<compile_context>
chip_gen: v7x
topology: tpu7x:2x2x1
jax: 0.10.0
libtpu: 0.0.40
codegen_flags: <defaults>
</compile_context>

<pallas_src>
import functools

import jax
import jax.numpy as jnp
from jax import lax
from jax.experimental import pallas as pl
from jax.experimental.pallas import tpu as pltpu


# ---------------------------------------------------------------------------
# Fused kernel: 6x (Conv1d k=3 pad=1 + folded BN + ReLU) + mean-pool + Linear
# ---------------------------------------------------------------------------
def _fused_head_kernel(x_ref, *refs, L):
    """One block of tb batch elements, batch folded into the matmul M axis.

    refs = (w1, s1, ..., w6, s6, wc, bc, out_ref)
      x_ref : (tb*L, D)          encoder features (f32 or bf16)
      w_i   : (3*Cin_i, Cout_i)  bf16 conv weights, taps stacked [prev; center; next],
                                 BatchNorm scale pre-folded
      s_i   : (1, Cout_i)        f32 folded shift (beta + (bias - mean)*scale)
      wc    : (C_last, 128k)     f32 classifier weight, lane-padded
      bc    : (1, 128k)          f32 classifier bias, lane-padded
      out   : (tb, 128k)         f32 logits (lane-padded)
    """
    *layer_refs, wc_ref, bc_ref, out_ref = refs
    M = x_ref.shape[0]          # tb * L rows in this block
    TB = M // L

    # Per-row sequence position; masks zero the conv halos at batch boundaries.
    pos = lax.broadcasted_iota(jnp.int32, (M, 1), 0) % L
    not_first = pos != 0            # row has a valid left neighbour  (l > 0)
    not_last = pos != (L - 1)       # row has a valid right neighbour (l < L-1)

    def conv_bn_relu(h, w_ref, s_ref):
        # k=3 conv as three accumulating matmuls against static slices of the
        # (3*Cin, Cout) weight (no im2col concat). bf16 MXU inputs, f32 accumulation.
        cin = w_ref.shape[0] // 3
        hc = h.astype(jnp.bfloat16)
        hp = jnp.where(not_first, pltpu.roll(h, shift=1, axis=0), 0.0
                       ).astype(jnp.bfloat16)              # x[l-1]
        hn = jnp.where(not_last, pltpu.roll(h, shift=M - 1, axis=0), 0.0
                       ).astype(jnp.bfloat16)               # x[l+1]
        acc = jnp.dot(hc, w_ref[cin:2 * cin, :], preferred_element_type=jnp.float32)
        acc = acc + jnp.dot(hp, w_ref[0:cin, :], preferred_element_type=jnp.float32)
        acc = acc + jnp.dot(hn, w_ref[2 * cin:3 * cin, :],
                            preferred_element_type=jnp.float32)
        return jnp.maximum(acc + s_ref[...], 0.0)

    h = x_ref[...].astype(jnp.float32)
    n_layers = len(layer_refs) // 2
    for i in range(n_layers):
        h = conv_bn_relu(h, layer_refs[2 * i], layer_refs[2 * i + 1])
    # (The duplicated back-to-back nn.ReLU in the PyTorch Sequential is a no-op.)

    # Mean over L: sublane reduction; avoids any O(TB^2) pooling matrix.
    c_last = h.shape[-1]
    pooled = h.reshape(TB, L, c_last).sum(axis=1) * (1.0 / L)      # (TB, C) f32

    logits = jnp.dot(pooled, wc_ref[...],
                     preferred_element_type=jnp.float32) + bc_ref[...]
    out_ref[...] = logits.astype(out_ref.dtype)


# ---------------------------------------------------------------------------
# Block / VMEM sizing heuristics
# ---------------------------------------------------------------------------
def _choose_batch_block(B, L, batch_block):
    """Pick the per-grid-step batch block tb.

    Legal tb: divides B and (tb % 8 == 0 or tb == B) so that both the (tb*L, D)
    input block and the (tb, 128) output block satisfy the (8, 128) block-shape rule.
    Heuristic: aim for >=2 grid steps (v7x megacore) and ~4 steps (DMA/compute
    overlap) while keeping tb*L in roughly [512, 2048] rows so every matmul has a
    tall M and the per-step working set fits v7x's 64 MiB VMEM.  Small batches
    (B < 16) fall back to a single whole-batch step.
    """
    legal = [t for t in range(1, B + 1) if B % t == 0 and (t % 8 == 0 or t == B)]
    if batch_block is not None:
        want = max(1, min(int(batch_block), B))
    else:
        want = max(512 // L, 1)
        want = max(want, B // 4)                 # prefer ~4 steps for big B
        want = min(want, max(2048 // L, 1))      # cap per-step rows (v7x VMEM)
        want = min(want, max(B // 2, 1))         # never a single step if avoidable
    cands = [t for t in legal if t <= want]
    return max(cands) if cands else min(legal)


def _vmem_limit_bytes():
    """Scoped-VMEM budget: ~3/4 of physical capacity, clamped to [32, 96] MiB
    (-> ~48 MiB on v7x's 64 MiB, ~96 MiB on v5e/v6e's 128 MiB)."""
    try:
        cap = int(getattr(pltpu.get_tpu_info(), "vmem_capacity_bytes",
                          64 * 1024 * 1024))
    except Exception:
        cap = 64 * 1024 * 1024
    return int(min(96 * 1024 * 1024, max(32 * 1024 * 1024, (cap * 3) // 4)))


# ---------------------------------------------------------------------------
# Wrapper
# ---------------------------------------------------------------------------
@functools.partial(jax.jit, static_argnames=("batch_block",))
def finetune_cnn_forward(x, conv_params, cls_params, batch_block=None):
    """x: (B, L, embedding_dim) encoder features (encoder treated as identity).

    Pass x as bf16 to halve the dominant HBM->VMEM DMA if the encoder allows it
    (f32 also accepted); all matmul accumulation stays f32 inside the kernel.
    """
    B, L, D = x.shape
    tb = _choose_batch_block(B, L, batch_block)

    wc, bc = cls_params
    nc = wc.shape[-1]
    # Lane-dense classifier output: pad columns to a multiple of 128 so the final
    # store is an unmasked vst; slice back to nc after the call.
    ncp = max(128, 128 * pl.cdiv(nc, 128))
    wc_p = jnp.zeros((wc.shape[0], ncp), jnp.float32).at[:, :nc].set(
        wc.astype(jnp.float32))
    bc_p = jnp.zeros((1, ncp), jnp.float32).at[:, :nc].set(
        bc.reshape(1, nc).astype(jnp.float32))

    x2d = x.reshape(B * L, D)   # fold batch into the matmul M axis

    args = [x2d]
    in_specs = [pl.BlockSpec((tb * L, D), lambda i: (i, 0))]
    flops = 0
    for w, s in conv_params:
        args += [w, s]
        # Constant index_map: fetched once, resident in VMEM across grid steps.
        in_specs += [pl.BlockSpec(w.shape, lambda i: (0, 0)),
                     pl.BlockSpec(s.shape, lambda i: (0, 0))]
        flops += 2 * B * L * w.shape[0] * w.shape[1]
    args += [wc_p, bc_p]
    in_specs += [pl.BlockSpec((wc.shape[0], ncp), lambda i: (0, 0)),
                 pl.BlockSpec((1, ncp), lambda i: (0, 0))]
    flops += 2 * B * wc.shape[0] * ncp

    bytes_accessed = x2d.size * jnp.dtype(x2d.dtype).itemsize + B * ncp * 4
    for a in args[1:]:
        bytes_accessed += a.size * jnp.dtype(a.dtype).itemsize

    kernel = functools.partial(_fused_head_kernel, L=L)
    out = pl.pallas_call(
        kernel,
        out_shape=jax.ShapeDtypeStruct((B, ncp), jnp.float32),
        grid=(B // tb,),
        in_specs=in_specs,
        out_specs=pl.BlockSpec((tb, ncp), lambda i: (i, 0)),
        compiler_params=pltpu.CompilerParams(
            dimension_semantics=("parallel",),
            vmem_limit_bytes=_vmem_limit_bytes()),
        cost_estimate=pl.CostEstimate(
            flops=int(flops), transcendentals=0,
            bytes_accessed=int(bytes_accessed)),
    )(*args)
    return out[:, :nc]


# ---------------------------------------------------------------------------
# Parameter construction (deterministic, mirrors FinetuneCNNModel.__init__).
# BatchNorm (eval mode) scale folds into the conv weight; bias/mean/beta fold
# into the per-channel shift.  Conv weights stored as (3*Cin, Cout) bf16 with
# taps stacked [prev; center; next].  (When loading a real PyTorch checkpoint,
# transpose Conv1d weights (Cout, Cin, 3) -> (3, Cin, Cout) before folding and
# use the checkpoint's running_mean / running_var.)
# ---------------------------------------------------------------------------
def make_params(key, embedding_dim=512, num_classes=10):
    d = embedding_dim
    layer_dims = [
        (d, d),
        (d, d // 2),
        (d // 2, d // 4),
        (d // 4, d // 4),
        (d // 4, d // 8),
        (d // 8, d // 8),
    ]
    eps = 1e-5
    conv_params = []
    for cin, cout in layer_dims:
        key, kw, kb = jax.random.split(key, 3)
        fan_in = cin * 3
        w = jax.random.normal(kw, (3, cin, cout), jnp.float32) / jnp.sqrt(fan_in)
        bias = jax.random.normal(kb, (cout,), jnp.float32) * 0.01
        # BatchNorm1d (eval-mode) default stats: gamma=1, beta=0, mean=0, var=1
        gamma = jnp.ones((cout,), jnp.float32)
        beta = jnp.zeros((cout,), jnp.float32)
        run_mean = jnp.zeros((cout,), jnp.float32)
        run_var = jnp.ones((cout,), jnp.float32)
        scale = gamma / jnp.sqrt(run_var + eps)
        shift = beta + (bias - run_mean) * scale
        w_folded = (w * scale[None, None, :]).reshape(3 * cin, cout)
        conv_params.append((w_folded.astype(jnp.bfloat16),
                            shift.reshape(1, cout).astype(jnp.float32)))

    key, kw, kb = jax.random.split(key, 3)
    wc = jax.random.normal(kw, (d // 8, num_classes), jnp.float32) / jnp.sqrt(d // 8)
    bc = jax.random.normal(kb, (1, num_classes), jnp.float32) * 0.01
    return conv_params, (wc, bc)


# ---------------------------------------------------------------------------
# Pure-JAX reference (same folded/bf16 numerics) for validation.
# ---------------------------------------------------------------------------
def reference_forward(x, conv_params, cls_params):
    h = x.astype(jnp.float32)                                        # (B, L, D)
    for w, s in conv_params:
        cin = w.shape[0] // 3
        wf = w.astype(jnp.float32)
        hb = h.astype(jnp.bfloat16).astype(jnp.float32)
        hp = jnp.pad(hb, ((0, 0), (1, 0), (0, 0)))[:, :-1, :]        # x[l-1]
        hn = jnp.pad(hb, ((0, 0), (0, 1), (0, 0)))[:, 1:, :]         # x[l+1]
        acc = (jnp.einsum("bld,dc->blc", hp, wf[:cin])
               + jnp.einsum("bld,dc->blc", hb, wf[cin:2 * cin])
               + jnp.einsum("bld,dc->blc", hn, wf[2 * cin:]))
        h = jnp.maximum(acc + s, 0.0)
    pooled = h.mean(axis=1)
    wc, bc = cls_params
    return pooled @ wc + bc


if __name__ == "__main__":
    B, L = 2, 8
    embedding_dim = 512
    num_classes = 10

    key = jax.random.PRNGKey(0)
    key, kx = jax.random.split(key)
    x = jax.random.normal(kx, (B, L, embedding_dim), jnp.float32)

    conv_params, cls_params = make_params(key, embedding_dim, num_classes)

    logits = finetune_cnn_forward(x, conv_params, cls_params)
    jax.block_until_ready(logits)
    assert logits.shape == (B, num_classes)

    ref = reference_forward(x, conv_params, cls_params)
    max_diff = float(jnp.max(jnp.abs(logits - ref)))
    assert jnp.allclose(logits, ref, rtol=2e-2, atol=2e-2), f"max_diff={max_diff}"

    print("KERNEL_OK")
</pallas_src>

<mosaic_0001>
module attributes {stable_mosaic.version = 11 : i64} {
  func.func @_fused_head_kernel(%arg0: i32, %arg1: memref<16x512xf32, #tpu.memory_space<vmem>>, %arg2: memref<1536x512xbf16, #tpu.memory_space<vmem>>, %arg3: memref<1x512xf32, #tpu.memory_space<vmem>>, %arg4: memref<1536x256xbf16, #tpu.memory_space<vmem>>, %arg5: memref<1x256xf32, #tpu.memory_space<vmem>>, %arg6: memref<768x128xbf16, #tpu.memory_space<vmem>>, %arg7: memref<1x128xf32, #tpu.memory_space<vmem>>, %arg8: memref<384x128xbf16, #tpu.memory_space<vmem>>, %arg9: memref<1x128xf32, #tpu.memory_space<vmem>>, %arg10: memref<384x64xbf16, #tpu.memory_space<vmem>>, %arg11: memref<1x64xf32, #tpu.memory_space<vmem>>, %arg12: memref<192x64xbf16, #tpu.memory_space<vmem>>, %arg13: memref<1x64xf32, #tpu.memory_space<vmem>>, %arg14: memref<64x128xf32, #tpu.memory_space<vmem>>, %arg15: memref<1x128xf32, #tpu.memory_space<vmem>>, %arg16: memref<2x128xf32, #tpu.memory_space<vmem>>) attributes {dimension_semantics = [#tpu.dimension_semantics<parallel>], iteration_bounds = array<i64: 1>, scalar_prefetch = 0 : i64, scratch_operands = 0 : i64, tpu.core_type = #tpu.core_type<tc>, window_params = [{transform_indices = @transform_0, window_bounds = array<i64: 16, 512>}, {pipeline_mode = #tpu.pipeline_mode<synchronous>, transform_indices = @transform_1, window_bounds = array<i64: 1536, 512>}, {pipeline_mode = #tpu.pipeline_mode<synchronous>, transform_indices = @transform_2, window_bounds = array<i64: 1, 512>}, {pipeline_mode = #tpu.pipeline_mode<synchronous>, transform_indices = @transform_3, window_bounds = array<i64: 1536, 256>}, {pipeline_mode = #tpu.pipeline_mode<synchronous>, transform_indices = @transform_4, window_bounds = array<i64: 1, 256>}, {pipeline_mode = #tpu.pipeline_mode<synchronous>, transform_indices = @transform_5, window_bounds = array<i64: 768, 128>}, {pipeline_mode = #tpu.pipeline_mode<synchronous>, transform_indices = @transform_6, window_bounds = array<i64: 1, 128>}, {pipeline_mode = #tpu.pipeline_mode<synchronous>, transform_indices = @transform_7, window_bounds = array<i64: 384, 128>}, {pipeline_mode = #tpu.pipeline_mode<synchronous>, transform_indices = @transform_8, window_bounds = array<i64: 1, 128>}, {pipeline_mode = #tpu.pipeline_mode<synchronous>, transform_indices = @transform_9, window_bounds = array<i64: 384, 64>}, {pipeline_mode = #tpu.pipeline_mode<synchronous>, transform_indices = @transform_10, window_bounds = array<i64: 1, 64>}, {pipeline_mode = #tpu.pipeline_mode<synchronous>, transform_indices = @transform_11, window_bounds = array<i64: 192, 64>}, {pipeline_mode = #tpu.pipeline_mode<synchronous>, transform_indices = @transform_12, window_bounds = array<i64: 1, 64>}, {pipeline_mode = #tpu.pipeline_mode<synchronous>, transform_indices = @transform_13, window_bounds = array<i64: 64, 128>}, {pipeline_mode = #tpu.pipeline_mode<synchronous>, transform_indices = @transform_14, window_bounds = array<i64: 1, 128>}, {transform_indices = @transform_15, window_bounds = array<i64: 2, 128>}]} {
    %0 = tpu.iota {dimensions = array<i32: 0>} : vector<16x1xi32>
    %c8_i32 = arith.constant 8 : i32
    %c0_i32 = arith.constant 0 : i32
    %1 = arith.cmpi eq, %c8_i32, %c0_i32 : i32
    %c1_i32 = arith.constant 1 : i32
    %2 = arith.select %1, %c1_i32, %c8_i32 : i32
    %3 = vector.broadcast %2 : i32 to vector<16x1xi32>
    %4 = arith.remsi %0, %3 : vector<16x1xi32>
    %c0_i32_0 = arith.constant 0 : i32
    %5 = vector.broadcast %c0_i32_0 : i32 to vector<16x1xi32>
    %6 = arith.cmpi ne, %4, %5 : vector<16x1xi32>
    %c0_i32_1 = arith.constant 0 : i32
    %7 = vector.broadcast %c0_i32_1 : i32 to vector<16x1xi32>
    %8 = arith.cmpi slt, %4, %7 : vector<16x1xi32>
    %c0_i32_2 = arith.constant 0 : i32
    %9 = arith.cmpi slt, %2, %c0_i32_2 : i32
    %10 = vector.broadcast %9 : i1 to vector<16x1xi1>
    %11 = vector.broadcast %10 : vector<16x1xi1> to vector<16x1xi1>
    %12 = arith.xori %8, %11 : vector<16x1xi1>
    %13 = arith.andi %12, %6 : vector<16x1xi1>
    %14 = vector.broadcast %2 : i32 to vector<16x1xi32>
    %15 = arith.addi %4, %14 : vector<16x1xi32>
    %16 = arith.select %13, %15, %4 : vector<16x1xi1>, vector<16x1xi32>
    %c0_i32_3 = arith.constant 0 : i32
    %17 = vector.broadcast %c0_i32_3 : i32 to vector<16x1xi32>
    %18 = arith.cmpi ne, %16, %17 : vector<16x1xi32>
    %c7_i32 = arith.constant 7 : i32
    %19 = vector.broadcast %c7_i32 : i32 to vector<16x1xi32>
    %20 = arith.cmpi ne, %16, %19 : vector<16x1xi32>
    %c0 = arith.constant 0 : index
    %c0_4 = arith.constant 0 : index
    %21 = vector.load %arg1[%c0, %c0_4] : memref<16x512xf32, #tpu.memory_space<vmem>>, vector<16x512xf32>
    %22 = arith.truncf %21 : vector<16x512xf32> to vector<16x512xbf16>
    %c1_i32_5 = arith.constant 1 : i32
    %23 = tpu.dynamic_rotate %21 by %c1_i32_5 dim 0 : vector<16x512xf32>, i32 -> vector<16x512xf32>
    %cst = arith.constant 0.000000e+00 : f32
    %24 = vector.shape_cast %18 : vector<16x1xi1> to vector<16x1xi1>
    %25 = vector.broadcast %24 : vector<16x1xi1> to vector<16x512xi1>
    %26 = vector.broadcast %cst : f32 to vector<16x512xf32>
    %27 = arith.select %25, %23, %26 : vector<16x512xi1>, vector<16x512xf32>
    %28 = arith.truncf %27 : vector<16x512xf32> to vector<16x512xbf16>
    %c15_i32 = arith.constant 15 : i32
    %29 = tpu.dynamic_rotate %21 by %c15_i32 dim 0 : vector<16x512xf32>, i32 -> vector<16x512xf32>
    %cst_6 = arith.constant 0.000000e+00 : f32
    %30 = vector.shape_cast %20 : vector<16x1xi1> to vector<16x1xi1>
    %31 = vector.broadcast %30 : vector<16x1xi1> to vector<16x512xi1>
    %32 = vector.broadcast %cst_6 : f32 to vector<16x512xf32>
    %33 = arith.select %31, %29, %32 : vector<16x512xi1>, vector<16x512xf32>
    %34 = arith.truncf %33 : vector<16x512xf32> to vector<16x512xbf16>
    %c512 = arith.constant 512 : index
    %c0_7 = arith.constant 0 : index
    %35 = vector.load %arg2[%c512, %c0_7] : memref<1536x512xbf16, #tpu.memory_space<vmem>>, vector<512x512xbf16>
    %cst_8 = arith.constant dense<0.000000e+00> : vector<16x512xf32>
    %36 = tpu.matmul %22, %35, %cst_8 {dimension_numbers = #tpu.dot_dimension_numbers<[1], [0], [0], [1], [0, 0, 1, 1], [], []>} : vector<16x512xbf16>, vector<512x512xbf16>, vector<16x512xf32> -> vector<16x512xf32>
    %c0_9 = arith.constant 0 : index
    %c0_10 = arith.constant 0 : index
    %37 = vector.load %arg2[%c0_9, %c0_10] : memref<1536x512xbf16, #tpu.memory_space<vmem>>, vector<512x512xbf16>
    %cst_11 = arith.constant dense<0.000000e+00> : vector<16x512xf32>
    %38 = tpu.matmul %28, %37, %cst_11 {dimension_numbers = #tpu.dot_dimension_numbers<[1], [0], [0], [1], [0, 0, 1, 1], [], []>} : vector<16x512xbf16>, vector<512x512xbf16>, vector<16x512xf32> -> vector<16x512xf32>
    %39 = arith.addf %36, %38 : vector<16x512xf32>
    %c1024 = arith.constant 1024 : index
    %c0_12 = arith.constant 0 : index
    %40 = vector.load %arg2[%c1024, %c0_12] : memref<1536x512xbf16, #tpu.memory_space<vmem>>, vector<512x512xbf16>
    %cst_13 = arith.constant dense<0.000000e+00> : vector<16x512xf32>
    %41 = tpu.matmul %34, %40, %cst_13 {dimension_numbers = #tpu.dot_dimension_numbers<[1], [0], [0], [1], [0, 0, 1, 1], [], []>} : vector<16x512xbf16>, vector<512x512xbf16>, vector<16x512xf32> -> vector<16x512xf32>
    %42 = arith.addf %39, %41 : vector<16x512xf32>
    %c0_14 = arith.constant 0 : index
    %c0_15 = arith.constant 0 : index
    %43 = vector.load %arg3[%c0_14, %c0_15] : memref<1x512xf32, #tpu.memory_space<vmem>>, vector<1x512xf32>
    %44 = vector.broadcast %43 : vector<1x512xf32> to vector<16x512xf32>
    %45 = arith.addf %42, %44 : vector<16x512xf32>
    %cst_16 = arith.constant 0.000000e+00 : f32
    %46 = vector.broadcast %cst_16 : f32 to vector<16x512xf32>
    %47 = arith.maximumf %45, %46 : vector<16x512xf32>
    %48 = arith.truncf %47 : vector<16x512xf32> to vector<16x512xbf16>
    %c1_i32_17 = arith.constant 1 : i32
    %49 = tpu.dynamic_rotate %47 by %c1_i32_17 dim 0 : vector<16x512xf32>, i32 -> vector<16x512xf32>
    %cst_18 = arith.constant 0.000000e+00 : f32
    %50 = vector.shape_cast %18 : vector<16x1xi1> to vector<16x1xi1>
    %51 = vector.broadcast %50 : vector<16x1xi1> to vector<16x512xi1>
    %52 = vector.broadcast %cst_18 : f32 to vector<16x512xf32>
    %53 = arith.select %51, %49, %52 : vector<16x512xi1>, vector<16x512xf32>
    %54 = arith.truncf %53 : vector<16x512xf32> to vector<16x512xbf16>
    %c15_i32_19 = arith.constant 15 : i32
    %55 = tpu.dynamic_rotate %47 by %c15_i32_19 dim 0 : vector<16x512xf32>, i32 -> vector<16x512xf32>
    %cst_20 = arith.constant 0.000000e+00 : f32
    %56 = vector.shape_cast %20 : vector<16x1xi1> to vector<16x1xi1>
    %57 = vector.broadcast %56 : vector<16x1xi1> to vector<16x512xi1>
    %58 = vector.broadcast %cst_20 : f32 to vector<16x512xf32>
    %59 = arith.select %57, %55, %58 : vector<16x512xi1>, vector<16x512xf32>
    %60 = arith.truncf %59 : vector<16x512xf32> to vector<16x512xbf16>
    %c512_21 = arith.constant 512 : index
    %c0_22 = arith.constant 0 : index
    %61 = vector.load %arg4[%c512_21, %c0_22] : memref<1536x256xbf16, #tpu.memory_space<vmem>>, vector<512x256xbf16>
    %cst_23 = arith.constant dense<0.000000e+00> : vector<16x256xf32>
    %62 = tpu.matmul %48, %61, %cst_23 {dimension_numbers = #tpu.dot_dimension_numbers<[1], [0], [0], [1], [0, 0, 1, 1], [], []>} : vector<16x512xbf16>, vector<512x256xbf16>, vector<16x256xf32> -> vector<16x256xf32>
    %c0_24 = arith.constant 0 : index
    %c0_25 = arith.constant 0 : index
    %63 = vector.load %arg4[%c0_24, %c0_25] : memref<1536x256xbf16, #tpu.memory_space<vmem>>, vector<512x256xbf16>
    %cst_26 = arith.constant dense<0.000000e+00> : vector<16x256xf32>
    %64 = tpu.matmul %54, %63, %cst_26 {dimension_numbers = #tpu.dot_dimension_numbers<[1], [0], [0], [1], [0, 0, 1, 1], [], []>} : vector<16x512xbf16>, vector<512x256xbf16>, vector<16x256xf32> -> vector<16x256xf32>
    %65 = arith.addf %62, %64 : vector<16x256xf32>
    %c1024_27 = arith.constant 1024 : index
    %c0_28 = arith.constant 0 : index
    %66 = vector.load %arg4[%c1024_27, %c0_28] : memref<1536x256xbf16, #tpu.memory_space<vmem>>, vector<512x256xbf16>
    %cst_29 = arith.constant dense<0.000000e+00> : vector<16x256xf32>
    %67 = tpu.matmul %60, %66, %cst_29 {dimension_numbers = #tpu.dot_dimension_numbers<[1], [0], [0], [1], [0, 0, 1, 1], [], []>} : vector<16x512xbf16>, vector<512x256xbf16>, vector<16x256xf32> -> vector<16x256xf32>
    %68 = arith.addf %65, %67 : vector<16x256xf32>
    %c0_30 = arith.constant 0 : index
    %c0_31 = arith.constant 0 : index
    %69 = vector.load %arg5[%c0_30, %c0_31] : memref<1x256xf32, #tpu.memory_space<vmem>>, vector<1x256xf32>
    %70 = vector.broadcast %69 : vector<1x256xf32> to vector<16x256xf32>
    %71 = arith.addf %68, %70 : vector<16x256xf32>
    %cst_32 = arith.constant 0.000000e+00 : f32
    %72 = vector.broadcast %cst_32 : f32 to vector<16x256xf32>
    %73 = arith.maximumf %71, %72 : vector<16x256xf32>
    %74 = arith.truncf %73 : vector<16x256xf32> to vector<16x256xbf16>
    %c1_i32_33 = arith.constant 1 : i32
    %75 = tpu.dynamic_rotate %73 by %c1_i32_33 dim 0 : vector<16x256xf32>, i32 -> vector<16x256xf32>
    %cst_34 = arith.constant 0.000000e+00 : f32
    %76 = vector.shape_cast %18 : vector<16x1xi1> to vector<16x1xi1>
    %77 = vector.broadcast %76 : vector<16x1xi1> to vector<16x256xi1>
    %78 = vector.broadcast %cst_34 : f32 to vector<16x256xf32>
    %79 = arith.select %77, %75, %78 : vector<16x256xi1>, vector<16x256xf32>
    %80 = arith.truncf %79 : vector<16x256xf32> to vector<16x256xbf16>
    %c15_i32_35 = arith.constant 15 : i32
    %81 = tpu.dynamic_rotate %73 by %c15_i32_35 dim 0 : vector<16x256xf32>, i32 -> vector<16x256xf32>
    %cst_36 = arith.constant 0.000000e+00 : f32
    %82 = vector.shape_cast %20 : vector<16x1xi1> to vector<16x1xi1>
    %83 = vector.broadcast %82 : vector<16x1xi1> to vector<16x256xi1>
    %84 = vector.broadcast %cst_36 : f32 to vector<16x256xf32>
    %85 = arith.select %83, %81, %84 : vector<16x256xi1>, vector<16x256xf32>
    %86 = arith.truncf %85 : vector<16x256xf32> to vector<16x256xbf16>
    %c256 = arith.constant 256 : index
    %c0_37 = arith.constant 0 : index
    %87 = vector.load %arg6[%c256, %c0_37] : memref<768x128xbf16, #tpu.memory_space<vmem>>, vector<256x128xbf16>
    %cst_38 = arith.constant dense<0.000000e+00> : vector<16x128xf32>
    %88 = tpu.matmul %74, %87, %cst_38 {dimension_numbers = #tpu.dot_dimension_numbers<[1], [0], [0], [1], [0, 0, 1, 1], [], []>} : vector<16x256xbf16>, vector<256x128xbf16>, vector<16x128xf32> -> vector<16x128xf32>
    %c0_39 = arith.constant 0 : index
    %c0_40 = arith.constant 0 : index
    %89 = vector.load %arg6[%c0_39, %c0_40] : memref<768x128xbf16, #tpu.memory_space<vmem>>, vector<256x128xbf16>
    %cst_41 = arith.constant dense<0.000000e+00> : vector<16x128xf32>
    %90 = tpu.matmul %80, %89, %cst_41 {dimension_numbers = #tpu.dot_dimension_numbers<[1], [0], [0], [1], [0, 0, 1, 1], [], []>} : vector<16x256xbf16>, vector<256x128xbf16>, vector<16x128xf32> -> vector<16x128xf32>
    %91 = arith.addf %88, %90 : vector<16x128xf32>
    %c512_42 = arith.constant 512 : index
    %c0_43 = arith.constant 0 : index
    %92 = vector.load %arg6[%c512_42, %c0_43] : memref<768x128xbf16, #tpu.memory_space<vmem>>, vector<256x128xbf16>
    %cst_44 = arith.constant dense<0.000000e+00> : vector<16x128xf32>
    %93 = tpu.matmul %86, %92, %cst_44 {dimension_numbers = #tpu.dot_dimension_numbers<[1], [0], [0], [1], [0, 0, 1, 1], [], []>} : vector<16x256xbf16>, vector<256x128xbf16>, vector<16x128xf32> -> vector<16x128xf32>
    %94 = arith.addf %91, %93 : vector<16x128xf32>
    %c0_45 = arith.constant 0 : index
    %c0_46 = arith.constant 0 : index
    %95 = vector.load %arg7[%c0_45, %c0_46] : memref<1x128xf32, #tpu.memory_space<vmem>>, vector<1x128xf32>
    %96 = vector.broadcast %95 : vector<1x128xf32> to vector<16x128xf32>
    %97 = arith.addf %94, %96 : vector<16x128xf32>
    %cst_47 = arith.constant 0.000000e+00 : f32
    %98 = vector.broadcast %cst_47 : f32 to vector<16x128xf32>
    %99 = arith.maximumf %97, %98 : vector<16x128xf32>
    %100 = arith.truncf %99 : vector<16x128xf32> to vector<16x128xbf16>
    %c1_i32_48 = arith.constant 1 : i32
    %101 = tpu.dynamic_rotate %99 by %c1_i32_48 dim 0 : vector<16x128xf32>, i32 -> vector<16x128xf32>
    %cst_49 = arith.constant 0.000000e+00 : f32
    %102 = vector.shape_cast %18 : vector<16x1xi1> to vector<16x1xi1>
    %103 = vector.broadcast %102 : vector<16x1xi1> to vector<16x128xi1>
    %104 = vector.broadcast %cst_49 : f32 to vector<16x128xf32>
    %105 = arith.select %103, %101, %104 : vector<16x128xi1>, vector<16x128xf32>
    %106 = arith.truncf %105 : vector<16x128xf32> to vector<16x128xbf16>
    %c15_i32_50 = arith.constant 15 : i32
    %107 = tpu.dynamic_rotate %99 by %c15_i32_50 dim 0 : vector<16x128xf32>, i32 -> vector<16x128xf32>
    %cst_51 = arith.constant 0.000000e+00 : f32
    %108 = vector.shape_cast %20 : vector<16x1xi1> to vector<16x1xi1>
    %109 = vector.broadcast %108 : vector<16x1xi1> to vector<16x128xi1>
    %110 = vector.broadcast %cst_51 : f32 to vector<16x128xf32>
    %111 = arith.select %109, %107, %110 : vector<16x128xi1>, vector<16x128xf32>
    %112 = arith.truncf %111 : vector<16x128xf32> to vector<16x128xbf16>
    %c128 = arith.constant 128 : index
    %c0_52 = arith.constant 0 : index
    %113 = vector.load %arg8[%c128, %c0_52] : memref<384x128xbf16, #tpu.memory_space<vmem>>, vector<128x128xbf16>
    %cst_53 = arith.constant dense<0.000000e+00> : vector<16x128xf32>
    %114 = tpu.matmul %100, %113, %cst_53 {dimension_numbers = #tpu.dot_dimension_numbers<[1], [0], [0], [1], [0, 0, 1, 1], [], []>} : vector<16x128xbf16>, vector<128x128xbf16>, vector<16x128xf32> -> vector<16x128xf32>
    %c0_54 = arith.constant 0 : index
    %c0_55 = arith.constant 0 : index
    %115 = vector.load %arg8[%c0_54, %c0_55] : memref<384x128xbf16, #tpu.memory_space<vmem>>, vector<128x128xbf16>
    %cst_56 = arith.constant dense<0.000000e+00> : vector<16x128xf32>
    %116 = tpu.matmul %106, %115, %cst_56 {dimension_numbers = #tpu.dot_dimension_numbers<[1], [0], [0], [1], [0, 0, 1, 1], [], []>} : vector<16x128xbf16>, vector<128x128xbf16>, vector<16x128xf32> -> vector<16x128xf32>
    %117 = arith.addf %114, %116 : vector<16x128xf32>
    %c256_57 = arith.constant 256 : index
    %c0_58 = arith.constant 0 : index
    %118 = vector.load %arg8[%c256_57, %c0_58] : memref<384x128xbf16, #tpu.memory_space<vmem>>, vector<128x128xbf16>
    %cst_59 = arith.constant dense<0.000000e+00> : vector<16x128xf32>
    %119 = tpu.matmul %112, %118, %cst_59 {dimension_numbers = #tpu.dot_dimension_numbers<[1], [0], [0], [1], [0, 0, 1, 1], [], []>} : vector<16x128xbf16>, vector<128x128xbf16>, vector<16x128xf32> -> vector<16x128xf32>
    %120 = arith.addf %117, %119 : vector<16x128xf32>
    %c0_60 = arith.constant 0 : index
    %c0_61 = arith.constant 0 : index
    %121 = vector.load %arg9[%c0_60, %c0_61] : memref<1x128xf32, #tpu.memory_space<vmem>>, vector<1x128xf32>
    %122 = vector.broadcast %121 : vector<1x128xf32> to vector<16x128xf32>
    %123 = arith.addf %120, %122 : vector<16x128xf32>
    %cst_62 = arith.constant 0.000000e+00 : f32
    %124 = vector.broadcast %cst_62 : f32 to vector<16x128xf32>
    %125 = arith.maximumf %123, %124 : vector<16x128xf32>
    %126 = arith.truncf %125 : vector<16x128xf32> to vector<16x128xbf16>
    %c1_i32_63 = arith.constant 1 : i32
    %127 = tpu.dynamic_rotate %125 by %c1_i32_63 dim 0 : vector<16x128xf32>, i32 -> vector<16x128xf32>
    %cst_64 = arith.constant 0.000000e+00 : f32
    %128 = vector.shape_cast %18 : vector<16x1xi1> to vector<16x1xi1>
    %129 = vector.broadcast %128 : vector<16x1xi1> to vector<16x128xi1>
    %130 = vector.broadcast %cst_64 : f32 to vector<16x128xf32>
    %131 = arith.select %129, %127, %130 : vector<16x128xi1>, vector<16x128xf32>
    %132 = arith.truncf %131 : vector<16x128xf32> to vector<16x128xbf16>
    %c15_i32_65 = arith.constant 15 : i32
    %133 = tpu.dynamic_rotate %125 by %c15_i32_65 dim 0 : vector<16x128xf32>, i32 -> vector<16x128xf32>
    %cst_66 = arith.constant 0.000000e+00 : f32
    %134 = vector.shape_cast %20 : vector<16x1xi1> to vector<16x1xi1>
    %135 = vector.broadcast %134 : vector<16x1xi1> to vector<16x128xi1>
    %136 = vector.broadcast %cst_66 : f32 to vector<16x128xf32>
    %137 = arith.select %135, %133, %136 : vector<16x128xi1>, vector<16x128xf32>
    %138 = arith.truncf %137 : vector<16x128xf32> to vector<16x128xbf16>
    %c128_67 = arith.constant 128 : index
    %c0_68 = arith.constant 0 : index
    %139 = vector.load %arg10[%c128_67, %c0_68] : memref<384x64xbf16, #tpu.memory_space<vmem>>, vector<128x64xbf16>
    %cst_69 = arith.constant dense<0.000000e+00> : vector<16x64xf32>
    %140 = tpu.matmul %126, %139, %cst_69 {dimension_numbers = #tpu.dot_dimension_numbers<[1], [0], [0], [1], [0, 0, 1, 1], [], []>} : vector<16x128xbf16>, vector<128x64xbf16>, vector<16x64xf32> -> vector<16x64xf32>
    %c0_70 = arith.constant 0 : index
    %c0_71 = arith.constant 0 : index
    %141 = vector.load %arg10[%c0_70, %c0_71] : memref<384x64xbf16, #tpu.memory_space<vmem>>, vector<128x64xbf16>
    %cst_72 = arith.constant dense<0.000000e+00> : vector<16x64xf32>
    %142 = tpu.matmul %132, %141, %cst_72 {dimension_numbers = #tpu.dot_dimension_numbers<[1], [0], [0], [1], [0, 0, 1, 1], [], []>} : vector<16x128xbf16>, vector<128x64xbf16>, vector<16x64xf32> -> vector<16x64xf32>
    %143 = arith.addf %140, %142 : vector<16x64xf32>
    %c256_73 = arith.constant 256 : index
    %c0_74 = arith.constant 0 : index
    %144 = vector.load %arg10[%c256_73, %c0_74] : memref<384x64xbf16, #tpu.memory_space<vmem>>, vector<128x64xbf16>
    %cst_75 = arith.constant dense<0.000000e+00> : vector<16x64xf32>
    %145 = tpu.matmul %138, %144, %cst_75 {dimension_numbers = #tpu.dot_dimension_numbers<[1], [0], [0], [1], [0, 0, 1, 1], [], []>} : vector<16x128xbf16>, vector<128x64xbf16>, vector<16x64xf32> -> vector<16x64xf32>
    %146 = arith.addf %143, %145 : vector<16x64xf32>
    %c0_76 = arith.constant 0 : index
    %c0_77 = arith.constant 0 : index
    %147 = vector.load %arg11[%c0_76, %c0_77] : memref<1x64xf32, #tpu.memory_space<vmem>>, vector<1x64xf32>
    %148 = vector.broadcast %147 : vector<1x64xf32> to vector<16x64xf32>
    %149 = arith.addf %146, %148 : vector<16x64xf32>
    %cst_78 = arith.constant 0.000000e+00 : f32
    %150 = vector.broadcast %cst_78 : f32 to vector<16x64xf32>
    %151 = arith.maximumf %149, %150 : vector<16x64xf32>
    %152 = arith.truncf %151 : vector<16x64xf32> to vector<16x64xbf16>
    %c1_i32_79 = arith.constant 1 : i32
    %153 = tpu.dynamic_rotate %151 by %c1_i32_79 dim 0 : vector<16x64xf32>, i32 -> vector<16x64xf32>
    %cst_80 = arith.constant 0.000000e+00 : f32
    %154 = vector.shape_cast %18 : vector<16x1xi1> to vector<16x1xi1>
    %155 = vector.broadcast %154 : vector<16x1xi1> to vector<16x64xi1>
    %156 = vector.broadcast %cst_80 : f32 to vector<16x64xf32>
    %157 = arith.select %155, %153, %156 : vector<16x64xi1>, vector<16x64xf32>
    %158 = arith.truncf %157 : vector<16x64xf32> to vector<16x64xbf16>
    %c15_i32_81 = arith.constant 15 : i32
    %159 = tpu.dynamic_rotate %151 by %c15_i32_81 dim 0 : vector<16x64xf32>, i32 -> vector<16x64xf32>
    %cst_82 = arith.constant 0.000000e+00 : f32
    %160 = vector.shape_cast %20 : vector<16x1xi1> to vector<16x1xi1>
    %161 = vector.broadcast %160 : vector<16x1xi1> to vector<16x64xi1>
    %162 = vector.broadcast %cst_82 : f32 to vector<16x64xf32>
    %163 = arith.select %161, %159, %162 : vector<16x64xi1>, vector<16x64xf32>
    %164 = arith.truncf %163 : vector<16x64xf32> to vector<16x64xbf16>
    %c64 = arith.constant 64 : index
    %c0_83 = arith.constant 0 : index
    %165 = vector.load %arg12[%c64, %c0_83] : memref<192x64xbf16, #tpu.memory_space<vmem>>, vector<64x64xbf16>
    %cst_84 = arith.constant dense<0.000000e+00> : vector<16x64xf32>
    %166 = tpu.matmul %152, %165, %cst_84 {dimension_numbers = #tpu.dot_dimension_numbers<[1], [0], [0], [1], [0, 0, 1, 1], [], []>} : vector<16x64xbf16>, vector<64x64xbf16>, vector<16x64xf32> -> vector<16x64xf32>
    %c0_85 = arith.constant 0 : index
    %c0_86 = arith.constant 0 : index
    %167 = vector.load %arg12[%c0_85, %c0_86] : memref<192x64xbf16, #tpu.memory_space<vmem>>, vector<64x64xbf16>
    %cst_87 = arith.constant dense<0.000000e+00> : vector<16x64xf32>
    %168 = tpu.matmul %158, %167, %cst_87 {dimension_numbers = #tpu.dot_dimension_numbers<[1], [0], [0], [1], [0, 0, 1, 1], [], []>} : vector<16x64xbf16>, vector<64x64xbf16>, vector<16x64xf32> -> vector<16x64xf32>
    %169 = arith.addf %166, %168 : vector<16x64xf32>
    %c128_88 = arith.constant 128 : index
    %c0_89 = arith.constant 0 : index
    %170 = vector.load %arg12[%c128_88, %c0_89] : memref<192x64xbf16, #tpu.memory_space<vmem>>, vector<64x64xbf16>
    %cst_90 = arith.constant dense<0.000000e+00> : vector<16x64xf32>
    %171 = tpu.matmul %164, %170, %cst_90 {dimension_numbers = #tpu.dot_dimension_numbers<[1], [0], [0], [1], [0, 0, 1, 1], [], []>} : vector<16x64xbf16>, vector<64x64xbf16>, vector<16x64xf32> -> vector<16x64xf32>
    %172 = arith.addf %169, %171 : vector<16x64xf32>
    %c0_91 = arith.constant 0 : index
    %c0_92 = arith.constant 0 : index
    %173 = vector.load %arg13[%c0_91, %c0_92] : memref<1x64xf32, #tpu.memory_space<vmem>>, vector<1x64xf32>
    %174 = vector.broadcast %173 : vector<1x64xf32> to vector<16x64xf32>
    %175 = arith.addf %172, %174 : vector<16x64xf32>
    %cst_93 = arith.constant 0.000000e+00 : f32
    %176 = vector.broadcast %cst_93 : f32 to vector<16x64xf32>
    %177 = arith.maximumf %175, %176 : vector<16x64xf32>
    %178 = vector.shape_cast %177 : vector<16x64xf32> to vector<2x8x64xf32>
    %cst_94 = arith.constant dense<0.000000e+00> : vector<2x64xf32>
    %179 = vector.multi_reduction <add>, %178, %cst_94 [1] : vector<2x8x64xf32> to vector<2x64xf32>
    %cst_95 = arith.constant 1.250000e-01 : f32
    %180 = vector.broadcast %cst_95 : f32 to vector<2x64xf32>
    %181 = arith.mulf %179, %180 : vector<2x64xf32>
    %c0_96 = arith.constant 0 : index
    %c0_97 = arith.constant 0 : index
    %182 = vector.load %arg14[%c0_96, %c0_97] : memref<64x128xf32, #tpu.memory_space<vmem>>, vector<64x128xf32>
    %cst_98 = arith.constant dense<0.000000e+00> : vector<2x128xf32>
    %183 = tpu.matmul %181, %182, %cst_98 {dimension_numbers = #tpu.dot_dimension_numbers<[1], [0], [0], [1], [0, 0, 1, 1], [], []>} : vector<2x64xf32>, vector<64x128xf32>, vector<2x128xf32> -> vector<2x128xf32>
    %c0_99 = arith.constant 0 : index
    %c0_100 = arith.constant 0 : index
    %184 = vector.load %arg15[%c0_99, %c0_100] : memref<1x128xf32, #tpu.memory_space<vmem>>, vector<1x128xf32>
    %185 = vector.broadcast %184 : vector<1x128xf32> to vector<2x128xf32>
    %186 = arith.addf %183, %185 : vector<2x128xf32>
    %c0_101 = arith.constant 0 : index
    %c0_102 = arith.constant 0 : index
    %187 = vector.load %arg16[%c0_101, %c0_102] : memref<2x128xf32, #tpu.memory_space<vmem>>, vector<2x128xf32>
    tpu.vector_store %arg16[%c0_101, %c0_102], %186 {strides = array<i32>} : memref<2x128xf32, #tpu.memory_space<vmem>>, vector<2x128xf32>,
    return
  }
  func.func @transform_0(%arg0: i32) -> (i32, i32) {
    %c0_i32 = arith.constant 0 : i32
    %c0_i32_0 = arith.constant 0 : i32
    return %arg0, %c0_i32 : i32, i32
  }
  func.func @transform_1(%arg0: i32) -> (i32, i32) {
    %c0_i32 = arith.constant 0 : i32
    %c0_i32_0 = arith.constant 0 : i32
    %c0_i32_1 = arith.constant 0 : i32
    return %c0_i32, %c0_i32_0 : i32, i32
  }
  func.func @transform_2(%arg0: i32) -> (i32, i32) {
    %c0_i32 = arith.constant 0 : i32
    %c0_i32_0 = arith.constant 0 : i32
    %c0_i32_1 = arith.constant 0 : i32
    return %c0_i32, %c0_i32_0 : i32, i32
  }
  func.func @transform_3(%arg0: i32) -> (i32, i32) {
    %c0_i32 = arith.constant 0 : i32
    %c0_i32_0 = arith.constant 0 : i32
    %c0_i32_1 = arith.constant 0 : i32
    return %c0_i32, %c0_i32_0 : i32, i32
  }
  func.func @transform_4(%arg0: i32) -> (i32, i32) {
    %c0_i32 = arith.constant 0 : i32
    %c0_i32_0 = arith.constant 0 : i32
    %c0_i32_1 = arith.constant 0 : i32
    return %c0_i32, %c0_i32_0 : i32, i32
  }
  func.func @transform_5(%arg0: i32) -> (i32, i32) {
    %c0_i32 = arith.constant 0 : i32
    %c0_i32_0 = arith.constant 0 : i32
    %c0_i32_1 = arith.constant 0 : i32
    return %c0_i32, %c0_i32_0 : i32, i32
  }
  func.func @transform_6(%arg0: i32) -> (i32, i32) {
    %c0_i32 = arith.constant 0 : i32
    %c0_i32_0 = arith.constant 0 : i32
    %c0_i32_1 = arith.constant 0 : i32
    return %c0_i32, %c0_i32_0 : i32, i32
  }
  func.func @transform_7(%arg0: i32) -> (i32, i32) {
    %c0_i32 = arith.constant 0 : i32
    %c0_i32_0 = arith.constant 0 : i32
    %c0_i32_1 = arith.constant 0 : i32
    return %c0_i32, %c0_i32_0 : i32, i32
  }
  func.func @transform_8(%arg0: i32) -> (i32, i32) {
    %c0_i32 = arith.constant 0 : i32
    %c0_i32_0 = arith.constant 0 : i32
    %c0_i32_1 = arith.constant 0 : i32
    return %c0_i32, %c0_i32_0 : i32, i32
  }
  func.func @transform_9(%arg0: i32) -> (i32, i32) {
    %c0_i32 = arith.constant 0 : i32
    %c0_i32_0 = arith.constant 0 : i32
    %c0_i32_1 = arith.constant 0 : i32
    return %c0_i32, %c0_i32_0 : i32, i32
  }
  func.func @transform_10(%arg0: i32) -> (i32, i32) {
    %c0_i32 = arith.constant 0 : i32
    %c0_i32_0 = arith.constant 0 : i32
    %c0_i32_1 = arith.constant 0 : i32
    return %c0_i32, %c0_i32_0 : i32, i32
  }
  func.func @transform_11(%arg0: i32) -> (i32, i32) {
    %c0_i32 = arith.constant 0 : i32
    %c0_i32_0 = arith.constant 0 : i32
    %c0_i32_1 = arith.constant 0 : i32
    return %c0_i32, %c0_i32_0 : i32, i32
  }
  func.func @transform_12(%arg0: i32) -> (i32, i32) {
    %c0_i32 = arith.constant 0 : i32
    %c0_i32_0 = arith.constant 0 : i32
    %c0_i32_1 = arith.constant 0 : i32
    return %c0_i32, %c0_i32_0 : i32, i32
  }
  func.func @transform_13(%arg0: i32) -> (i32, i32) {
    %c0_i32 = arith.constant 0 : i32
    %c0_i32_0 = arith.constant 0 : i32
    %c0_i32_1 = arith.constant 0 : i32
    return %c0_i32, %c0_i32_0 : i32, i32
  }
  func.func @transform_14(%arg0: i32) -> (i32, i32) {
    %c0_i32 = arith.constant 0 : i32
    %c0_i32_0 = arith.constant 0 : i32
    %c0_i32_1 = arith.constant 0 : i32
    return %c0_i32, %c0_i32_0 : i32, i32
  }
  func.func @transform_15(%arg0: i32) -> (i32, i32) {
    %c0_i32 = arith.constant 0 : i32
    %c0_i32_0 = arith.constant 0 : i32
    return %arg0, %c0_i32 : i32, i32
  }
}

</mosaic_0001>

<bundles_post_ra>
// kernel: finetune_cnn_forward.1
= control target key start
LH: loop header
LB: loop body
LE: loop exit
PB: predicated region body
PF: predicated region fallthrough
CT: control target
= control target key end

     0   :  { %20 = vsyncpa [#allocation3], 0  ;;  %s9606_s0 = inlined_call_operand.hbm [shape: f32[16,512], index: 0, kind: input, shape index: {}]   ;;  %s9607_s1 = inlined_call_operand.hbm [shape: bf16[1536,512], index: 1, kind: input, shape index: {}]   ;;  %s9608_s2 = inlined_call_operand.hbm [shape: f32[1,512], index: 2, kind: input, shape index: {}]   ;;  %s9609_s3 = inlined_call_operand.hbm [shape: bf16[1536,256], index: 3, kind: input, shape index: {}]   ;;  %s9610_s4 = inlined_call_operand.hbm [shape: f32[1,256], index: 4, kind: input, shape index: {}]   ;;  %s9611_s5 = inlined_call_operand.hbm [shape: bf16[768,128], index: 5, kind: input, shape index: {}]   ;;  %s9612_s6 = inlined_call_operand.hbm [shape: f32[1,128], index: 6, kind: input, shape index: {}]   ;;  %s9613_s7 = inlined_call_operand.hbm [shape: bf16[384,128], index: 7, kind: input, shape index: {}]   ;;  %s9614_s8 = inlined_call_operand.hbm [shape: f32[1,128], index: 8, kind: input, shape index: {}]   ;;  %s9615_s9 = inlined_call_operand.vmem [shape: bf16[384,64], index: 9, kind: input, shape index: {}]   ;;  %s9616_s10 = inlined_call_operand.hbm [shape: f32[1,64], index: 10, kind: input, shape index: {}]   ;;  %s9617_s11 = inlined_call_operand.vmem [shape: bf16[192,64], index: 11, kind: input, shape index: {}]   ;;  %s9618_s12 = inlined_call_operand.hbm [shape: f32[1,64], index: 12, kind: input, shape index: {}]   ;;  %s9619_s13 = inlined_call_operand.vmem [shape: f32[64,128], index: 13, kind: input, shape index: {}]   ;;  %s9620_s14 = inlined_call_operand.vmem [shape: f32[1,128], index: 14, kind: input, shape index: {}]   ;;  %s9621_s15 = inlined_call_operand.hbm [shape: f32[2,128], index: 15, kind: output, shape index: {}]  }
   0x1   :  { %21 = vsyncpa [#allocation6], 0 }
   0x2   :  { %22 = vsyncpa [#allocation9], 0 }
   0x3   :  { %23 = vsyncpa [#allocation12], 0 }
   0x4   :  { %24 = vsyncpa [#allocation15], 0 }
   0x5   :  { %25 = vsyncpa [#allocation18], 0 }
   0x6   :  { %26 = vsyncpa [#allocation4], 0  ;;  %s8740_s18 = smov [#allocation5]   ;;  %s8462_s22 = scalar_lea.hbm %s9607_s1, 49152 }
   0x7   :  { %s44_s19 = sshll.u32 %s8740_s18, 4  ;;  %p8463_p0 = scmp.ne.s32.totalorder %s9607_s1, %s8462_s22  ;;  %s45_s19 = int_to_ptr.vmem [resolvable:$true] %s44_s19 }
   0x8   :  { %p8466_p1 = scmp.lt.u32.totalorder %s8462_s22, %s9607_s1 }
   0xa   :  { %p8468_p2 = pnand %p8466_p1, %p8463_p0 }
   0xc   :  { %8471 = shalt.err (!%p8468_p2)
}
   0xd   :  { %s8472_s27 = scalar_lea.vmem %s45_s19, 49152  ;;  %p8477_p4 = scmp.lt.s32.totalorder %s45_s19, %s45_s19 }
   0xe   :  { %p8473_p3 = scmp.ne.s32.totalorder %s45_s19, %s8472_s27  ;;  %p8478_p5 = scmp.lt.s32.totalorder %s8472_s27, %s8472_s27 }
  0x10   :  { %p8479_p6 = por %p8478_p5, %p8477_p4 }
  0x12   :  { %p8480_p7 = pnand %p8479_p6, %p8473_p3 }
  0x14   :  { %8483 = shalt.err (!%p8480_p7)
}
  0x15   :  { %s8741_s28 = smov 256   ;;  %s8742_s29 = smov 16  }
  0x16   :  { %50 = dma.hbm_to_vmem [thread:$0]  %s9607_s1, 49152, %s45_s19, [#allocation6], %s8741_s28, %s8741_s28, %s8742_s29  }
  0x17   :  { %s8743_s17 = smov [#allocation8]   ;;  %s8484_s22 = scalar_lea.hbm %s9609_s3, 24576 }
  0x18   :  { %s66_s18 = sshll.u32 %s8743_s17, 4  ;;  %p8485_p8 = scmp.ne.s32.totalorder %s9609_s3, %s8484_s22  ;;  %s67_s18 = int_to_ptr.vmem [resolvable:$true] %s66_s18 }
  0x19   :  { %p8488_p9 = scmp.lt.u32.totalorder %s8484_s22, %s9609_s3 }
  0x1b   :  { %p8490_p10 = pnand %p8488_p9, %p8485_p8 }
  0x1d   :  { %8493 = shalt.err (!%p8490_p10)
}
  0x1e   :  { %s8494_s27 = scalar_lea.vmem %s67_s18, 24576  ;;  %p8499_p12 = scmp.lt.s32.totalorder %s67_s18, %s67_s18 }
  0x1f   :  { %p8495_p11 = scmp.ne.s32.totalorder %s67_s18, %s8494_s27  ;;  %p8500_p13 = scmp.lt.s32.totalorder %s8494_s27, %s8494_s27 }
  0x21   :  { %p8501_p0 = por %p8500_p13, %p8499_p12 }
  0x23   :  { %p8502_p1 = pnand %p8501_p0, %p8495_p11 }
  0x25   :  { %8505 = shalt.err (!%p8502_p1)
}
  0x26   :  { %s8744_s1 = smov 128   ;;  %s8745_s19 = smov 8  }
  0x27   :  { %72 = dma.hbm_to_vmem [thread:$0]  %s9609_s3, 24576, %s67_s18, [#allocation9], %s8744_s1, %s8744_s1, %s8745_s19  }
  0x28   :  { %s8746_s30 = smov [#allocation11]   ;;  %s8506_s21 = scalar_lea.hbm %s9611_s5, 6144 }
  0x29   :  { %s88_s16 = sshll.u32 %s8746_s30, 4  ;;  %p8507_p2 = scmp.ne.s32.totalorder %s9611_s5, %s8506_s21  ;;  %s89_s16 = int_to_ptr.vmem [resolvable:$true] %s88_s16 }
  0x2a   :  { %p8510_p3 = scmp.lt.u32.totalorder %s8506_s21, %s9611_s5 }
  0x2c   :  { %p8512_p4 = pnand %p8510_p3, %p8507_p2 }
  0x2e   :  { %8515 = shalt.err (!%p8512_p4)
}
  0x2f   :  { %s8516_s26 = scalar_lea.vmem %s89_s16, 6144  ;;  %p8521_p6 = scmp.lt.s32.totalorder %s89_s16, %s89_s16 }
  0x30   :  { %p8517_p5 = scmp.ne.s32.totalorder %s89_s16, %s8516_s26  ;;  %p8522_p7 = scmp.lt.s32.totalorder %s8516_s26, %s8516_s26 }
  0x32   :  { %p8523_p8 = por %p8522_p7, %p8521_p6 }
  0x34   :  { %p8524_p9 = pnand %p8523_p8, %p8517_p5 }
  0x36   :  { %8527 = shalt.err (!%p8524_p9)
}
  0x37   :  { %s8747_s3 = smov 64   ;;  %s8748_s18 = smov 4  }
  0x38   :  { %94 = dma.hbm_to_vmem [thread:$0]  %s9611_s5, 6144, %s89_s16, [#allocation12], %s8747_s3, %s8747_s3, %s8748_s18  }
  0x39   :  { %s8749_s19 = smov [#allocation14]   ;;  %s8750_s29 = smov [#allocation17]  }
  0x3a   :  { %s110_s28 = sshll.u32 %s8749_s19, 4  ;;  %s135_s30 = sshll.u32 %s8750_s29, 4  ;;  %s111_s28 = int_to_ptr.vmem [resolvable:$true] %s110_s28  ;;  %s136_s30 = int_to_ptr.vmem [resolvable:$true] %s135_s30 }
  0x3b   :  { %s8528_s21 = scalar_lea.hbm %s9613_s7, 3072 }
  0x3c   :  { %p8529_p10 = scmp.ne.s32.totalorder %s9613_s7, %s8528_s21  ;;  %p8532_p11 = scmp.lt.u32.totalorder %s8528_s21, %s9613_s7 }
  0x3e   :  { %p8534_p12 = pnand %p8532_p11, %p8529_p10 }
  0x40   :  { %8537 = shalt.err (!%p8534_p12)
}
  0x41   :  { %s8538_s5 = scalar_lea.vmem %s111_s28, 3072  ;;  %p8543_p0 = scmp.lt.s32.totalorder %s111_s28, %s111_s28 }
  0x42   :  { %p8539_p13 = scmp.ne.s32.totalorder %s111_s28, %s8538_s5  ;;  %p8544_p1 = scmp.lt.s32.totalorder %s8538_s5, %s8538_s5 }
  0x44   :  { %p8545_p2 = por %p8544_p1, %p8543_p0 }
  0x46   :  { %p8546_p3 = pnand %p8545_p2, %p8539_p13 }
  0x48   :  { %8549 = shalt.err (!%p8546_p3)
}
  0x49   :  { %116 = dma.hbm_to_vmem [thread:$0]  %s9613_s7, 3072, %s111_s28, [#allocation15], %s8747_s3, %s8747_s3, %s8748_s18  }
  0x4a   :  { %s8550_s19 = scalar_lea.hbm %s9616_s10, 16 }
  0x4b   :  { %p8551_p4 = scmp.ne.s32.totalorder %s9616_s10, %s8550_s19  ;;  %p8554_p5 = scmp.lt.u32.totalorder %s8550_s19, %s9616_s10 }
  0x4d   :  { %p8556_p6 = pnand %p8554_p5, %p8551_p4 }
  0x4f   :  { %8559 = shalt.err (!%p8556_p6)
}
  0x50   :  { %s8560_s22 = scalar_lea.vmem %s136_s30, 16  ;;  %s8564_s23 = scalar_lea.vmem %s136_s30, 32 }
  0x51   :  { %p8561_p7 = scmp.ne.s32.totalorder %s136_s30, %s8560_s22  ;;  %p8565_p8 = scmp.lt.s32.totalorder %s136_s30, %s136_s30 }
  0x52   :  { %p8566_p9 = scmp.lt.s32.totalorder %s8564_s23, %s8560_s22 }
  0x54   :  { %p8567_p10 = por %p8566_p9, %p8565_p8 }
  0x56   :  { %p8568_p11 = pnand %p8567_p10, %p8561_p7 }
  0x58   :  { %8571 = shalt.err (!%p8568_p11)
}
  0x59   :  { %138 = dma.hbm_to_vmem [thread:$0]  %s9616_s10, 16, %s136_s30, [#allocation18]  }
  0x5a   :  { %s8751_s18 = smov [#allocation2]   ;;  %s8572_s5 = scalar_lea.hbm %s9606_s0, 1024 }
  0x5b   :  { %s32_s28 = sshll.u32 %s8751_s18, 4  ;;  %p8573_p12 = scmp.ne.s32.totalorder %s9606_s0, %s8572_s5  ;;  %s33_s28 = int_to_ptr.vmem [resolvable:$true] %s32_s28 }
  0x5c   :  { %p8576_p13 = scmp.lt.u32.totalorder %s8572_s5, %s9606_s0 }
  0x5e   :  { %p8578_p0 = pnand %p8576_p13, %p8573_p12 }
  0x60   :  { %8581 = shalt.err (!%p8578_p0)
}
  0x61   :  { %s8582_s19 = scalar_lea.vmem %s33_s28, 1024  ;;  %p8587_p2 = scmp.lt.s32.totalorder %s33_s28, %s33_s28 }
  0x62   :  { %p8583_p1 = scmp.ne.s32.totalorder %s33_s28, %s8582_s19  ;;  %p8588_p3 = scmp.lt.s32.totalorder %s8582_s19, %s8582_s19 }
  0x64   :  { %p8589_p4 = por %p8588_p3, %p8587_p2 }
  0x66   :  { %p8590_p5 = pnand %p8589_p4, %p8583_p1 }
  0x68   :  { %8593 = shalt.err (!%p8590_p5)
}
  0x69   :  { %s8752_s10 = smov 512   ;;  %s8753_s30 = smov 32  }
  0x6a   :  { %38 = dma.hbm_to_vmem [thread:$0]  %s9606_s0, 1024, %s33_s28, [#allocation3], %s8752_s10, %s8752_s10, %s8753_s30  }
  0x6b   :  { %s8754_s20 = smov [#allocation7]   ;;  %s8755_s22 = smov [#allocation10]  }
  0x6c   :  { %s57_s21 = sshll.u32 %s8754_s20, 4  ;;  %s79_s23 = sshll.u32 %s8755_s22, 4  ;;  %s58_s21 = int_to_ptr.vmem [resolvable:$true] %s57_s21  ;;  %s80_s23 = int_to_ptr.vmem [resolvable:$true] %s79_s23 }
  0x6d   :  { %s8594_s18 = scalar_lea.hbm %s9608_s2, 64 }
  0x6e   :  { %p8595_p6 = scmp.ne.s32.totalorder %s9608_s2, %s8594_s18  ;;  %p8598_p7 = scmp.lt.u32.totalorder %s8594_s18, %s9608_s2 }
  0x70   :  { %p8600_p8 = pnand %p8598_p7, %p8595_p6 }
  0x72   :  { %8603 = shalt.err (!%p8600_p8)
}
  0x73   :  { %s8604_s0 = scalar_lea.vmem %s58_s21, 64  ;;  %p8609_p10 = scmp.lt.s32.totalorder %s58_s21, %s58_s21 }
  0x74   :  { %p8605_p9 = scmp.ne.s32.totalorder %s58_s21, %s8604_s0  ;;  %p8610_p11 = scmp.lt.s32.totalorder %s8604_s0, %s8604_s0 }
  0x76   :  { %p8611_p12 = por %p8610_p11, %p8609_p10 }
  0x78   :  { %p8612_p13 = pnand %p8611_p12, %p8605_p9 }
  0x7a   :  { %8615 = shalt.err (!%p8612_p13)
}
  0x7b   :  { %60 = dma.hbm_to_vmem [thread:$0]  %s9608_s2, 64, %s58_s21, [#allocation6]  }
  0x7c   :  { %s8616_s19 = scalar_lea.hbm %s9610_s4, 32 }
  0x7d   :  { %p8617_p0 = scmp.ne.s32.totalorder %s9610_s4, %s8616_s19  ;;  %p8620_p1 = scmp.lt.u32.totalorder %s8616_s19, %s9610_s4 }
  0x7f   :  { %p8622_p2 = pnand %p8620_p1, %p8617_p0 }
  0x81   :  { %8625 = shalt.err (!%p8622_p2)
}
  0x82   :  { %s8626_s20 = scalar_lea.vmem %s80_s23, 32  ;;  %p8631_p4 = scmp.lt.s32.totalorder %s80_s23, %s80_s23 }
  0x83   :  { %p8627_p3 = scmp.ne.s32.totalorder %s80_s23, %s8626_s20  ;;  %p8632_p5 = scmp.lt.s32.totalorder %s8626_s20, %s8626_s20 }
  0x85   :  { %p8633_p6 = por %p8632_p5, %p8631_p4 }
  0x87   :  { %p8634_p7 = pnand %p8633_p6, %p8627_p3 }
  0x89   :  { %8637 = shalt.err (!%p8634_p7)
}
  0x8a   :  { %82 = dma.hbm_to_vmem [thread:$0]  %s9610_s4, 32, %s80_s23, [#allocation9]  }
  0x8b   :  { %s8756_s22 = smov [#allocation13]   ;;  %s8757_s3 = smov [#allocation16]  }
  0x8c   :  { %s101_s7 = sshll.u32 %s8756_s22, 4  ;;  %s123_s18 = sshll.u32 %s8757_s3, 4  ;;  %s102_s7 = int_to_ptr.vmem [resolvable:$true] %s101_s7  ;;  %s124_s18 = int_to_ptr.vmem [resolvable:$true] %s123_s18 }
  0x8d   :  { %s8638_s5 = scalar_lea.hbm %s9612_s6, 16 }
  0x8e   :  { %p8639_p8 = scmp.ne.s32.totalorder %s9612_s6, %s8638_s5  ;;  %p8642_p9 = scmp.lt.u32.totalorder %s8638_s5, %s9612_s6 }
  0x90   :  { %p8644_p10 = pnand %p8642_p9, %p8639_p8 }
  0x92   :  { %8647 = shalt.err (!%p8644_p10)
}
  0x93   :  { %s8648_s4 = scalar_lea.vmem %s102_s7, 16  ;;  %s8652_s23 = scalar_lea.vmem %s102_s7, 32 }
  0x94   :  { %p8649_p11 = scmp.ne.s32.totalorder %s102_s7, %s8648_s4  ;;  %p8653_p12 = scmp.lt.s32.totalorder %s102_s7, %s102_s7 }
  0x95   :  { %p8654_p13 = scmp.lt.s32.totalorder %s8652_s23, %s8648_s4 }
  0x97   :  { %p8655_p0 = por %p8654_p13, %p8653_p12 }
  0x99   :  { %p8656_p1 = pnand %p8655_p0, %p8649_p11 }
  0x9b   :  { %8659 = shalt.err (!%p8656_p1)
}
  0x9c   :  { %104 = dma.hbm_to_vmem [thread:$0]  %s9612_s6, 16, %s102_s7, [#allocation12]  }
  0x9d   :  { %s8660_s30 = scalar_lea.hbm %s9614_s8, 16 }
  0x9e   :  { %p8661_p2 = scmp.ne.s32.totalorder %s9614_s8, %s8660_s30  ;;  %p8664_p3 = scmp.lt.u32.totalorder %s8660_s30, %s9614_s8 }
  0xa0   :  { %p8666_p4 = pnand %p8664_p3, %p8661_p2 }
  0xa2   :  { %8669 = shalt.err (!%p8666_p4)
}
  0xa3   :  { %s8670_s21 = scalar_lea.vmem %s124_s18, 16  ;;  %s8674_s22 = scalar_lea.vmem %s124_s18, 32 }
  0xa4   :  { %p8671_p5 = scmp.ne.s32.totalorder %s124_s18, %s8670_s21  ;;  %p8675_p6 = scmp.lt.s32.totalorder %s124_s18, %s124_s18 }
  0xa5   :  { %p8676_p7 = scmp.lt.s32.totalorder %s8674_s22, %s8670_s21 }
  0xa7   :  { %p8677_p8 = por %p8676_p7, %p8675_p6 }
  0xa9   :  { %p8678_p9 = pnand %p8677_p8, %p8671_p5 }
  0xab   :  { %8681 = shalt.err (!%p8678_p9)
}
  0xac   :  { %126 = dma.hbm_to_vmem [thread:$0]  %s9614_s8, 16, %s124_s18, [#allocation15]  }
  0xad   :  { %s8758_s3 = smov [#allocation19]   ;;  %s8682_s16 = scalar_lea.hbm %s9618_s12, 16 }
  0xae   :  { %s147_s24 = sshll.u32 %s8758_s3, 4  ;;  %p8683_p10 = scmp.ne.s32.totalorder %s9618_s12, %s8682_s16  ;;  %s148_s24 = int_to_ptr.vmem [resolvable:$true] %s147_s24 }
  0xaf   :  { %p8686_p11 = scmp.lt.u32.totalorder %s8682_s16, %s9618_s12 }
  0xb1   :  { %p8688_p12 = pnand %p8686_p11, %p8683_p10 }
  0xb3   :  { %8691 = shalt.err (!%p8688_p12)
}
  0xb4   :  { %s8692_s23 = scalar_lea.vmem %s148_s24, 16  ;;  %s8696_s8 = scalar_lea.vmem %s148_s24, 32 }
  0xb5   :  { %p8693_p13 = scmp.ne.s32.totalorder %s148_s24, %s8692_s23  ;;  %p8697_p0 = scmp.lt.s32.totalorder %s148_s24, %s148_s24 }
  0xb6   :  { %p8698_p1 = scmp.lt.s32.totalorder %s8696_s8, %s8692_s23 }
  0xb8   :  { %p8699_p2 = por %p8698_p1, %p8697_p0 }
  0xba   :  { %p8700_p3 = pnand %p8699_p2, %p8693_p13 }
  0xbc   :  { %8703 = shalt.err (!%p8700_p3)
}
  0xbd   :  { %150 = dma.hbm_to_vmem [thread:$0]  %s9618_s12, 16, %s148_s24, [#allocation18]  }
  0xbe   :  { %8726 = dma.done.wait [#allocation3], 1024  }
  0xbf   :  { %8727 = vsyncadd [#allocation3], 4294966272 }
  0xc0   :  { %8728 = dma.done.wait [#allocation6], 49216  }
  0xc1   :  { %8729 = vsyncadd [#allocation6], 4294918080 }
  0xc2   :  { %8730 = dma.done.wait [#allocation9], 24608  }
  0xc3   :  { %8731 = vsyncadd [#allocation9], 4294942688 }
  0xc4   :  { %8732 = dma.done.wait [#allocation12], 6160  }
  0xc5   :  { %8733 = vsyncadd [#allocation12], 4294961136 }
  0xc6   :  { %8734 = dma.done.wait [#allocation15], 3088  }
  0xc7   :  { %8735 = vsyncadd [#allocation15], 4294964208 }
  0xc8   :  { %8736 = dma.done.wait [#allocation18], 32  }
  0xc9   :  { %8737 = vsyncadd [#allocation18], 4294967264  ;;  %v7482_v0 = vld [vmem:[#allocation5 + $0x4] ss:$16 sps:$4 sm:$0xff]   ;;  %v7484_v1 = vld [vmem:[#allocation5 + $0xc] ss:$16 sps:$4 sm:$0xff]   ;;  %v189_v33 = vlaneseq }
  0xca   :  { %1194 = vmatprep.subr.bf16.mxu0 %v7482_v0  ;;  %v7486_v2 = vld [vmem:[#allocation5] ss:$16 sps:$4 sm:$0xff]   ;;  %v7487_v3 = vld [vmem:[#allocation5 + $0x8] ss:$16 sps:$4 sm:$0xff]   ;;  %1280 = vmatprep.subr.bf16.mxu1 %v7484_v1  ;;  %v7488_v4 = vld [vmem:[#allocation5 + $0x24] ss:$16 sps:$4 sm:$0xff]  }
  0xcb   :  { %1195 = vmatpush1.bf16.msra.mxu0 %v7486_v2  ;;  %1281 = vmatpush1.bf16.msra.mxu1 %v7487_v3  ;;  %v7490_v5 = vld [vmem:[#allocation5 + $0x2c] ss:$16 sps:$4 sm:$0xff]   ;;  %v7492_v6 = vld [vmem:[#allocation5 + $0x20] ss:$16 sps:$4 sm:$0xff]   ;;  %v7493_v7 = vld [vmem:[#allocation5 + $0x28] ss:$16 sps:$4 sm:$0xff]  }
  0xcc   :  { %1196 = vmatprep.subr.bf16.mxu0 %v7488_v4  ;;  %1282 = vmatprep.subr.bf16.mxu1 %v7490_v5  ;;  %v7494_v8 = vld [vmem:[#allocation5 + $0x44] ss:$16 sps:$4 sm:$0xff]   ;;  %v7496_v9 = vld [vmem:[#allocation5 + $0x4c] ss:$16 sps:$4 sm:$0xff]   ;;  %v7498_v10 = vld [vmem:[#allocation5 + $0x40] ss:$16 sps:$4 sm:$0xff]  }
  0xcd   :  { %v7499_v11 = vld [vmem:[#allocation5 + $0x48] ss:$16 sps:$4 sm:$0xff]   ;;  %v7500_v12 = vld [vmem:[#allocation5 + $0x64] ss:$16 sps:$4 sm:$0xff]   ;;  %v7502_v13 = vld [vmem:[#allocation5 + $0x6c] ss:$16 sps:$4 sm:$0xff]  }
  0xce   :  { %v7504_v14 = vld [vmem:[#allocation5 + $0x60] ss:$16 sps:$4 sm:$0xff]   ;;  %v7505_v15 = vld [vmem:[#allocation5 + $0x68] ss:$16 sps:$4 sm:$0xff]   ;;  %v7506_v16 = vld [vmem:[#allocation5 + $0x84] ss:$16 sps:$4 sm:$0xff]  }
  0xcf   :  { %1197 = vmatpush1.bf16.msra.mxu0 %v7492_v6  ;;  %1283 = vmatpush1.bf16.msra.mxu1 %v7493_v7  ;;  %v7508_v17 = vld [vmem:[#allocation5 + $0x8c] ss:$16 sps:$4 sm:$0xff]   ;;  %v7510_v18 = vld [vmem:[#allocation5 + $0x80] ss:$16 sps:$4 sm:$0xff]   ;;  %v7511_v19 = vld [vmem:[#allocation5 + $0x88] ss:$16 sps:$4 sm:$0xff]  }
  0xd0   :  { %1198 = vmatprep.subr.bf16.mxu0 %v7494_v8  ;;  %1284 = vmatprep.subr.bf16.mxu1 %v7496_v9  ;;  %v7512_v20 = vld [vmem:[#allocation5 + $0xa4] ss:$16 sps:$4 sm:$0xff]   ;;  %v7514_v21 = vld [vmem:[#allocation5 + $0xac] ss:$16 sps:$4 sm:$0xff]   ;;  %v7516_v22 = vld [vmem:[#allocation5 + $0xa0] ss:$16 sps:$4 sm:$0xff]  }
  0xd1   :  { %v7517_v23 = vld [vmem:[#allocation5 + $0xa8] ss:$16 sps:$4 sm:$0xff]   ;;  %v7518_v24 = vld [vmem:[#allocation5 + $0xc4] ss:$16 sps:$4 sm:$0xff]   ;;  %v7520_v25 = vld [vmem:[#allocation5 + $0xcc] ss:$16 sps:$4 sm:$0xff]  }
  0xd2   :  { %v7522_v26 = vld [vmem:[#allocation5 + $0xc0] ss:$16 sps:$4 sm:$0xff]   ;;  %v7523_v27 = vld [vmem:[#allocation5 + $0xc8] ss:$16 sps:$4 sm:$0xff]   ;;  %v7524_v28 = vld [vmem:[#allocation5 + $0xe4] ss:$16 sps:$4 sm:$0xff]  }
  0xd3   :  { %1199 = vmatpush1.bf16.msra.mxu0 %v7498_v10  ;;  %1285 = vmatpush1.bf16.msra.mxu1 %v7499_v11  ;;  %v7526_v29 = vld [vmem:[#allocation5 + $0xec] ss:$16 sps:$4 sm:$0xff]   ;;  %v7528_v30 = vld [vmem:[#allocation5 + $0xe0] ss:$16 sps:$4 sm:$0xff]   ;;  %v7529_v31 = vld [vmem:[#allocation5 + $0xe8] ss:$16 sps:$4 sm:$0xff]  }
  0xd4   :  { %1200 = vmatprep.subr.bf16.mxu0 %v7500_v12  ;;  %1286 = vmatprep.subr.bf16.mxu1 %v7502_v13  ;;  %v7530_v32 = vld [vmem:[#allocation5 + $0x104] ss:$16 sps:$4 sm:$0xff]   ;;  %v7532_v34 = vld [vmem:[#allocation5 + $0x10c] ss:$16 sps:$4 sm:$0xff]   ;;  %v7534_v35 = vld [vmem:[#allocation5 + $0x100] ss:$16 sps:$4 sm:$0xff]  }
  0xd5   :  { %v7535_v36 = vld [vmem:[#allocation5 + $0x108] ss:$16 sps:$4 sm:$0xff]   ;;  %v7536_v37 = vld [vmem:[#allocation5 + $0x124] ss:$16 sps:$4 sm:$0xff]   ;;  %v8975_v38 = vshrl.u32 %v189_v33, 7  ;;  %vm8760_vm8 = vmmov 0  }
  0xd6   :  { %v7538_v39 = vld [vmem:[#allocation5 + $0x12c] ss:$16 sps:$4 sm:$0xff]   ;;  %v7540_v40 = vld [vmem:[#allocation5 + $0x120] ss:$16 sps:$4 sm:$0xff]   ;;  %v7541_v41 = vld [vmem:[#allocation5 + $0x128] ss:$16 sps:$4 sm:$0xff]  }
  0xd7   :  { %1201 = vmatpush1.bf16.msra.mxu0 %v7504_v14  ;;  %1287 = vmatpush1.bf16.msra.mxu1 %v7505_v15  ;;  %v7542_v42 = vld [vmem:[#allocation5 + $0x144] ss:$16 sps:$4 sm:$0xff]   ;;  %v8978_v43 = vadd.s32 8, %v8975_v38  ;;  %v7544_v44 = vld [vmem:[#allocation5 + $0x14c] ss:$16 sps:$4 sm:$0xff]   ;;  %v196_v47 = vand.u32 7, %v8975_v38 }
  0xd8   :  { %1202 = vmatprep.subr.bf16.mxu0 %v7506_v16  ;;  %1288 = vmatprep.subr.bf16.mxu1 %v7508_v17  ;;  %v7546_v45 = vld [vmem:[#allocation5 + $0x140] ss:$16 sps:$4 sm:$0xff]   ;;  %v7547_v46 = vld [vmem:[#allocation5 + $0x148] ss:$16 sps:$4 sm:$0xff]   ;;  %v7548_v48 = vld [vmem:[#allocation5 + $0x164] ss:$16 sps:$4 sm:$0xff]  }
  0xd9   :  { %v203_v49 = vand.u32 7, %v8978_v43  ;;  %v7550_v50 = vld [vmem:[#allocation5 + $0x16c] ss:$16 sps:$4 sm:$0xff]   ;;  %vm240_vm0 = vcmp.lt.s32.totalorder %v8975_v38, 1  ;;  %v7552_v52 = vld [vmem:[#allocation5 + $0x160] ss:$16 sps:$4 sm:$0xff]  }
  0xda   :  { %v8982_v51 = vld [vmem:[#allocation2 + $0x8] sm:$0xff]  ;;  %vm8987_vm1 = vcmp.ne.s32.totalorder %v196_v47, 0  ;;  %v7554_v59 = vld [vmem:[#allocation5 + $0x184] ss:$16 sps:$4 sm:$0xff]   ;;  %v7558_v61 = vld [vmem:[#allocation5 + $0x180] ss:$16 sps:$4 sm:$0xff]  }
  0xdb   :  { %1203 = vmatpush1.bf16.msra.mxu0 %v7510_v18  ;;  %1289 = vmatpush1.bf16.msra.mxu1 %v7511_v19  ;;  %v225_v54 = vld [vmem:[#allocation2 + $0x28] sm:$0xff]  ;;  %v233_v55 = vrot.slane %v8982_v51, 7  ;;  %vm8994_vm2 = vcmp.ne.s32.totalorder %v203_v49, 0  ;;  %v7560_v3 = vld [vmem:[#allocation5 + $0x1a4] ss:$16 sps:$4 sm:$0xff]   ;;  %vm273_vm4 = vcmp.lt.s32.totalorder %v8975_v38, 7 }
  0xdc   :  { %1204 = vmatprep.subr.bf16.mxu0 %v7512_v20  ;;  %1290 = vmatprep.subr.bf16.mxu1 %v7514_v21  ;;  %v7553_v56 = vld [vmem:[#allocation5 + $0x168] ss:$16 sps:$4 sm:$0xff]   ;;  %v237_v58 = vrot.slane %v225_v54, 7  ;;  %v7556_v60 = vld [vmem:[#allocation5 + $0x18c] ss:$16 sps:$4 sm:$0xff]   ;;  %vm9006_vm3 = vmpackc.low %vm8994_vm2, %vm8987_vm1  ;;  %vm9076_vm5 = vcmp.ne.s32.totalorder %v196_v47, 7 }
  0xdd   :  { %v7559_v2 = vld [vmem:[#allocation5 + $0x188] ss:$16 sps:$4 sm:$0xff]   ;;  %v7562_v4 = vld [vmem:[#allocation5 + $0x1ac] ss:$16 sps:$4 sm:$0xff]   ;;  %v7564_v5 = vld [vmem:[#allocation5 + $0x1a0] ss:$16 sps:$4 sm:$0xff]  }
  0xde   :  { %v242_v62 = vsel %vm240_vm0, %v233_v55, %v237_v58  ;;  %v246_v63 = vsel %vm240_vm0, %v237_v58, %v233_v55  ;;  %v7565_v6 = vld [vmem:[#allocation5 + $0x1a8] ss:$16 sps:$4 sm:$0xff]   ;;  %v7566_v7 = vld [vmem:[#allocation5 + $0x1c4] ss:$16 sps:$4 sm:$0xff]   ;;  %v7568_v8 = vld [vmem:[#allocation5 + $0x1cc] ss:$16 sps:$4 sm:$0xff]  }
  0xdf   :  { %1205 = vmatpush1.bf16.msra.mxu0 %v7516_v22  ;;  %1291 = vmatpush1.bf16.msra.mxu1 %v7517_v23  ;;  %v6408_v1 = vpack.c.bf16 %v242_v62, %v246_v63  ;;  %v9014_v9 = vld [vmem:[#allocation2] sm:$0xff]  ;;  %v7571_v12 = vld [vmem:[#allocation5 + $0x1c8] ss:$16 sps:$4 sm:$0xff]   ;;  %v7574_v16 = vld [vmem:[#allocation5 + $0x1ec] ss:$16 sps:$4 sm:$0xff]   ;;  %vm9082_vm6 = vcmp.ne.s32.totalorder %v203_v49, 7 }
  0xe0   :  { %1206 = vmatprep.subr.bf16.mxu0 %v7518_v24  ;;  %1292 = vmatprep.subr.bf16.mxu1 %v7520_v25  ;;  %v9016_v10 = vld [vmem:[#allocation2 + $0x20] sm:$0xff]  ;;  %v232_v13 = vrot.slane %v9014_v9, 7  ;;  %v7577_v18 = vld [vmem:[#allocation5 + $0x1e8] ss:$16 sps:$4 sm:$0xff]   ;;  %v7583_v22 = vld [vmem:[#allocation5 + $0x20c] ss:$16 sps:$4 sm:$0xff]  }
  0xe1   :  { %6409 = vmatprep.mubr.msk.bf16.mxu0 %vm9006_vm3, %v6408_v1  ;;  %6421 = vmatprep.mubr.msk.bf16.mxu1 %vm9006_vm3, %v6408_v1  ;;  %v7570_v11 = vld [vmem:[#allocation5 + $0x1c0] ss:$16 sps:$4 sm:$0xff]   ;;  %v236_v14 = vrot.slane %v9016_v10, 7  ;;  %v7572_v15 = vld [vmem:[#allocation5 + $0x1e4] ss:$16 sps:$4 sm:$0xff]   ;;  %v9031_v55 = vld [vmem:[#allocation2 + $0x18] sm:$0xff] }
  0xe2   :  { %v7576_v17 = vld [vmem:[#allocation5 + $0x1e0] ss:$16 sps:$4 sm:$0xff]   ;;  %v7580_v21 = vld [vmem:[#allocation5 + $0x204] ss:$16 sps:$4 sm:$0xff]   ;;  %v7581_v25 = vld [vmem:[#allocation5 + $0x208] ss:$16 sps:$4 sm:$0xff]  }
  0xe3   :  { %1207 = vmatpush1.bf16.msra.mxu0 %v7522_v26  ;;  %1293 = vmatpush1.bf16.msra.mxu1 %v7523_v27  ;;  %v241_v19 = vsel %vm240_vm0, %v232_v13, %v236_v14  ;;  %v245_v20 = vsel %vm240_vm0, %v236_v14, %v232_v13  ;;  %v7578_v23 = vld [vmem:[#allocation5 + $0x200] ss:$16 sps:$4 sm:$0xff]   ;;  %v9025_v26 = vpack.c.bf16 %v225_v54, %v8982_v51  ;;  %v7586_v27 = vld [vmem:[#allocation5 + $0x224] ss:$16 sps:$4 sm:$0xff]   ;;  %v7617_v58 = vld [vmem:[#allocation5 + $0x2c8] ss:$16 sps:$4 sm:$0xff]  }
  0xe4   :  { %1208 = vmatprep.subr.bf16.mxu0 %v7524_v28  ;;  %1294 = vmatprep.subr.bf16.mxu1 %v7526_v29  ;;  %v6411_v24 = vpack.c.bf16 %v241_v19, %v245_v20  ;;  %v7589_v28 = vld [vmem:[#allocation5 + $0x22c] ss:$16 sps:$4 sm:$0xff]   ;;  %v7584_v29 = vld [vmem:[#allocation5 + $0x220] ss:$16 sps:$4 sm:$0xff]   ;;  %v7616_v51 = vld [vmem:[#allocation5 + $0x2c4] ss:$16 sps:$4 sm:$0xff]  }
  0xe5   :  { %v7590_v33 = vld [vmem:[#allocation5 + $0x240] ss:$16 sps:$4 sm:$0xff]   ;;  %v7625_v62 = vld [vmem:[#allocation5 + $0x2ec] ss:$16 sps:$4 sm:$0xff]   ;;  %v7635_v14 = vld [vmem:[#allocation5 + $0x328] ss:$16 sps:$4 sm:$0xff]  }
  0xe6   :  { %v7614_v54 = vld [vmem:[#allocation5 + $0x2c0] ss:$16 sps:$4 sm:$0xff]   ;;  %v7646_v19 = vld [vmem:[#allocation5 + $0x364] ss:$16 sps:$4 sm:$0xff]   ;;  %v7649_v20 = vld [vmem:[#allocation5 + $0x36c] ss:$16 sps:$4 sm:$0xff]  }
  0xe7   :  { %1209 = vmatpush1.bf16.msra.mxu0 %v7528_v30  ;;  %1295 = vmatpush1.bf16.msra.mxu1 %v7529_v31  ;;  %v7587_v30 = vld [vmem:[#allocation5 + $0x228] ss:$16 sps:$4 sm:$0xff]   ;;  %v7592_v31 = vld [vmem:[#allocation5 + $0x244] ss:$16 sps:$4 sm:$0xff]   ;;  %v7632_v13 = vld [vmem:[#allocation5 + $0x320] ss:$16 sps:$4 sm:$0xff]  }
  0xe8   :  { %1210 = vmatprep.subr.bf16.mxu0 %v7530_v32  ;;  %1296 = vmatprep.subr.bf16.mxu1 %v7532_v34  ;;  %v7595_v32 = vld [vmem:[#allocation5 + $0x24c] ss:$16 sps:$4 sm:$0xff]   ;;  %v7593_v34 = vld [vmem:[#allocation5 + $0x248] ss:$16 sps:$4 sm:$0xff]   ;;  %vm9090_vm7 = vmpackc.low %vm9082_vm6, %vm9076_vm5  ;;  %vm5949_vm9 = vcmask 523264   ;;  %vm6184_vm10 = vcmask 1041409  }
  0xe9   :  { %v7872_v43 = vld [vmem:[#allocation5 + $0x820] ss:$16 sps:$4 sm:$0xff]   ;;  %v7875_v49 = vld [vmem:[#allocation5 + $0x828] ss:$16 sps:$4 sm:$0xff]   ;;  %s8762_s2 = smov [#allocation20]  }
  0xea   :  { %v8429_v0 = vld [vmem:[%s9615_s9 + $0x58] sm:$0xff]   ;;  %v8444_v47 = vld [vmem:[%s9617_s11 + $0x10] sm:$0xff]   ;;  %s6265_s21 = sshll.u32 %s8762_s2, 4  ;;  %s6266_s21 = int_to_ptr.vmem [resolvable:$true] %s6265_s21 }
  0xeb   :  { %1211 = vmatpush1.bf16.msra.mxu0 %v7534_v35  ;;  %1297 = vmatpush1.bf16.msra.mxu1 %v7535_v36  ;;  %v7598_v35 = vld [vmem:[#allocation5 + $0x264] ss:$16 sps:$4 sm:$0xff]   ;;  %v7601_v36 = vld [vmem:[#allocation5 + $0x26c] ss:$16 sps:$4 sm:$0xff]   ;;  %s8704_s22 = scalar_lea.vmem %s6266_s21, 32  ;;  %p8709_p5 = scmp.lt.s32.totalorder %s6266_s21, %s6266_s21 }
  0xec   :  { %1212 = vmatprep.subr.bf16.mxu0 %v7536_v37  ;;  %1298 = vmatprep.subr.bf16.mxu1 %v7538_v39  ;;  %v7596_v37 = vld [vmem:[#allocation5 + $0x260] ss:$16 sps:$4 sm:$0xff]   ;;  %v7599_v39 = vld [vmem:[#allocation5 + $0x268] ss:$16 sps:$4 sm:$0xff]   ;;  %p8705_p4 = scmp.ne.s32.totalorder %s6266_s21, %s8704_s22  ;;  %p8710_p6 = scmp.lt.s32.totalorder %s8704_s22, %s8704_s22 }
  0xed   :  { %v8448_v53 = vld [vmem:[%s9617_s11 + $0x30] sm:$0xff]   ;;  %v8449_v57 = vld [vmem:[%s9617_s11 + $0x38] sm:$0xff]  }
  0xee   :  { %p8711_p7 = por %p8710_p6, %p8709_p5 }
  0xef   :  { %1213 = vmatpush1.bf16.msra.mxu0 %v7540_v40  ;;  %1299 = vmatpush1.bf16.msra.mxu1 %v7541_v41  ;;  %v7604_v40 = vld [vmem:[#allocation5 + $0x284] ss:$16 sps:$4 sm:$0xff]   ;;  %v7607_v41 = vld [vmem:[#allocation5 + $0x28c] ss:$16 sps:$4 sm:$0xff]  }
  0xf0   :  { %1214 = vmatprep.subr.bf16.mxu0 %v7542_v42  ;;  %1300 = vmatprep.subr.bf16.mxu1 %v7544_v44  ;;  %v7602_v42 = vld [vmem:[#allocation5 + $0x280] ss:$16 sps:$4 sm:$0xff]   ;;  %v7605_v44 = vld [vmem:[#allocation5 + $0x288] ss:$16 sps:$4 sm:$0xff]   ;;  %p8712_p8 = pnand %p8711_p7, %p8705_p4 }
  0xf3   :  { %1215 = vmatpush1.bf16.msra.mxu0 %v7546_v45  ;;  %1301 = vmatpush1.bf16.msra.mxu1 %v7547_v46  ;;  %v7610_v45 = vld [vmem:[#allocation5 + $0x2a4] ss:$16 sps:$4 sm:$0xff]   ;;  %v7613_v46 = vld [vmem:[#allocation5 + $0x2ac] ss:$16 sps:$4 sm:$0xff]  }
  0xf4   :  { %1216 = vmatprep.subr.bf16.mxu0 %v7548_v48  ;;  %1302 = vmatprep.subr.bf16.mxu1 %v7550_v50  ;;  %v7608_v48 = vld [vmem:[#allocation5 + $0x2a0] ss:$16 sps:$4 sm:$0xff]   ;;  %v7611_v50 = vld [vmem:[#allocation5 + $0x2a8] ss:$16 sps:$4 sm:$0xff]  }
  0xf7   :  { %1217 = vmatpush1.bf16.msra.mxu0 %v7552_v52  ;;  %1303 = vmatpush1.bf16.msra.mxu1 %v7553_v56  ;;  %v7619_v52 = vld [vmem:[#allocation5 + $0x2cc] ss:$16 sps:$4 sm:$0xff]  }
  0xf8   :  { %1218 = vmatprep.subr.bf16.mxu0 %v7554_v59  ;;  %1304 = vmatprep.subr.bf16.mxu1 %v7556_v60  ;;  %v9033_v56 = vld [vmem:[#allocation2 + $0x38] sm:$0xff]  ;;  %v235_v59 = vrot.slane %v9031_v55, 7 }
  0xf9   :  { %v239_v60 = vrot.slane %v9033_v56, 7 }
  0xfb   :  { %1219 = vmatpush1.bf16.msra.mxu0 %v7558_v61  ;;  %1305 = vmatpush1.bf16.msra.mxu1 %v7559_v2  ;;  %v7622_v61 = vld [vmem:[#allocation5 + $0x2e4] ss:$16 sps:$4 sm:$0xff]   ;;  %v244_v63 = vsel %vm240_vm0, %v235_v59, %v239_v60  ;;  %v248_v1 = vsel %vm240_vm0, %v239_v60, %v235_v59  ;;  %v7620_v2 = vld [vmem:[#allocation5 + $0x2e0] ss:$16 sps:$4 sm:$0xff]   ;;  %v7685_v60 = vld [vmem:[#allocation5 + $0x42c] ss:$16 sps:$4 sm:$0xff]  }
  0xfc   :  { %1220 = vmatprep.subr.bf16.mxu0 %v7560_v3  ;;  %1306 = vmatprep.subr.bf16.mxu1 %v7562_v4  ;;  %v6414_v3 = vpack.c.bf16 %v244_v63, %v248_v1  ;;  %v7623_v4 = vld [vmem:[#allocation5 + $0x2e8] ss:$16 sps:$4 sm:$0xff]   ;;  %v7682_v59 = vld [vmem:[#allocation5 + $0x424] ss:$16 sps:$4 sm:$0xff]   ;;  %v7691_v1 = vld [vmem:[#allocation5 + $0x44c] ss:$16 sps:$4 sm:$0xff]  }
  0xfd   :  { %v7688_v63 = vld [vmem:[#allocation5 + $0x444] ss:$16 sps:$4 sm:$0xff]  }
  0xff   :  { %1221 = vmatpush1.bf16.msra.mxu0 %v7564_v5  ;;  %1307 = vmatpush1.bf16.msra.mxu1 %v7565_v6  ;;  %v7628_v5 = vld [vmem:[#allocation5 + $0x304] ss:$16 sps:$4 sm:$0xff]   ;;  %v7631_v6 = vld [vmem:[#allocation5 + $0x30c] ss:$16 sps:$4 sm:$0xff]  }
 0x100   :  { %1222 = vmatprep.subr.bf16.mxu0 %v7566_v7  ;;  %1308 = vmatprep.subr.bf16.mxu1 %v7568_v8  ;;  %v7626_v7 = vld [vmem:[#allocation5 + $0x300] ss:$16 sps:$4 sm:$0xff]   ;;  %v7629_v8 = vld [vmem:[#allocation5 + $0x308] ss:$16 sps:$4 sm:$0xff]  }
 0x103   :  { %1223 = vmatpush1.bf16.msra.mxu0 %v7570_v11  ;;  %1309 = vmatpush1.bf16.msra.mxu1 %v7571_v12  ;;  %v7634_v11 = vld [vmem:[#allocation5 + $0x324] ss:$16 sps:$4 sm:$0xff]   ;;  %v7637_v12 = vld [vmem:[#allocation5 + $0x32c] ss:$16 sps:$4 sm:$0xff]  }
 0x104   :  { %1224 = vmatprep.subr.bf16.mxu0 %v7572_v15  ;;  %1310 = vmatprep.subr.bf16.mxu1 %v7574_v16  ;;  %v7640_v15 = vld [vmem:[#allocation5 + $0x344] ss:$16 sps:$4 sm:$0xff]   ;;  %v7643_v16 = vld [vmem:[#allocation5 + $0x34c] ss:$16 sps:$4 sm:$0xff]  }
 0x107   :  { %1225 = vmatpush1.bf16.msra.mxu0 %v7576_v17  ;;  %1311 = vmatpush1.bf16.msra.mxu1 %v7577_v18  ;;  %v7638_v17 = vld [vmem:[#allocation5 + $0x340] ss:$16 sps:$4 sm:$0xff]   ;;  %v7641_v18 = vld [vmem:[#allocation5 + $0x348] ss:$16 sps:$4 sm:$0xff]  }
 0x108   :  { %1237 = vmatprep.subr.bf16.mxu0 %v7580_v21  ;;  %1323 = vmatprep.subr.bf16.mxu1 %v7583_v22  ;;  %v7644_v21 = vld [vmem:[#allocation5 + $0x360] ss:$16 sps:$4 sm:$0xff]   ;;  %v7647_v22 = vld [vmem:[#allocation5 + $0x368] ss:$16 sps:$4 sm:$0xff]  }
 0x10a   :  { %6412 = vmatmul.mubr.msk.bf16.vlgmr.msra.gmra.mrb[0].mxu0 %vm9006_vm3, %v6411_v24  ;;  %6424 = vmatmul.mubr.msk.bf16.vlgmr.msra.gmra.mrb[0].mxu1 %vm9006_vm3, %v6411_v24  ;;  %v7655_v24 = vld [vmem:[#allocation5 + $0x38c] ss:$16 sps:$4 sm:$0xff]  }
 0x10b   :  { %1238 = vmatpush1.bf16.msra.mxu0 %v7578_v23  ;;  %1324 = vmatpush1.bf16.msra.mxu1 %v7581_v25  ;;  %v7652_v23 = vld [vmem:[#allocation5 + $0x384] ss:$16 sps:$4 sm:$0xff]   ;;  %v7650_v25 = vld [vmem:[#allocation5 + $0x380] ss:$16 sps:$4 sm:$0xff]  }
 0x10c   :  { %1239 = vmatprep.subr.bf16.mxu0 %v7586_v27  ;;  %1325 = vmatprep.subr.bf16.mxu1 %v7589_v28  ;;  %v7653_v27 = vld [vmem:[#allocation5 + $0x388] ss:$16 sps:$4 sm:$0xff]   ;;  %v7658_v28 = vld [vmem:[#allocation5 + $0x3a4] ss:$16 sps:$4 sm:$0xff]  }
 0x10d   :  { %6415 = vmatprep.mubr.msk.bf16.mxu0 %vm9006_vm3, %v6414_v3  ;;  %6427 = vmatprep.mubr.msk.bf16.mxu1 %vm9006_vm3, %v6414_v3  ;;  %v7689_v3 = vld [vmem:[#allocation5 + $0x448] ss:$16 sps:$4 sm:$0xff]  }
 0x10f   :  { %1240 = vmatpush1.bf16.msra.mxu0 %v7584_v29  ;;  %1326 = vmatpush1.bf16.msra.mxu1 %v7587_v30  ;;  %v7661_v29 = vld [vmem:[#allocation5 + $0x3ac] ss:$16 sps:$4 sm:$0xff]   ;;  %v7656_v30 = vld [vmem:[#allocation5 + $0x3a0] ss:$16 sps:$4 sm:$0xff]  }
 0x110   :  { %1241 = vmatprep.subr.bf16.mxu0 %v7592_v31  ;;  %1327 = vmatprep.subr.bf16.mxu1 %v7595_v32  ;;  %v7659_v31 = vld [vmem:[#allocation5 + $0x3a8] ss:$16 sps:$4 sm:$0xff]   ;;  %v7664_v32 = vld [vmem:[#allocation5 + $0x3c4] ss:$16 sps:$4 sm:$0xff]  }
 0x113   :  { %1242 = vmatpush1.bf16.msra.mxu0 %v7590_v33  ;;  %1328 = vmatpush1.bf16.msra.mxu1 %v7593_v34  ;;  %v7667_v33 = vld [vmem:[#allocation5 + $0x3cc] ss:$16 sps:$4 sm:$0xff]   ;;  %v9045_v34 = vld [vmem:[#allocation2 + $0x10] sm:$0xff] }
 0x114   :  { %1243 = vmatprep.subr.bf16.mxu0 %v7598_v35  ;;  %1329 = vmatprep.subr.bf16.mxu1 %v7601_v36  ;;  %v9047_v35 = vld [vmem:[#allocation2 + $0x30] sm:$0xff] }
 0x115   :  { %v7662_v36 = vld [vmem:[#allocation5 + $0x3c0] ss:$16 sps:$4 sm:$0xff]  }
 0x117   :  { %1244 = vmatpush1.bf16.msra.mxu0 %v7596_v37  ;;  %1330 = vmatpush1.bf16.msra.mxu1 %v7599_v39  ;;  %v7665_v37 = vld [vmem:[#allocation5 + $0x3c8] ss:$16 sps:$4 sm:$0xff]   ;;  %v234_v39 = vrot.slane %v9045_v34, 7 }
 0x118   :  { %1245 = vmatprep.subr.bf16.mxu0 %v7604_v40  ;;  %1331 = vmatprep.subr.bf16.mxu1 %v7607_v41  ;;  %v238_v40 = vrot.slane %v9047_v35, 7  ;;  %v7670_v41 = vld [vmem:[#allocation5 + $0x3e4] ss:$16 sps:$4 sm:$0xff]  }
 0x11b   :  { %1246 = vmatpush1.bf16.msra.mxu0 %v7602_v42  ;;  %1332 = vmatpush1.bf16.msra.mxu1 %v7605_v44  ;;  %v7673_v42 = vld [vmem:[#allocation5 + $0x3ec] ss:$16 sps:$4 sm:$0xff]   ;;  %v7668_v44 = vld [vmem:[#allocation5 + $0x3e0] ss:$16 sps:$4 sm:$0xff]  }
 0x11c   :  { %1247 = vmatprep.subr.bf16.mxu0 %v7610_v45  ;;  %1333 = vmatprep.subr.bf16.mxu1 %v7613_v46  ;;  %v7671_v45 = vld [vmem:[#allocation5 + $0x3e8] ss:$16 sps:$4 sm:$0xff]   ;;  %v243_v46 = vsel %vm240_vm0, %v234_v39, %v238_v40 }
 0x11f   :  { %1248 = vmatpush1.bf16.msra.mxu0 %v7608_v48  ;;  %1334 = vmatpush1.bf16.msra.mxu1 %v7611_v50  ;;  %v247_v48 = vsel %vm240_vm0, %v238_v40, %v234_v39  ;;  %v7676_v50 = vld [vmem:[#allocation5 + $0x404] ss:$16 sps:$4 sm:$0xff]   ;;  %v7734_v39 = vld [vmem:[#allocation5 + $0x540] ss:$16 sps:$4 sm:$0xff]   ;;  %v7737_v40 = vld [vmem:[#allocation5 + $0x548] ss:$16 sps:$4 sm:$0xff]  }
 0x120   :  { %1249 = vmatprep.subr.bf16.mxu0 %v7616_v51  ;;  %1335 = vmatprep.subr.bf16.mxu1 %v7619_v52  ;;  %v7679_v51 = vld [vmem:[#allocation5 + $0x40c] ss:$16 sps:$4 sm:$0xff]   ;;  %v7674_v52 = vld [vmem:[#allocation5 + $0x400] ss:$16 sps:$4 sm:$0xff]  }
 0x123   :  { %1250 = vmatpush1.bf16.msra.mxu0 %v7614_v54  ;;  %1336 = vmatpush1.bf16.msra.mxu1 %v7617_v58  ;;  %v6417_v54 = vpack.c.bf16 %v243_v46, %v247_v48  ;;  %v7677_v58 = vld [vmem:[#allocation5 + $0x408] ss:$16 sps:$4 sm:$0xff]   ;;  %v7748_v46 = vld [vmem:[#allocation5 + $0x584] ss:$16 sps:$4 sm:$0xff]   ;;  %v7751_v48 = vld [vmem:[#allocation5 + $0x58c] ss:$16 sps:$4 sm:$0xff]  }
 0x124   :  { %1251 = vmatprep.subr.bf16.mxu0 %v7622_v61  ;;  %1337 = vmatprep.subr.bf16.mxu1 %v7625_v62  ;;  %v7680_v61 = vld [vmem:[#allocation5 + $0x420] ss:$16 sps:$4 sm:$0xff]   ;;  %v7683_v62 = vld [vmem:[#allocation5 + $0x428] ss:$16 sps:$4 sm:$0xff]  }
 0x127   :  { %1252 = vmatpush1.bf16.msra.mxu0 %v7620_v2  ;;  %1338 = vmatpush1.bf16.msra.mxu1 %v7623_v4  ;;  %v7686_v2 = vld [vmem:[#allocation5 + $0x440] ss:$16 sps:$4 sm:$0xff]   ;;  %v7694_v4 = vld [vmem:[#allocation5 + $0x464] ss:$16 sps:$4 sm:$0xff]  }
 0x128   :  { %1253 = vmatprep.subr.bf16.mxu0 %v7628_v5  ;;  %1339 = vmatprep.subr.bf16.mxu1 %v7631_v6  ;;  %v7697_v5 = vld [vmem:[#allocation5 + $0x46c] ss:$16 sps:$4 sm:$0xff]   ;;  %v7692_v6 = vld [vmem:[#allocation5 + $0x460] ss:$16 sps:$4 sm:$0xff]  }
 0x12b   :  { %1254 = vmatpush1.bf16.msra.mxu0 %v7626_v7  ;;  %1340 = vmatpush1.bf16.msra.mxu1 %v7629_v8  ;;  %v7695_v7 = vld [vmem:[#allocation5 + $0x468] ss:$16 sps:$4 sm:$0xff]   ;;  %v7700_v8 = vld [vmem:[#allocation5 + $0x484] ss:$16 sps:$4 sm:$0xff]  }
 0x12c   :  { %1255 = vmatprep.subr.bf16.mxu0 %v7634_v11  ;;  %1341 = vmatprep.subr.bf16.mxu1 %v7637_v12  ;;  %v7703_v11 = vld [vmem:[#allocation5 + $0x48c] ss:$16 sps:$4 sm:$0xff]   ;;  %v7698_v12 = vld [vmem:[#allocation5 + $0x480] ss:$16 sps:$4 sm:$0xff]  }
 0x12f   :  { %1256 = vmatpush1.bf16.msra.mxu0 %v7632_v13  ;;  %1342 = vmatpush1.bf16.msra.mxu1 %v7635_v14  ;;  %v7706_v13 = vld [vmem:[#allocation5 + $0x4a4] ss:$16 sps:$4 sm:$0xff]   ;;  %v7709_v14 = vld [vmem:[#allocation5 + $0x4ac] ss:$16 sps:$4 sm:$0xff]  }
 0x130   :  { %1257 = vmatprep.subr.bf16.mxu0 %v7640_v15  ;;  %1343 = vmatprep.subr.bf16.mxu1 %v7643_v16  ;;  %v7704_v15 = vld [vmem:[#allocation5 + $0x4a0] ss:$16 sps:$4 sm:$0xff]   ;;  %v7707_v16 = vld [vmem:[#allocation5 + $0x4a8] ss:$16 sps:$4 sm:$0xff]  }
 0x133   :  { %1258 = vmatpush1.bf16.msra.mxu0 %v7638_v17  ;;  %1344 = vmatpush1.bf16.msra.mxu1 %v7641_v18  ;;  %v7712_v17 = vld [vmem:[#allocation5 + $0x4c4] ss:$16 sps:$4 sm:$0xff]   ;;  %v7715_v18 = vld [vmem:[#allocation5 + $0x4cc] ss:$16 sps:$4 sm:$0xff]  }
 0x134   :  { %1259 = vmatprep.subr.bf16.mxu0 %v7646_v19  ;;  %1345 = vmatprep.subr.bf16.mxu1 %v7649_v20  ;;  %v7710_v19 = vld [vmem:[#allocation5 + $0x4c0] ss:$16 sps:$4 sm:$0xff]   ;;  %v7713_v20 = vld [vmem:[#allocation5 + $0x4c8] ss:$16 sps:$4 sm:$0xff]  }
 0x137   :  { %1260 = vmatpush1.bf16.msra.mxu0 %v7644_v21  ;;  %1346 = vmatpush1.bf16.msra.mxu1 %v7647_v22  ;;  %v7718_v21 = vld [vmem:[#allocation5 + $0x4e4] ss:$16 sps:$4 sm:$0xff]   ;;  %v7721_v22 = vld [vmem:[#allocation5 + $0x4ec] ss:$16 sps:$4 sm:$0xff]  }
 0x138   :  { %1261 = vmatprep.subr.bf16.mxu0 %v7652_v23  ;;  %1347 = vmatprep.subr.bf16.mxu1 %v7655_v24  ;;  %v7716_v23 = vld [vmem:[#allocation5 + $0x4e0] ss:$16 sps:$4 sm:$0xff]   ;;  %v7719_v24 = vld [vmem:[#allocation5 + $0x4e8] ss:$16 sps:$4 sm:$0xff]  }
 0x13b   :  { %1262 = vmatpush1.bf16.msra.mxu0 %v7650_v25  ;;  %1348 = vmatpush1.bf16.msra.mxu1 %v7653_v27  ;;  %v7724_v25 = vld [vmem:[#allocation5 + $0x504] ss:$16 sps:$4 sm:$0xff]   ;;  %v7727_v27 = vld [vmem:[#allocation5 + $0x50c] ss:$16 sps:$4 sm:$0xff]  }
 0x13c   :  { %1263 = vmatprep.subr.bf16.mxu0 %v7658_v28  ;;  %1349 = vmatprep.subr.bf16.mxu1 %v7661_v29  ;;  %v7722_v28 = vld [vmem:[#allocation5 + $0x500] ss:$16 sps:$4 sm:$0xff]   ;;  %v7725_v29 = vld [vmem:[#allocation5 + $0x508] ss:$16 sps:$4 sm:$0xff]  }
 0x13f   :  { %1264 = vmatpush1.bf16.msra.mxu0 %v7656_v30  ;;  %1350 = vmatpush1.bf16.msra.mxu1 %v7659_v31  ;;  %v7730_v30 = vld [vmem:[#allocation5 + $0x524] ss:$16 sps:$4 sm:$0xff]   ;;  %v7733_v31 = vld [vmem:[#allocation5 + $0x52c] ss:$16 sps:$4 sm:$0xff]  }
 0x140   :  { %1265 = vmatprep.subr.bf16.mxu0 %v7664_v32  ;;  %1351 = vmatprep.subr.bf16.mxu1 %v7667_v33  ;;  %v7728_v32 = vld [vmem:[#allocation5 + $0x520] ss:$16 sps:$4 sm:$0xff]   ;;  %v7731_v33 = vld [vmem:[#allocation5 + $0x528] ss:$16 sps:$4 sm:$0xff]  }
 0x143   :  { %1266 = vmatpush1.bf16.msra.mxu0 %v7662_v36  ;;  %1352 = vmatpush1.bf16.msra.mxu1 %v7665_v37  ;;  %v7736_v36 = vld [vmem:[#allocation5 + $0x544] ss:$16 sps:$4 sm:$0xff]   ;;  %v7739_v37 = vld [vmem:[#allocation5 + $0x54c] ss:$16 sps:$4 sm:$0xff]  }
 0x144   :  { %1267 = vmatprep.subr.bf16.mxu0 %v7670_v41  ;;  %1353 = vmatprep.subr.bf16.mxu1 %v7673_v42  ;;  %v7742_v41 = vld [vmem:[#allocation5 + $0x564] ss:$16 sps:$4 sm:$0xff]   ;;  %v7745_v42 = vld [vmem:[#allocation5 + $0x56c] ss:$16 sps:$4 sm:$0xff]  }
 0x147   :  { %1268 = vmatpush1.bf16.msra.mxu0 %v7668_v44  ;;  %1354 = vmatpush1.bf16.msra.mxu1 %v7671_v45  ;;  %v7740_v44 = vld [vmem:[#allocation5 + $0x560] ss:$16 sps:$4 sm:$0xff]   ;;  %v7743_v45 = vld [vmem:[#allocation5 + $0x568] ss:$16 sps:$4 sm:$0xff]  }
 0x148   :  { %2006 = vmatprep.subr.bf16.mxu0 %v7676_v50  ;;  %2092 = vmatprep.subr.bf16.mxu1 %v7679_v51  ;;  %v7746_v50 = vld [vmem:[#allocation5 + $0x580] ss:$16 sps:$4 sm:$0xff]   ;;  %v7749_v51 = vld [vmem:[#allocation5 + $0x588] ss:$16 sps:$4 sm:$0xff]  }
 0x14a   :  { %6418 = vmatmul.mubr.msk.bf16.vlgmr.msra.gmra.mrb[0].mxu0 %vm9006_vm3, %v6417_v54  ;;  %6430 = vmatmul.mubr.msk.bf16.vlgmr.msra.gmra.mrb[0].mxu1 %vm9006_vm3, %v6417_v54  ;;  %v7757_v54 = vld [vmem:[#allocation5 + $0x5ac] ss:$16 sps:$4 sm:$0xff]  }
 0x14b   :  { %2007 = vmatpush1.bf16.msra.mxu0 %v7674_v52  ;;  %2093 = vmatpush1.bf16.msra.mxu1 %v7677_v58  ;;  %v7754_v52 = vld [vmem:[#allocation5 + $0x5a4] ss:$16 sps:$4 sm:$0xff]   ;;  %v7752_v58 = vld [vmem:[#allocation5 + $0x5a0] ss:$16 sps:$4 sm:$0xff]  }
 0x14c   :  { %2008 = vmatprep.subr.bf16.mxu0 %v7682_v59  ;;  %2094 = vmatprep.subr.bf16.mxu1 %v7685_v60  ;;  %v7755_v59 = vld [vmem:[#allocation5 + $0x5a8] ss:$16 sps:$4 sm:$0xff]   ;;  %v7760_v60 = vld [vmem:[#allocation5 + $0x5c4] ss:$16 sps:$4 sm:$0xff]  }
 0x14d   :  { %2038 = vmatprep.mubr.bf16.mxu0 %v9025_v26  ;;  %2124 = vmatprep.mubr.bf16.mxu1 %v9025_v26  ;;  %v7701_v26 = vld [vmem:[#allocation5 + $0x488] ss:$16 sps:$4 sm:$0xff]  }
 0x14f   :  { %2009 = vmatpush1.bf16.msra.mxu0 %v7680_v61  ;;  %2095 = vmatpush1.bf16.msra.mxu1 %v7683_v62  ;;  %v7763_v61 = vld [vmem:[#allocation5 + $0x5cc] ss:$16 sps:$4 sm:$0xff]   ;;  %v7758_v62 = vld [vmem:[#allocation5 + $0x5c0] ss:$16 sps:$4 sm:$0xff]  }
 0x150   :  { %2010 = vmatprep.subr.bf16.mxu0 %v7688_v63  ;;  %2096 = vmatprep.subr.bf16.mxu1 %v7691_v1  ;;  %v7761_v63 = vld [vmem:[#allocation5 + $0x5c8] ss:$16 sps:$4 sm:$0xff]   ;;  %v7766_v1 = vld [vmem:[#allocation5 + $0x5e4] ss:$16 sps:$4 sm:$0xff]  }
 0x153   :  { %2011 = vmatpush1.bf16.msra.mxu0 %v7686_v2  ;;  %2097 = vmatpush1.bf16.msra.mxu1 %v7689_v3  ;;  %v7769_v2 = vld [vmem:[#allocation5 + $0x5ec] ss:$16 sps:$4 sm:$0xff]   ;;  %v7764_v3 = vld [vmem:[#allocation5 + $0x5e0] ss:$16 sps:$4 sm:$0xff]  }
 0x154   :  { %2012 = vmatprep.subr.bf16.mxu0 %v7694_v4  ;;  %2098 = vmatprep.subr.bf16.mxu1 %v7697_v5  ;;  %v8454_v4 = vld [vmem:[#allocation2 + $0x8] sm:$0xff] }
 0x155   :  { %v266_v5 = vrot.slane %v8454_v4, 1  ;;  %v7841_v4 = vld [vmem:[#allocation5 + $0x76c] ss:$16 sps:$4 sm:$0xff]  }
 0x157   :  { %2013 = vmatpush1.bf16.msra.mxu0 %v7692_v6  ;;  %2099 = vmatpush1.bf16.msra.mxu1 %v7695_v7  ;;  %v8455_v6 = vld [vmem:[#allocation2 + $0x28] sm:$0xff] }
 0x158   :  { %2014 = vmatprep.subr.bf16.mxu0 %v7700_v8  ;;  %2100 = vmatprep.subr.bf16.mxu1 %v7703_v11  ;;  %v270_v7 = vrot.slane %v8455_v6, 1  ;;  %v7767_v8 = vld [vmem:[#allocation5 + $0x5e8] ss:$16 sps:$4 sm:$0xff]   ;;  %v7772_v11 = vld [vmem:[#allocation5 + $0x604] ss:$16 sps:$4 sm:$0xff]  }
 0x159   :  { %v7839_v6 = vld [vmem:[#allocation5 + $0x768] ss:$16 sps:$4 sm:$0xff]  }
 0x15b   :  { %2015 = vmatpush1.bf16.msra.mxu0 %v7698_v12  ;;  %2101 = vmatpush1.bf16.msra.mxu1 %v7701_v26  ;;  %v7775_v12 = vld [vmem:[#allocation5 + $0x60c] ss:$16 sps:$4 sm:$0xff]   ;;  %v7770_v26 = vld [vmem:[#allocation5 + $0x600] ss:$16 sps:$4 sm:$0xff]  }
 0x15c   :  { %2016 = vmatprep.subr.bf16.mxu0 %v7706_v13  ;;  %2102 = vmatprep.subr.bf16.mxu1 %v7709_v14  ;;  %v228_v13 = vpack.c.bf16 %v9016_v10, %v9014_v9  ;;  %v7773_v14 = vld [vmem:[#allocation5 + $0x608] ss:$16 sps:$4 sm:$0xff]   ;;  %v7776_v9 = vld [vmem:[#allocation5 + $0x620] ss:$16 sps:$4 sm:$0xff]  }
 0x15d   :  { %v7779_v10 = vld [vmem:[#allocation5 + $0x628] ss:$16 sps:$4 sm:$0xff]  }
 0x15f   :  { %2017 = vmatpush1.bf16.msra.mxu0 %v7704_v15  ;;  %2103 = vmatpush1.bf16.msra.mxu1 %v7707_v16  ;;  %v275_v15 = vsel %vm273_vm4, %v266_v5, %v270_v7  ;;  %v279_v16 = vsel %vm273_vm4, %v270_v7, %v266_v5  ;;  %v7836_v5 = vld [vmem:[#allocation5 + $0x760] ss:$16 sps:$4 sm:$0xff]   ;;  %v7844_v7 = vld [vmem:[#allocation5 + $0x784] ss:$16 sps:$4 sm:$0xff]  }
 0x160   :  { %2018 = vmatprep.subr.bf16.mxu0 %v7712_v17  ;;  %2104 = vmatprep.subr.bf16.mxu1 %v7715_v18  ;;  %v7778_v17 = vld [vmem:[#allocation5 + $0x624] ss:$16 sps:$4 sm:$0xff]   ;;  %v7781_v18 = vld [vmem:[#allocation5 + $0x62c] ss:$16 sps:$4 sm:$0xff]  }
 0x163   :  { %2019 = vmatpush1.bf16.msra.mxu0 %v7710_v19  ;;  %2105 = vmatpush1.bf16.msra.mxu1 %v7713_v20  ;;  %v9068_v19 = vpack.c.bf16 %v279_v16, %v275_v15  ;;  %v231_v20 = vpack.c.bf16 %v9033_v56, %v9031_v55  ;;  %v7793_v55 = vld [vmem:[#allocation5 + $0x66c] ss:$16 sps:$4 sm:$0xff]   ;;  %v7788_v56 = vld [vmem:[#allocation5 + $0x660] ss:$16 sps:$4 sm:$0xff]   ;;  %v7851_v15 = vld [vmem:[#allocation5 + $0x7a8] ss:$16 sps:$4 sm:$0xff]  }
 0x164   :  { %2020 = vmatprep.subr.bf16.mxu0 %v7718_v21  ;;  %2106 = vmatprep.subr.bf16.mxu1 %v7721_v22  ;;  %v7784_v21 = vld [vmem:[#allocation5 + $0x644] ss:$16 sps:$4 sm:$0xff]   ;;  %v7787_v22 = vld [vmem:[#allocation5 + $0x64c] ss:$16 sps:$4 sm:$0xff]  }
 0x165   :  { %v7856_v16 = vld [vmem:[#allocation5 + $0x7c4] ss:$16 sps:$4 sm:$0xff]  }
 0x167   :  { %2021 = vmatpush1.bf16.msra.mxu0 %v7716_v23  ;;  %2107 = vmatpush1.bf16.msra.mxu1 %v7719_v24  ;;  %v7782_v23 = vld [vmem:[#allocation5 + $0x640] ss:$16 sps:$4 sm:$0xff]   ;;  %v7785_v24 = vld [vmem:[#allocation5 + $0x648] ss:$16 sps:$4 sm:$0xff]  }
 0x168   :  { %2022 = vmatprep.subr.bf16.mxu0 %v7724_v25  ;;  %2108 = vmatprep.subr.bf16.mxu1 %v7727_v27  ;;  %v7790_v25 = vld [vmem:[#allocation5 + $0x664] ss:$16 sps:$4 sm:$0xff]   ;;  %v7791_v27 = vld [vmem:[#allocation5 + $0x668] ss:$16 sps:$4 sm:$0xff]  }
 0x16b   :  { %2023 = vmatpush1.bf16.msra.mxu0 %v7722_v28  ;;  %2109 = vmatpush1.bf16.msra.mxu1 %v7725_v29  ;;  %v7796_v28 = vld [vmem:[#allocation5 + $0x684] ss:$16 sps:$4 sm:$0xff]   ;;  %v7799_v29 = vld [vmem:[#allocation5 + $0x68c] ss:$16 sps:$4 sm:$0xff]  }
 0x16c   :  { %2024 = vmatprep.subr.bf16.mxu0 %v7730_v30  ;;  %2110 = vmatprep.subr.bf16.mxu1 %v7733_v31  ;;  %v7794_v30 = vld [vmem:[#allocation5 + $0x680] ss:$16 sps:$4 sm:$0xff]   ;;  %v7797_v31 = vld [vmem:[#allocation5 + $0x688] ss:$16 sps:$4 sm:$0xff]  }
 0x16f   :  { %2025 = vmatpush1.bf16.msra.mxu0 %v7728_v32  ;;  %2111 = vmatpush1.bf16.msra.mxu1 %v7731_v33  ;;  %v7802_v32 = vld [vmem:[#allocation5 + $0x6a4] ss:$16 sps:$4 sm:$0xff]   ;;  %v7805_v33 = vld [vmem:[#allocation5 + $0x6ac] ss:$16 sps:$4 sm:$0xff]  }
 0x170   :  { %2026 = vmatprep.subr.bf16.mxu0 %v7736_v36  ;;  %2112 = vmatprep.subr.bf16.mxu1 %v7739_v37  ;;  %v7800_v36 = vld [vmem:[#allocation5 + $0x6a0] ss:$16 sps:$4 sm:$0xff]   ;;  %v7803_v37 = vld [vmem:[#allocation5 + $0x6a8] ss:$16 sps:$4 sm:$0xff]  }
 0x173   :  { %2027 = vmatpush1.bf16.msra.mxu0 %v7734_v39  ;;  %2113 = vmatpush1.bf16.msra.mxu1 %v7737_v40  ;;  %v7808_v39 = vld [vmem:[#allocation5 + $0x6c4] ss:$16 sps:$4 sm:$0xff]   ;;  %v7811_v40 = vld [vmem:[#allocation5 + $0x6cc] ss:$16 sps:$4 sm:$0xff]  }
 0x174   :  { %2028 = vmatprep.subr.bf16.mxu0 %v7742_v41  ;;  %2114 = vmatprep.subr.bf16.mxu1 %v7745_v42  ;;  %v7806_v41 = vld [vmem:[#allocation5 + $0x6c0] ss:$16 sps:$4 sm:$0xff]   ;;  %v7809_v42 = vld [vmem:[#allocation5 + $0x6c8] ss:$16 sps:$4 sm:$0xff]  }
 0x177   :  { %2029 = vmatpush1.bf16.msra.mxu0 %v7740_v44  ;;  %2115 = vmatpush1.bf16.msra.mxu1 %v7743_v45  ;;  %v7814_v44 = vld [vmem:[#allocation5 + $0x6e4] ss:$16 sps:$4 sm:$0xff]   ;;  %v7817_v45 = vld [vmem:[#allocation5 + $0x6ec] ss:$16 sps:$4 sm:$0xff]  }
 0x178   :  { %2030 = vmatprep.subr.bf16.mxu0 %v7748_v46  ;;  %2116 = vmatprep.subr.bf16.mxu1 %v7751_v48  ;;  %v7812_v46 = vld [vmem:[#allocation5 + $0x6e0] ss:$16 sps:$4 sm:$0xff]   ;;  %v7815_v48 = vld [vmem:[#allocation5 + $0x6e8] ss:$16 sps:$4 sm:$0xff]  }
 0x17b   :  { %2031 = vmatpush1.bf16.msra.mxu0 %v7746_v50  ;;  %2117 = vmatpush1.bf16.msra.mxu1 %v7749_v51  ;;  %v7820_v50 = vld [vmem:[#allocation5 + $0x704] ss:$16 sps:$4 sm:$0xff]   ;;  %v7823_v51 = vld [vmem:[#allocation5 + $0x70c] ss:$16 sps:$4 sm:$0xff]  }
 0x17c   :  { %2032 = vmatprep.subr.bf16.mxu0 %v7754_v52  ;;  %2118 = vmatprep.subr.bf16.mxu1 %v7757_v54  ;;  %v7818_v52 = vld [vmem:[#allocation5 + $0x700] ss:$16 sps:$4 sm:$0xff]   ;;  %v7821_v54 = vld [vmem:[#allocation5 + $0x708] ss:$16 sps:$4 sm:$0xff]  }
 0x17f   :  { %2033 = vmatpush1.bf16.msra.mxu0 %v7752_v58  ;;  %2119 = vmatpush1.bf16.msra.mxu1 %v7755_v59  ;;  %v7826_v58 = vld [vmem:[#allocation5 + $0x724] ss:$16 sps:$4 sm:$0xff]   ;;  %v7829_v59 = vld [vmem:[#allocation5 + $0x72c] ss:$16 sps:$4 sm:$0xff]  }
 0x180   :  { %2034 = vmatprep.subr.bf16.mxu0 %v7760_v60  ;;  %2120 = vmatprep.subr.bf16.mxu1 %v7763_v61  ;;  %v7824_v60 = vld [vmem:[#allocation5 + $0x720] ss:$16 sps:$4 sm:$0xff]   ;;  %v7827_v61 = vld [vmem:[#allocation5 + $0x728] ss:$16 sps:$4 sm:$0xff]  }
 0x183   :  { %2035 = vmatpush1.bf16.msra.mxu0 %v7758_v62  ;;  %2121 = vmatpush1.bf16.msra.mxu1 %v7761_v63  ;;  %v7832_v62 = vld [vmem:[#allocation5 + $0x744] ss:$16 sps:$4 sm:$0xff]   ;;  %v7835_v63 = vld [vmem:[#allocation5 + $0x74c] ss:$16 sps:$4 sm:$0xff]  }
 0x184   :  { %2036 = vmatprep.subr.bf16.mxu0 %v7766_v1  ;;  %2122 = vmatprep.subr.bf16.mxu1 %v7769_v2  ;;  %v7830_v1 = vld [vmem:[#allocation5 + $0x740] ss:$16 sps:$4 sm:$0xff]   ;;  %v7833_v2 = vld [vmem:[#allocation5 + $0x748] ss:$16 sps:$4 sm:$0xff]  }
 0x187   :  { %2037 = vmatpush1.bf16.msra.mxu0 %v7764_v3  ;;  %2123 = vmatpush1.bf16.msra.mxu1 %v7767_v8  ;;  %v7838_v3 = vld [vmem:[#allocation5 + $0x764] ss:$16 sps:$4 sm:$0xff]   ;;  %v7847_v8 = vld [vmem:[#allocation5 + $0x78c] ss:$16 sps:$4 sm:$0xff]  }
 0x188   :  { %2049 = vmatprep.subr.bf16.mxu0 %v7772_v11  ;;  %2135 = vmatprep.subr.bf16.mxu1 %v7775_v12  ;;  %v7842_v11 = vld [vmem:[#allocation5 + $0x780] ss:$16 sps:$4 sm:$0xff]   ;;  %v7845_v12 = vld [vmem:[#allocation5 + $0x788] ss:$16 sps:$4 sm:$0xff]  }
 0x18a   :  { %2039 = vmatmul.mubr.bf16.vlgmr.msra.gmra.mrb[0].mxu0 %v228_v13  ;;  %2125 = vmatmul.mubr.bf16.vlgmr.msra.gmra.mrb[0].mxu1 %v228_v13  ;;  %v7853_v13 = vld [vmem:[#allocation5 + $0x7ac] ss:$16 sps:$4 sm:$0xff]  }
 0x18b   :  { %2050 = vmatpush1.bf16.msra.mxu0 %v7770_v26  ;;  %2136 = vmatpush1.bf16.msra.mxu1 %v7773_v14  ;;  %v7850_v26 = vld [vmem:[#allocation5 + $0x7a4] ss:$16 sps:$4 sm:$0xff]   ;;  %v7848_v14 = vld [vmem:[#allocation5 + $0x7a0] ss:$16 sps:$4 sm:$0xff]  }
 0x18c   :  { %2051 = vmatprep.subr.bf16.mxu0 %v7778_v17  ;;  %2137 = vmatprep.subr.bf16.mxu1 %v7781_v18  ;;  %v7859_v17 = vld [vmem:[#allocation5 + $0x7cc] ss:$16 sps:$4 sm:$0xff]   ;;  %v7854_v18 = vld [vmem:[#allocation5 + $0x7c0] ss:$16 sps:$4 sm:$0xff]  }
 0x18d   :  { %2081 = vmatprep.mubr.bf16.mxu0 %v231_v20  ;;  %2167 = vmatprep.mubr.bf16.mxu1 %v231_v20  ;;  %v7857_v20 = vld [vmem:[#allocation5 + $0x7c8] ss:$16 sps:$4 sm:$0xff]  }
 0x18f   :  { %2052 = vmatpush1.bf16.msra.mxu0 %v7776_v9  ;;  %2138 = vmatpush1.bf16.msra.mxu1 %v7779_v10  ;;  %v7862_v9 = vld [vmem:[#allocation5 + $0x7e4] ss:$16 sps:$4 sm:$0xff]   ;;  %v7865_v10 = vld [vmem:[#allocation5 + $0x7ec] ss:$16 sps:$4 sm:$0xff]  }
 0x190   :  { %2053 = vmatprep.subr.bf16.mxu0 %v7784_v21  ;;  %2139 = vmatprep.subr.bf16.mxu1 %v7787_v22  ;;  %v7860_v21 = vld [vmem:[#allocation5 + $0x7e0] ss:$16 sps:$4 sm:$0xff]   ;;  %v7863_v22 = vld [vmem:[#allocation5 + $0x7e8] ss:$16 sps:$4 sm:$0xff]  }
 0x193   :  { %2054 = vmatpush1.bf16.msra.mxu0 %v7782_v23  ;;  %2140 = vmatpush1.bf16.msra.mxu1 %v7785_v24  ;;  %v7868_v23 = vld [vmem:[#allocation5 + $0x804] ss:$16 sps:$4 sm:$0xff]   ;;  %v7871_v24 = vld [vmem:[#allocation5 + $0x80c] ss:$16 sps:$4 sm:$0xff]  }
 0x194   :  { %2055 = vmatprep.subr.bf16.mxu0 %v7790_v25  ;;  %2141 = vmatprep.subr.bf16.mxu1 %v7793_v55  ;;  %v7866_v25 = vld [vmem:[#allocation5 + $0x800] ss:$16 sps:$4 sm:$0xff]   ;;  %v230_v55 = vpack.c.bf16 %v9047_v35, %v9045_v34  ;;  %v7880_v34 = vld [vmem:[#allocation5 + $0x844] ss:$16 sps:$4 sm:$0xff]   ;;  %v7883_v35 = vld [vmem:[#allocation5 + $0x84c] ss:$16 sps:$4 sm:$0xff]  }
 0x197   :  { %2056 = vmatpush1.bf16.msra.mxu0 %v7788_v56  ;;  %2142 = vmatpush1.bf16.msra.mxu1 %v7791_v27  ;;  %v7869_v56 = vld [vmem:[#allocation5 + $0x808] ss:$16 sps:$4 sm:$0xff]   ;;  %v8450_v27 = vld [vmem:[%s9617_s11 + $0x40] sm:$0xff]  }
 0x198   :  { %2057 = vmatprep.subr.bf16.mxu0 %v7796_v28  ;;  %2143 = vmatprep.subr.bf16.mxu1 %v7799_v29  ;;  %v7874_v29 = vld [vmem:[#allocation5 + $0x824] ss:$16 sps:$4 sm:$0xff]   ;;  %v8451_v28 = vld [vmem:[%s9617_s11 + $0x48] sm:$0xff]  }
 0x19b   :  { %2058 = vmatpush1.bf16.msra.mxu0 %v7794_v30  ;;  %2144 = vmatpush1.bf16.msra.mxu1 %v7797_v31  ;;  %v7877_v30 = vld [vmem:[#allocation5 + $0x82c] ss:$16 sps:$4 sm:$0xff]   ;;  %v7878_v31 = vld [vmem:[#allocation5 + $0x840] ss:$16 sps:$4 sm:$0xff]  }
 0x19c   :  { %2059 = vmatprep.subr.bf16.mxu0 %v7802_v32  ;;  %2145 = vmatprep.subr.bf16.mxu1 %v7805_v33  ;;  %v7881_v32 = vld [vmem:[#allocation5 + $0x848] ss:$16 sps:$4 sm:$0xff]   ;;  %v7886_v33 = vld [vmem:[#allocation5 + $0x864] ss:$16 sps:$4 sm:$0xff]  }
 0x19f   :  { %2060 = vmatpush1.bf16.msra.mxu0 %v7800_v36  ;;  %2146 = vmatpush1.bf16.msra.mxu1 %v7803_v37  ;;  %v7889_v36 = vld [vmem:[#allocation5 + $0x86c] ss:$16 sps:$4 sm:$0xff]   ;;  %v7884_v37 = vld [vmem:[#allocation5 + $0x860] ss:$16 sps:$4 sm:$0xff]  }
 0x1a0   :  { %2061 = vmatprep.subr.bf16.mxu0 %v7808_v39  ;;  %2147 = vmatprep.subr.bf16.mxu1 %v7811_v40  ;;  %v7887_v39 = vld [vmem:[#allocation5 + $0x868] ss:$16 sps:$4 sm:$0xff]   ;;  %v7892_v40 = vld [vmem:[#allocation5 + $0x884] ss:$16 sps:$4 sm:$0xff]  }
 0x1a3   :  { %2062 = vmatpush1.bf16.msra.mxu0 %v7806_v41  ;;  %2148 = vmatpush1.bf16.msra.mxu1 %v7809_v42  ;;  %v7895_v41 = vld [vmem:[#allocation5 + $0x88c] ss:$16 sps:$4 sm:$0xff]   ;;  %v7890_v42 = vld [vmem:[#allocation5 + $0x880] ss:$16 sps:$4 sm:$0xff]  }
 0x1a4   :  { %2063 = vmatprep.subr.bf16.mxu0 %v7814_v44  ;;  %2149 = vmatprep.subr.bf16.mxu1 %v7817_v45  ;;  %v7893_v44 = vld [vmem:[#allocation5 + $0x888] ss:$16 sps:$4 sm:$0xff]   ;;  %v7898_v45 = vld [vmem:[#allocation5 + $0x8a4] ss:$16 sps:$4 sm:$0xff]  }
 0x1a7   :  { %2064 = vmatpush1.bf16.msra.mxu0 %v7812_v46  ;;  %2150 = vmatpush1.bf16.msra.mxu1 %v7815_v48  ;;  %v7896_v46 = vld [vmem:[#allocation5 + $0x8a0] ss:$16 sps:$4 sm:$0xff]   ;;  %v7899_v48 = vld [vmem:[#allocation5 + $0x8a8] ss:$16 sps:$4 sm:$0xff]  }
 0x1a8   :  { %2065 = vmatprep.subr.bf16.mxu0 %v7820_v50  ;;  %2151 = vmatprep.subr.bf16.mxu1 %v7823_v51  ;;  %v7904_v50 = vld [vmem:[#allocation5 + $0x8c4] ss:$16 sps:$4 sm:$0xff]   ;;  %v7907_v51 = vld [vmem:[#allocation5 + $0x8cc] ss:$16 sps:$4 sm:$0xff]  }
 0x1ab   :  { %2066 = vmatpush1.bf16.msra.mxu0 %v7818_v52  ;;  %2152 = vmatpush1.bf16.msra.mxu1 %v7821_v54  ;;  %v7902_v52 = vld [vmem:[#allocation5 + $0x8c0] ss:$16 sps:$4 sm:$0xff]   ;;  %v7905_v54 = vld [vmem:[#allocation5 + $0x8c8] ss:$16 sps:$4 sm:$0xff]  }
 0x1ac   :  { %2067 = vmatprep.subr.bf16.mxu0 %v7826_v58  ;;  %2153 = vmatprep.subr.bf16.mxu1 %v7829_v59  ;;  %v7910_v58 = vld [vmem:[#allocation5 + $0x8e4] ss:$16 sps:$4 sm:$0xff]   ;;  %v7913_v59 = vld [vmem:[#allocation5 + $0x8ec] ss:$16 sps:$4 sm:$0xff]  }
 0x1af   :  { %2068 = vmatpush1.bf16.msra.mxu0 %v7824_v60  ;;  %2154 = vmatpush1.bf16.msra.mxu1 %v7827_v61  ;;  %v7908_v60 = vld [vmem:[#allocation5 + $0x8e0] ss:$16 sps:$4 sm:$0xff]   ;;  %v7911_v61 = vld [vmem:[#allocation5 + $0x8e8] ss:$16 sps:$4 sm:$0xff]  }
 0x1b0   :  { %2069 = vmatprep.subr.bf16.mxu0 %v7832_v62  ;;  %2155 = vmatprep.subr.bf16.mxu1 %v7835_v63  ;;  %v7916_v62 = vld [vmem:[#allocation5 + $0x904] ss:$16 sps:$4 sm:$0xff]   ;;  %v7919_v63 = vld [vmem:[#allocation5 + $0x90c] ss:$16 sps:$4 sm:$0xff]  }
 0x1b3   :  { %2070 = vmatpush1.bf16.msra.mxu0 %v7830_v1  ;;  %2156 = vmatpush1.bf16.msra.mxu1 %v7833_v2  ;;  %v7914_v1 = vld [vmem:[#allocation5 + $0x900] ss:$16 sps:$4 sm:$0xff]   ;;  %v7917_v2 = vld [vmem:[#allocation5 + $0x908] ss:$16 sps:$4 sm:$0xff]  }
 0x1b4   :  { %2071 = vmatprep.subr.bf16.mxu0 %v7838_v3  ;;  %2157 = vmatprep.subr.bf16.mxu1 %v7841_v4  ;;  %v7922_v3 = vld [vmem:[#allocation5 + $0x924] ss:$16 sps:$4 sm:$0xff]   ;;  %v7925_v4 = vld [vmem:[#allocation5 + $0x92c] ss:$16 sps:$4 sm:$0xff]  }
 0x1b7   :  { %2072 = vmatpush1.bf16.msra.mxu0 %v7836_v5  ;;  %2158 = vmatpush1.bf16.msra.mxu1 %v7839_v6  ;;  %v7920_v5 = vld [vmem:[#allocation5 + $0x920] ss:$16 sps:$4 sm:$0xff]   ;;  %v7923_v6 = vld [vmem:[#allocation5 + $0x928] ss:$16 sps:$4 sm:$0xff]  }
 0x1b8   :  { %2073 = vmatprep.subr.bf16.mxu0 %v7844_v7  ;;  %2159 = vmatprep.subr.bf16.mxu1 %v7847_v8  ;;  %v7928_v7 = vld [vmem:[#allocation5 + $0x944] ss:$16 sps:$4 sm:$0xff]   ;;  %v7931_v8 = vld [vmem:[#allocation5 + $0x94c] ss:$16 sps:$4 sm:$0xff]  }
 0x1bb   :  { %2074 = vmatpush1.bf16.msra.mxu0 %v7842_v11  ;;  %2160 = vmatpush1.bf16.msra.mxu1 %v7845_v12  ;;  %v7926_v11 = vld [vmem:[#allocation5 + $0x940] ss:$16 sps:$4 sm:$0xff]   ;;  %v7929_v12 = vld [vmem:[#allocation5 + $0x948] ss:$16 sps:$4 sm:$0xff]  }
 0x1bc   :  { %2075 = vmatprep.subr.bf16.mxu0 %v7850_v26  ;;  %2161 = vmatprep.subr.bf16.mxu1 %v7853_v13  ;;  %v7934_v26 = vld [vmem:[#allocation5 + $0x964] ss:$16 sps:$4 sm:$0xff]   ;;  %v7937_v13 = vld [vmem:[#allocation5 + $0x96c] ss:$16 sps:$4 sm:$0xff]  }
 0x1bf   :  { %2076 = vmatpush1.bf16.msra.mxu0 %v7848_v14  ;;  %2162 = vmatpush1.bf16.msra.mxu1 %v7851_v15  ;;  %v7932_v14 = vld [vmem:[#allocation5 + $0x960] ss:$16 sps:$4 sm:$0xff]   ;;  %v7935_v15 = vld [vmem:[#allocation5 + $0x968] ss:$16 sps:$4 sm:$0xff]  }
 0x1c0   :  { %2077 = vmatprep.subr.bf16.mxu0 %v7856_v16  ;;  %2163 = vmatprep.subr.bf16.mxu1 %v7859_v17  ;;  %v7940_v16 = vld [vmem:[#allocation5 + $0x984] ss:$16 sps:$4 sm:$0xff]   ;;  %v7943_v17 = vld [vmem:[#allocation5 + $0x98c] ss:$16 sps:$4 sm:$0xff]  }
 0x1c3   :  { %2078 = vmatpush1.bf16.msra.mxu0 %v7854_v18  ;;  %2164 = vmatpush1.bf16.msra.mxu1 %v7857_v20  ;;  %v7938_v18 = vld [vmem:[#allocation5 + $0x980] ss:$16 sps:$4 sm:$0xff]   ;;  %v7941_v20 = vld [vmem:[#allocation5 + $0x988] ss:$16 sps:$4 sm:$0xff]  }
 0x1c4   :  { %2079 = vmatprep.subr.bf16.mxu0 %v7862_v9  ;;  %2165 = vmatprep.subr.bf16.mxu1 %v7865_v10  ;;  %v7946_v9 = vld [vmem:[#allocation5 + $0x9a4] ss:$16 sps:$4 sm:$0xff]   ;;  %v7949_v10 = vld [vmem:[#allocation5 + $0x9ac] ss:$16 sps:$4 sm:$0xff]  }
 0x1c7   :  { %2080 = vmatpush1.bf16.msra.mxu0 %v7860_v21  ;;  %2166 = vmatpush1.bf16.msra.mxu1 %v7863_v22  ;;  %v7944_v21 = vld [vmem:[#allocation5 + $0x9a0] ss:$16 sps:$4 sm:$0xff]   ;;  %v7947_v22 = vld [vmem:[#allocation5 + $0x9a8] ss:$16 sps:$4 sm:$0xff]  }
 0x1c8   :  { %2946 = vmatprep.subr.bf16.mxu0 %v7868_v23  ;;  %3032 = vmatprep.subr.bf16.mxu1 %v7871_v24  ;;  %v7952_v23 = vld [vmem:[#allocation5 + $0x9c4] ss:$16 sps:$4 sm:$0xff]   ;;  %v7955_v24 = vld [vmem:[#allocation5 + $0x9cc] ss:$16 sps:$4 sm:$0xff]  }
 0x1ca   :  { %2082 = vmatmul.mubr.bf16.vlgmr.msra.gmra.mrb[0].mxu0 %v230_v55  ;;  %2168 = vmatmul.mubr.bf16.vlgmr.msra.gmra.mrb[0].mxu1 %v230_v55  ;;  %v7953_v55 = vld [vmem:[#allocation5 + $0x9c8] ss:$16 sps:$4 sm:$0xff]  }
 0x1cb   :  { %2947 = vmatpush1.bf16.msra.mxu0 %v7866_v25  ;;  %3033 = vmatpush1.bf16.msra.mxu1 %v7869_v56  ;;  %v7950_v25 = vld [vmem:[#allocation5 + $0x9c0] ss:$16 sps:$4 sm:$0xff]   ;;  %v7958_v56 = vld [vmem:[#allocation5 + $0x9e4] ss:$16 sps:$4 sm:$0xff]  }
 0x1cc   :  { %2948 = vmatprep.subr.bf16.mxu0 %v7874_v29  ;;  %3034 = vmatprep.subr.bf16.mxu1 %v7877_v30  ;;  %v7961_v29 = vld [vmem:[#allocation5 + $0x9ec] ss:$16 sps:$4 sm:$0xff]   ;;  %v8456_v30 = vld [vmem:[#allocation2] sm:$0xff] }
 0x1cd   :  { %6689 = vmatprep.mubr.msk.bf16.mxu0 %vm9090_vm7, %v9068_v19  ;;  %6701 = vmatprep.mubr.msk.bf16.mxu1 %vm9090_vm7, %v9068_v19  ;;  %v7901_v19 = vld [vmem:[#allocation5 + $0x8ac] ss:$16 sps:$4 sm:$0xff]  }
 0x1cf   :  { %2949 = vmatpush1.bf16.msra.mxu0 %v7872_v43  ;;  %3035 = vmatpush1.bf16.msra.mxu1 %v7875_v49  ;;  %v265_v43 = vrot.slane %v8456_v30, 1  ;;  %v8457_v49 = vld [vmem:[#allocation2 + $0x20] sm:$0xff]  ;;  %v8021_v30 = vld [vmem:[#allocation5 + $0xb2c] ss:$16 sps:$4 sm:$0xff]  }
 0x1d0   :  { %2950 = vmatprep.subr.bf16.mxu0 %v7880_v34  ;;  %3036 = vmatprep.subr.bf16.mxu1 %v7883_v35  ;;  %v269_v34 = vrot.slane %v8457_v49, 1  ;;  %v7956_v35 = vld [vmem:[#allocation5 + $0x9e0] ss:$16 sps:$4 sm:$0xff]   ;;  %v8019_v49 = vld [vmem:[#allocation5 + $0xb28] ss:$16 sps:$4 sm:$0xff]  }
 0x1d3   :  { %2951 = vmatpush1.bf16.msra.mxu0 %v7878_v31  ;;  %3037 = vmatpush1.bf16.msra.mxu1 %v7881_v32  ;;  %v7959_v31 = vld [vmem:[#allocation5 + $0x9e8] ss:$16 sps:$4 sm:$0xff]   ;;  %v7964_v32 = vld [vmem:[#allocation5 + $0xa04] ss:$16 sps:$4 sm:$0xff]  }
 0x1d4   :  { %2952 = vmatprep.subr.bf16.mxu0 %v7886_v33  ;;  %3038 = vmatprep.subr.bf16.mxu1 %v7889_v36  ;;  %v7967_v33 = vld [vmem:[#allocation5 + $0xa0c] ss:$16 sps:$4 sm:$0xff]  }
 0x1d5   :  { %v8458_v36 = vld [vmem:[#allocation2 + $0x18] sm:$0xff] }
 0x1d7   :  { %2953 = vmatpush1.bf16.msra.mxu0 %v7884_v37  ;;  %3039 = vmatpush1.bf16.msra.mxu1 %v7887_v39  ;;  %v268_v37 = vrot.slane %v8458_v36, 1  ;;  %v8459_v39 = vld [vmem:[#allocation2 + $0x38] sm:$0xff] }
 0x1d8   :  { %2954 = vmatprep.subr.bf16.mxu0 %v7892_v40  ;;  %3040 = vmatprep.subr.bf16.mxu1 %v7895_v41  ;;  %v272_v40 = vrot.slane %v8459_v39, 1  ;;  %v274_v41 = vsel %vm273_vm4, %v265_v43, %v269_v34  ;;  %v8033_v36 = vld [vmem:[#allocation5 + $0xb6c] ss:$16 sps:$4 sm:$0xff]   ;;  %v8031_v39 = vld [vmem:[#allocation5 + $0xb68] ss:$16 sps:$4 sm:$0xff]  }
 0x1db   :  { %2955 = vmatpush1.bf16.msra.mxu0 %v7890_v42  ;;  %3041 = vmatpush1.bf16.msra.mxu1 %v7893_v44  ;;  %v278_v42 = vsel %vm273_vm4, %v269_v34, %v265_v43  ;;  %v7962_v44 = vld [vmem:[#allocation5 + $0xa00] ss:$16 sps:$4 sm:$0xff]   ;;  %v8024_v34 = vld [vmem:[#allocation5 + $0xb44] ss:$16 sps:$4 sm:$0xff]  }
 0x1dc   :  { %2956 = vmatprep.subr.bf16.mxu0 %v7898_v45  ;;  %3042 = vmatprep.subr.bf16.mxu1 %v7901_v19  ;;  %v7965_v45 = vld [vmem:[#allocation5 + $0xa08] ss:$16 sps:$4 sm:$0xff]   ;;  %v6691_v19 = vpack.c.bf16 %v278_v42, %v274_v41  ;;  %v8016_v43 = vld [vmem:[#allocation5 + $0xb20] ss:$16 sps:$4 sm:$0xff]   ;;  %v8039_v41 = vld [vmem:[#allocation5 + $0xb8c] ss:$16 sps:$4 sm:$0xff]  }
 0x1dd   :  { %v8034_v42 = vld [vmem:[#allocation5 + $0xb80] ss:$16 sps:$4 sm:$0xff]  }
 0x1df   :  { %2957 = vmatpush1.bf16.msra.mxu0 %v7896_v46  ;;  %3043 = vmatpush1.bf16.msra.mxu1 %v7899_v48  ;;  %v7970_v46 = vld [vmem:[#allocation5 + $0xa24] ss:$16 sps:$4 sm:$0xff]   ;;  %v7973_v48 = vld [vmem:[#allocation5 + $0xa2c] ss:$16 sps:$4 sm:$0xff]  }
 0x1e0   :  { %2958 = vmatprep.subr.bf16.mxu0 %v7904_v50  ;;  %3044 = vmatprep.subr.bf16.mxu1 %v7907_v51  ;;  %v277_v50 = vsel %vm273_vm4, %v268_v37, %v272_v40  ;;  %v281_v51 = vsel %vm273_vm4, %v272_v40, %v268_v37  ;;  %v8028_v37 = vld [vmem:[#allocation5 + $0xb60] ss:$16 sps:$4 sm:$0xff]   ;;  %v8036_v40 = vld [vmem:[#allocation5 + $0xb84] ss:$16 sps:$4 sm:$0xff]  }
 0x1e3   :  { %2959 = vmatpush1.bf16.msra.mxu0 %v7902_v52  ;;  %3045 = vmatpush1.bf16.msra.mxu1 %v7905_v54  ;;  %v7968_v52 = vld [vmem:[#allocation5 + $0xa20] ss:$16 sps:$4 sm:$0xff]   ;;  %v7971_v54 = vld [vmem:[#allocation5 + $0xa28] ss:$16 sps:$4 sm:$0xff]  }
 0x1e4   :  { %2960 = vmatprep.subr.bf16.mxu0 %v7910_v58  ;;  %3046 = vmatprep.subr.bf16.mxu1 %v7913_v59  ;;  %v6694_v58 = vpack.c.bf16 %v281_v51, %v277_v50  ;;  %v7976_v59 = vld [vmem:[#allocation5 + $0xa44] ss:$16 sps:$4 sm:$0xff]   ;;  %v8051_v51 = vld [vmem:[#allocation5 + $0xbcc] ss:$16 sps:$4 sm:$0xff]  }
 0x1e5   :  { %v8048_v50 = vld [vmem:[#allocation5 + $0xbc4] ss:$16 sps:$4 sm:$0xff]  }
 0x1e7   :  { %2961 = vmatpush1.bf16.msra.mxu0 %v7908_v60  ;;  %3047 = vmatpush1.bf16.msra.mxu1 %v7911_v61  ;;  %v7979_v60 = vld [vmem:[#allocation5 + $0xa4c] ss:$16 sps:$4 sm:$0xff]   ;;  %v7974_v61 = vld [vmem:[#allocation5 + $0xa40] ss:$16 sps:$4 sm:$0xff]  }
 0x1e8   :  { %2962 = vmatprep.subr.bf16.mxu0 %v7916_v62  ;;  %3048 = vmatprep.subr.bf16.mxu1 %v7919_v63  ;;  %v7977_v62 = vld [vmem:[#allocation5 + $0xa48] ss:$16 sps:$4 sm:$0xff]   ;;  %v7982_v63 = vld [vmem:[#allocation5 + $0xa64] ss:$16 sps:$4 sm:$0xff]  }
 0x1eb   :  { %2963 = vmatpush1.bf16.msra.mxu0 %v7914_v1  ;;  %3049 = vmatpush1.bf16.msra.mxu1 %v7917_v2  ;;  %v7985_v1 = vld [vmem:[#allocation5 + $0xa6c] ss:$16 sps:$4 sm:$0xff]   ;;  %v7980_v2 = vld [vmem:[#allocation5 + $0xa60] ss:$16 sps:$4 sm:$0xff]  }
 0x1ec   :  { %2964 = vmatprep.subr.bf16.mxu0 %v7922_v3  ;;  %3050 = vmatprep.subr.bf16.mxu1 %v7925_v4  ;;  %v7983_v3 = vld [vmem:[#allocation5 + $0xa68] ss:$16 sps:$4 sm:$0xff]   ;;  %v7988_v4 = vld [vmem:[#allocation5 + $0xa84] ss:$16 sps:$4 sm:$0xff]  }
 0x1ef   :  { %2965 = vmatpush1.bf16.msra.mxu0 %v7920_v5  ;;  %3051 = vmatpush1.bf16.msra.mxu1 %v7923_v6  ;;  %v7991_v5 = vld [vmem:[#allocation5 + $0xa8c] ss:$16 sps:$4 sm:$0xff]   ;;  %v9116_v6 = vld [vmem:[#allocation2 + $0x10] sm:$0xff] }
 0x1f0   :  { %2966 = vmatprep.subr.bf16.mxu0 %v7928_v7  ;;  %3052 = vmatprep.subr.bf16.mxu1 %v7931_v8  ;;  %v267_v7 = vrot.slane %v9116_v6, 1  ;;  %v9119_v8 = vld [vmem:[#allocation2 + $0x30] sm:$0xff] }
 0x1f1   :  { %v8066_v6 = vld [vmem:[#allocation8 + $0x24] ss:$8 sps:$4 sm:$0xff]  }
 0x1f3   :  { %2967 = vmatpush1.bf16.msra.mxu0 %v7926_v11  ;;  %3053 = vmatpush1.bf16.msra.mxu1 %v7929_v12  ;;  %v271_v11 = vrot.slane %v9119_v8, 1  ;;  %v7986_v12 = vld [vmem:[#allocation5 + $0xa80] ss:$16 sps:$4 sm:$0xff]   ;;  %v8064_v8 = vld [vmem:[#allocation8 + $0x20] ss:$8 sps:$4 sm:$0xff]  }
 0x1f4   :  { %2968 = vmatprep.subr.bf16.mxu0 %v7934_v26  ;;  %3054 = vmatprep.subr.bf16.mxu1 %v7937_v13  ;;  %v7989_v26 = vld [vmem:[#allocation5 + $0xa88] ss:$16 sps:$4 sm:$0xff]   ;;  %v7994_v13 = vld [vmem:[#allocation5 + $0xaa4] ss:$16 sps:$4 sm:$0xff]  }
 0x1f7   :  { %2969 = vmatpush1.bf16.msra.mxu0 %v7932_v14  ;;  %3055 = vmatpush1.bf16.msra.mxu1 %v7935_v15  ;;  %v7997_v14 = vld [vmem:[#allocation5 + $0xaac] ss:$16 sps:$4 sm:$0xff]   ;;  %v7992_v15 = vld [vmem:[#allocation5 + $0xaa0] ss:$16 sps:$4 sm:$0xff]  }
 0x1f8   :  { %2970 = vmatprep.subr.bf16.mxu0 %v7940_v16  ;;  %3056 = vmatprep.subr.bf16.mxu1 %v7943_v17  ;;  %v7995_v16 = vld [vmem:[#allocation5 + $0xaa8] ss:$16 sps:$4 sm:$0xff]   ;;  %v8000_v17 = vld [vmem:[#allocation5 + $0xac4] ss:$16 sps:$4 sm:$0xff]  }
 0x1fb   :  { %2971 = vmatpush1.bf16.msra.mxu0 %v7938_v18  ;;  %3057 = vmatpush1.bf16.msra.mxu1 %v7941_v20  ;;  %v8003_v18 = vld [vmem:[#allocation5 + $0xacc] ss:$16 sps:$4 sm:$0xff]   ;;  %v7998_v20 = vld [vmem:[#allocation5 + $0xac0] ss:$16 sps:$4 sm:$0xff]  }
 0x1fc   :  { %2972 = vmatprep.subr.bf16.mxu0 %v7946_v9  ;;  %3058 = vmatprep.subr.bf16.mxu1 %v7949_v10  ;;  %v8001_v9 = vld [vmem:[#allocation5 + $0xac8] ss:$16 sps:$4 sm:$0xff]   ;;  %v8006_v10 = vld [vmem:[#allocation5 + $0xae4] ss:$16 sps:$4 sm:$0xff]  }
 0x1ff   :  { %2973 = vmatpush1.bf16.msra.mxu0 %v7944_v21  ;;  %3059 = vmatpush1.bf16.msra.mxu1 %v7947_v22  ;;  %v8009_v21 = vld [vmem:[#allocation5 + $0xaec] ss:$16 sps:$4 sm:$0xff]   ;;  %v8004_v22 = vld [vmem:[#allocation5 + $0xae0] ss:$16 sps:$4 sm:$0xff]  }
 0x200   :  { %2974 = vmatprep.subr.bf16.mxu0 %v7952_v23  ;;  %3060 = vmatprep.subr.bf16.mxu1 %v7955_v24  ;;  %v8007_v23 = vld [vmem:[#allocation5 + $0xae8] ss:$16 sps:$4 sm:$0xff]   ;;  %v8012_v24 = vld [vmem:[#allocation5 + $0xb04] ss:$16 sps:$4 sm:$0xff]  }
 0x203   :  { %2975 = vmatpush1.bf16.msra.mxu0 %v7950_v25  ;;  %3061 = vmatpush1.bf16.msra.mxu1 %v7953_v55  ;;  %v8015_v25 = vld [vmem:[#allocation5 + $0xb0c] ss:$16 sps:$4 sm:$0xff]   ;;  %v8010_v55 = vld [vmem:[#allocation5 + $0xb00] ss:$16 sps:$4 sm:$0xff]  }
 0x204   :  { %2976 = vmatprep.subr.bf16.mxu0 %v7958_v56  ;;  %3062 = vmatprep.subr.bf16.mxu1 %v7961_v29  ;;  %v8013_v56 = vld [vmem:[#allocation5 + $0xb08] ss:$16 sps:$4 sm:$0xff]   ;;  %v8018_v29 = vld [vmem:[#allocation5 + $0xb24] ss:$16 sps:$4 sm:$0xff]  }
 0x207   :  { %2977 = vmatpush1.bf16.msra.mxu0 %v7956_v35  ;;  %3063 = vmatpush1.bf16.msra.mxu1 %v7959_v31  ;;  %v8027_v35 = vld [vmem:[#allocation5 + $0xb4c] ss:$16 sps:$4 sm:$0xff]   ;;  %v8022_v31 = vld [vmem:[#allocation5 + $0xb40] ss:$16 sps:$4 sm:$0xff]  }
 0x208   :  { %2989 = vmatprep.subr.bf16.mxu0 %v7964_v32  ;;  %3075 = vmatprep.subr.bf16.mxu1 %v7967_v33  ;;  %v8025_v32 = vld [vmem:[#allocation5 + $0xb48] ss:$16 sps:$4 sm:$0xff]   ;;  %v8030_v33 = vld [vmem:[#allocation5 + $0xb64] ss:$16 sps:$4 sm:$0xff]  }
 0x20a   :  { %6692 = vmatmul.mubr.msk.bf16.vlgmr.msra.gmra.mrb[0].mxu0 %vm9090_vm7, %v6691_v19  ;;  %6704 = vmatmul.mubr.msk.bf16.vlgmr.msra.gmra.mrb[0].mxu1 %vm9090_vm7, %v6691_v19  ;;  %v8045_v19 = vld [vmem:[#allocation5 + $0xbac] ss:$16 sps:$4 sm:$0xff]  }
 0x20b   :  { %2990 = vmatpush1.bf16.msra.mxu0 %v7962_v44  ;;  %3076 = vmatpush1.bf16.msra.mxu1 %v7965_v45  ;;  %v8037_v44 = vld [vmem:[#allocation5 + $0xb88] ss:$16 sps:$4 sm:$0xff]   ;;  %v8042_v45 = vld [vmem:[#allocation5 + $0xba4] ss:$16 sps:$4 sm:$0xff]  }
 0x20c   :  { %2991 = vmatprep.subr.bf16.mxu0 %v7970_v46  ;;  %3077 = vmatprep.subr.bf16.mxu1 %v7973_v48  ;;  %v8040_v46 = vld [vmem:[#allocation5 + $0xba0] ss:$16 sps:$4 sm:$0xff]   ;;  %v8043_v48 = vld [vmem:[#allocation5 + $0xba8] ss:$16 sps:$4 sm:$0xff]  }
 0x20d   :  { %6695 = vmatprep.mubr.msk.bf16.mxu0 %vm9090_vm7, %v6694_v58  ;;  %6707 = vmatprep.mubr.msk.bf16.mxu1 %vm9090_vm7, %v6694_v58  ;;  %v8054_v58 = vld [vmem:[#allocation5 + $0xbe4] ss:$16 sps:$4 sm:$0xff]  }
 0x20f   :  { %2992 = vmatpush1.bf16.msra.mxu0 %v7968_v52  ;;  %3078 = vmatpush1.bf16.msra.mxu1 %v7971_v54  ;;  %v8046_v52 = vld [vmem:[#allocation5 + $0xbc0] ss:$16 sps:$4 sm:$0xff]   ;;  %v8049_v54 = vld [vmem:[#allocation5 + $0xbc8] ss:$16 sps:$4 sm:$0xff]  }
 0x210   :  { %2993 = vmatprep.subr.bf16.mxu0 %v7976_v59  ;;  %3079 = vmatprep.subr.bf16.mxu1 %v7979_v60  ;;  %v8057_v59 = vld [vmem:[#allocation5 + $0xbec] ss:$16 sps:$4 sm:$0xff]   ;;  %v8052_v60 = vld [vmem:[#allocation5 + $0xbe0] ss:$16 sps:$4 sm:$0xff]  }
 0x213   :  { %2994 = vmatpush1.bf16.msra.mxu0 %v7974_v61  ;;  %3080 = vmatpush1.bf16.msra.mxu1 %v7977_v62  ;;  %v8055_v61 = vld [vmem:[#allocation5 + $0xbe8] ss:$16 sps:$4 sm:$0xff]  }
 0x214   :  { %2995 = vmatprep.subr.bf16.mxu0 %v7982_v63  ;;  %3081 = vmatprep.subr.bf16.mxu1 %v7985_v1  ;;  %v8060_v62 = vld [vmem:[#allocation8 + $0x4] ss:$8 sps:$4 sm:$0xff]   ;;  %v276_v63 = vsel %vm273_vm4, %v267_v7, %v271_v11  ;;  %v280_v1 = vsel %vm273_vm4, %v271_v11, %v267_v7  ;;  %v8069_v7 = vld [vmem:[#allocation8 + $0x34] ss:$8 sps:$4 sm:$0xff]   ;;  %v8067_v11 = vld [vmem:[#allocation8 + $0x30] ss:$8 sps:$4 sm:$0xff]  }
 0x217   :  { %2996 = vmatpush1.bf16.msra.mxu0 %v7980_v2  ;;  %3082 = vmatpush1.bf16.msra.mxu1 %v7983_v3  ;;  %v8058_v2 = vld [vmem:[#allocation8] ss:$8 sps:$4 sm:$0xff]   ;;  %v6697_v3 = vpack.c.bf16 %v280_v1, %v276_v63 }
 0x218   :  { %2997 = vmatprep.subr.bf16.mxu0 %v7988_v4  ;;  %3083 = vmatprep.subr.bf16.mxu1 %v7991_v5  ;;  %v8063_v4 = vld [vmem:[#allocation8 + $0x14] ss:$8 sps:$4 sm:$0xff]   ;;  %v8061_v5 = vld [vmem:[#allocation8 + $0x10] ss:$8 sps:$4 sm:$0xff]  }
 0x21b   :  { %2998 = vmatpush1.bf16.msra.mxu0 %v7986_v12  ;;  %3084 = vmatpush1.bf16.msra.mxu1 %v7989_v26  ;;  %v8072_v12 = vld [vmem:[#allocation8 + $0x44] ss:$8 sps:$4 sm:$0xff]   ;;  %v8070_v26 = vld [vmem:[#allocation8 + $0x40] ss:$8 sps:$4 sm:$0xff]  }
 0x21c   :  { %2999 = vmatprep.subr.bf16.mxu0 %v7994_v13  ;;  %3085 = vmatprep.subr.bf16.mxu1 %v7997_v14  ;;  %v8075_v13 = vld [vmem:[#allocation8 + $0x54] ss:$8 sps:$4 sm:$0xff]   ;;  %v8073_v14 = vld [vmem:[#allocation8 + $0x50] ss:$8 sps:$4 sm:$0xff]  }
 0x21f   :  { %3000 = vmatpush1.bf16.msra.mxu0 %v7992_v15  ;;  %3086 = vmatpush1.bf16.msra.mxu1 %v7995_v16  ;;  %v8078_v15 = vld [vmem:[#allocation8 + $0x64] ss:$8 sps:$4 sm:$0xff]   ;;  %v8076_v16 = vld [vmem:[#allocation8 + $0x60] ss:$8 sps:$4 sm:$0xff]  }
 0x220   :  { %3001 = vmatprep.subr.bf16.mxu0 %v8000_v17  ;;  %3087 = vmatprep.subr.bf16.mxu1 %v8003_v18  ;;  %v8081_v17 = vld [vmem:[#allocation8 + $0x74] ss:$8 sps:$4 sm:$0xff]   ;;  %v8079_v18 = vld [vmem:[#allocation8 + $0x70] ss:$8 sps:$4 sm:$0xff]  }
 0x223   :  { %3002 = vmatpush1.bf16.msra.mxu0 %v7998_v20  ;;  %3088 = vmatpush1.bf16.msra.mxu1 %v8001_v9  ;;  %v8084_v20 = vld [vmem:[#allocation8 + $0x84] ss:$8 sps:$4 sm:$0xff]   ;;  %v8082_v9 = vld [vmem:[#allocation8 + $0x80] ss:$8 sps:$4 sm:$0xff]  }
 0x224   :  { %3003 = vmatprep.subr.bf16.mxu0 %v8006_v10  ;;  %3089 = vmatprep.subr.bf16.mxu1 %v8009_v21  ;;  %v8087_v10 = vld [vmem:[#allocation8 + $0x94] ss:$8 sps:$4 sm:$0xff]   ;;  %v8085_v21 = vld [vmem:[#allocation8 + $0x90] ss:$8 sps:$4 sm:$0xff]  }
 0x227   :  { %3004 = vmatpush1.bf16.msra.mxu0 %v8004_v22  ;;  %3090 = vmatpush1.bf16.msra.mxu1 %v8007_v23  ;;  %v8090_v22 = vld [vmem:[#allocation8 + $0xa4] ss:$8 sps:$4 sm:$0xff]   ;;  %v8088_v23 = vld [vmem:[#allocation8 + $0xa0] ss:$8 sps:$4 sm:$0xff]  }
 0x228   :  { %3005 = vmatprep.subr.bf16.mxu0 %v8012_v24  ;;  %3091 = vmatprep.subr.bf16.mxu1 %v8015_v25  ;;  %v8093_v24 = vld [vmem:[#allocation8 + $0xb4] ss:$8 sps:$4 sm:$0xff]   ;;  %v8091_v25 = vld [vmem:[#allocation8 + $0xb0] ss:$8 sps:$4 sm:$0xff]  }
 0x22b   :  { %3006 = vmatpush1.bf16.msra.mxu0 %v8010_v55  ;;  %3092 = vmatpush1.bf16.msra.mxu1 %v8013_v56  ;;  %v8096_v55 = vld [vmem:[#allocation8 + $0xc4] ss:$8 sps:$4 sm:$0xff]   ;;  %v8094_v56 = vld [vmem:[#allocation8 + $0xc0] ss:$8 sps:$4 sm:$0xff]  }
 0x22c   :  { %3007 = vmatprep.subr.bf16.mxu0 %v8018_v29  ;;  %3093 = vmatprep.subr.bf16.mxu1 %v8021_v30  ;;  %v8099_v29 = vld [vmem:[#allocation8 + $0xd4] ss:$8 sps:$4 sm:$0xff]   ;;  %v8097_v30 = vld [vmem:[#allocation8 + $0xd0] ss:$8 sps:$4 sm:$0xff]  }
 0x22f   :  { %3008 = vmatpush1.bf16.msra.mxu0 %v8016_v43  ;;  %3094 = vmatpush1.bf16.msra.mxu1 %v8019_v49  ;;  %v8102_v43 = vld [vmem:[#allocation8 + $0xe4] ss:$8 sps:$4 sm:$0xff]   ;;  %v8100_v49 = vld [vmem:[#allocation8 + $0xe0] ss:$8 sps:$4 sm:$0xff]  }
 0x230   :  { %3009 = vmatprep.subr.bf16.mxu0 %v8024_v34  ;;  %3095 = vmatprep.subr.bf16.mxu1 %v8027_v35  ;;  %v8105_v34 = vld [vmem:[#allocation8 + $0xf4] ss:$8 sps:$4 sm:$0xff]   ;;  %v8103_v35 = vld [vmem:[#allocation8 + $0xf0] ss:$8 sps:$4 sm:$0xff]  }
 0x233   :  { %3010 = vmatpush1.bf16.msra.mxu0 %v8022_v31  ;;  %3096 = vmatpush1.bf16.msra.mxu1 %v8025_v32  ;;  %v8108_v31 = vld [vmem:[#allocation8 + $0x104] ss:$8 sps:$4 sm:$0xff]   ;;  %v3130_v32 = vsub.s32 0, %v8975_v38 }
 0x234   :  { %3011 = vmatprep.subr.bf16.mxu0 %v8030_v33  ;;  %3097 = vmatprep.subr.bf16.mxu1 %v8033_v36  ;;  %v3138_v33 = vsub.s32 2, %v8975_v38  ;;  %v3126_v36 = vld [vmem:[#allocation7] sm:$0xf] }
 0x237   :  { %3012 = vmatpush1.bf16.msra.mxu0 %v8028_v37  ;;  %3098 = vmatpush1.bf16.msra.mxu1 %v8031_v39  ;;  %v3134_v37 = vsub.s32 1, %v8975_v38  ;;  %v3142_v39 = vsub.s32 3, %v8975_v38  ;;  %v8447_v38 = vld [vmem:[%s9617_s11 + $0x28] sm:$0xff]  }
 0x238   :  { %3013 = vmatprep.subr.bf16.mxu0 %v8036_v40  ;;  %3099 = vmatprep.subr.bf16.mxu1 %v8039_v41  ;;  %v3131_v40 = vrot.slane %v3126_v36, %v3130_v32  ;;  %v3139_v41 = vrot.slane %v3126_v36, %v3138_v33 }
 0x23b   :  { %3014 = vmatpush1.bf16.msra.mxu0 %v8034_v42  ;;  %3100 = vmatpush1.bf16.msra.mxu1 %v8037_v44  ;;  %v3135_v42 = vrot.slane %v3126_v36, %v3134_v37  ;;  %v3143_v44 = vrot.slane %v3126_v36, %v3142_v39 }
 0x23c   :  { %3015 = vmatprep.subr.bf16.mxu0 %v8042_v45  ;;  %3101 = vmatprep.subr.bf16.mxu1 %v8045_v19 }
 0x23f   :  { %3016 = vmatpush1.bf16.msra.mxu0 %v8040_v46  ;;  %3102 = vmatpush1.bf16.msra.mxu1 %v8043_v48 }
 0x240   :  { %3017 = vmatprep.subr.bf16.mxu0 %v8048_v50  ;;  %3103 = vmatprep.subr.bf16.mxu1 %v8051_v51 }
 0x243   :  { %3018 = vmatpush1.bf16.msra.mxu0 %v8046_v52  ;;  %3104 = vmatpush1.bf16.msra.mxu1 %v8049_v54 }
 0x244   :  { %3019 = vmatprep.subr.bf16.mxu0 %v8054_v58  ;;  %3105 = vmatprep.subr.bf16.mxu1 %v8057_v59 }
 0x247   :  { %3020 = vmatpush1.bf16.msra.mxu0 %v8052_v60  ;;  %3106 = vmatpush1.bf16.msra.mxu1 %v8055_v61 }
 0x248   :  { %3672 = vmatprep.subr.bf16.mxu0 %v8060_v62 }
 0x24a   :  { %6698 = vmatmul.mubr.msk.bf16.vlgmr.msra.gmra.mrb[0].mxu0 %vm9090_vm7, %v6697_v3  ;;  %6710 = vmatmul.mubr.msk.bf16.vlgmr.msra.gmra.mrb[0].mxu1 %vm9090_vm7, %v6697_v3 }
 0x24b   :  { %3673 = vmatpush1.bf16.msra.mxu0 %v8058_v2 }
 0x24c   :  { %3674 = vmatprep.subr.bf16.mxu0 %v8063_v4 }
 0x24f   :  { %3675 = vmatpush1.bf16.msra.mxu0 %v8061_v5 }
 0x250   :  { %3676 = vmatprep.subr.bf16.mxu0 %v8066_v6 }
 0x253   :  { %3677 = vmatpush1.bf16.msra.mxu0 %v8064_v8 }
 0x254   :  { %3678 = vmatprep.subr.bf16.mxu0 %v8069_v7 }
 0x257   :  { %3679 = vmatpush1.bf16.msra.mxu0 %v8067_v11 }
 0x258   :  { %3680 = vmatprep.subr.bf16.mxu0 %v8072_v12 }
 0x25b   :  { %3681 = vmatpush1.bf16.msra.mxu0 %v8070_v26 }
 0x25c   :  { %3682 = vmatprep.subr.bf16.mxu0 %v8075_v13 }
 0x25f   :  { %3683 = vmatpush1.bf16.msra.mxu0 %v8073_v14 }
 0x260   :  { %3684 = vmatprep.subr.bf16.mxu0 %v8078_v15 }
 0x263   :  { %3685 = vmatpush1.bf16.msra.mxu0 %v8076_v16 }
 0x264   :  { %3686 = vmatprep.subr.bf16.mxu0 %v8081_v17 }
 0x267   :  { %3687 = vmatpush1.bf16.msra.mxu0 %v8079_v18 }
 0x268   :  { %3688 = vmatprep.subr.bf16.mxu0 %v8084_v20 }
 0x26b   :  { %3689 = vmatpush1.bf16.msra.mxu0 %v8082_v9 }
 0x26c   :  { %3690 = vmatprep.subr.bf16.mxu0 %v8087_v10 }
 0x26f   :  { %3691 = vmatpush1.bf16.msra.mxu0 %v8085_v21 }
 0x270   :  { %3692 = vmatprep.subr.bf16.mxu0 %v8090_v22 }
 0x273   :  { %3693 = vmatpush1.bf16.msra.mxu0 %v8088_v23 }
 0x274   :  { %3694 = vmatprep.subr.bf16.mxu0 %v8093_v24 }
 0x277   :  { %3695 = vmatpush1.bf16.msra.mxu0 %v8091_v25 }
 0x278   :  { %3696 = vmatprep.subr.bf16.mxu0 %v8096_v55 }
 0x27b   :  { %3697 = vmatpush1.bf16.msra.mxu0 %v8094_v56 }
 0x27c   :  { %3698 = vmatprep.subr.bf16.mxu0 %v8099_v29 }
 0x27f   :  { %3699 = vmatpush1.bf16.msra.mxu0 %v8097_v30 }
 0x280   :  { %3700 = vmatprep.subr.bf16.mxu0 %v8102_v43 }
 0x283   :  { %3701 = vmatpush1.bf16.msra.mxu0 %v8100_v49 }
 0x284   :  { %3702 = vmatprep.subr.bf16.mxu0 %v8105_v34 }
 0x287   :  { %3703 = vmatpush1.bf16.msra.mxu0 %v8103_v35 }
 0x288   :  { %3715 = vmatprep.subr.bf16.mxu0 %v8108_v31 }
 0x31d   :  { %v3023_v45 = vpop.f32.mrb[0].mxu0  ;;  %v3109_v19 = vpop.f32.mrb[0].mxu1 }
 0x31e   :  { %v3148_v46 = vadd.f32 %v3131_v40, %v3023_v45  ;;  %v3150_v48 = vadd.f32 %v3139_v41, %v3109_v19  ;;  %v3025_v50 = vpop.f32.mrb[1].mxu0  ;;  %v3111_v51 = vpop.f32.mrb[1].mxu1 }
 0x31f   :  { %v3149_v52 = vadd.f32 %v3135_v42, %v3025_v50  ;;  %v3151_v54 = vadd.f32 %v3143_v44, %v3111_v51  ;;  %v3027_v58 = vpop.f32.mrb[2].mxu0  ;;  %v3113_v59 = vpop.f32.mrb[2].mxu1 }
 0x320   :  { %v9146_v60 = vmax.f32 %v3148_v46, 0.0  ;;  %v9148_v61 = vmax.f32 %v3150_v48, 0.0  ;;  %v3152_v62 = vadd.f32 %v3131_v40, %v3027_v58  ;;  %v3154_v63 = vadd.f32 %v3139_v41, %v3113_v59  ;;  %v3029_v1 = vpop.f32.mrb[3].mxu0  ;;  %v3115_v2 = vpop.f32.mrb[3].mxu1  ;;  %v8106_v46 = vld [vmem:[#allocation8 + $0x100] ss:$8 sps:$4 sm:$0xff]  }
 0x321   :  { %v9150_v3 = vmax.f32 %v3149_v52, 0.0  ;;  %v9152_v4 = vmax.f32 %v3151_v54, 0.0  ;;  %v3153_v5 = vadd.f32 %v3135_v42, %v3029_v1  ;;  %v3155_v6 = vadd.f32 %v3143_v44, %v3115_v2  ;;  %v8111_v54 = vld [vmem:[#allocation8 + $0x114] ss:$8 sps:$4 sm:$0xff]  }
 0x322   :  { %v3168_v8 = vrot.slane %v9146_v60, 7  ;;  %v3196_v7 = vrot.slane %v9146_v60, 1  ;;  %v3170_v11 = vrot.slane %v9148_v61, 7  ;;  %v3198_v12 = vrot.slane %v9148_v61, 1 }
 0x323   :  { %v3169_v26 = vrot.slane %v9150_v3, 7  ;;  %v9159_v13 = vmax.f32 %v3152_v62, 0.0  ;;  %v9161_v14 = vmax.f32 %v3154_v63, 0.0  ;;  %v9163_v15 = vmax.f32 %v3153_v5, 0.0 }
 0x324   :  { %v3197_v16 = vrot.slane %v9150_v3, 1  ;;  %v3171_v17 = vrot.slane %v9152_v4, 7  ;;  %v3199_v18 = vrot.slane %v9152_v4, 1  ;;  %v9168_v20 = vmax.f32 %v3155_v6, 0.0  ;;  %v8109_v6 = vld [vmem:[#allocation8 + $0x110] ss:$8 sps:$4 sm:$0xff]  }
 0x325   :  { %v3164_v9 = vpack.c.bf16 %v9159_v13, %v9146_v60  ;;  %v3172_v10 = vrot.slane %v9159_v13, 7  ;;  %v3200_v21 = vrot.slane %v9159_v13, 1  ;;  %v3166_v22 = vpack.c.bf16 %v9161_v14, %v9148_v61  ;;  %v8219_v60 = vld [vmem:[#allocation8 + $0x354] ss:$8 sps:$4 sm:$0xff]   ;;  %v8217_v13 = vld [vmem:[#allocation8 + $0x350] ss:$8 sps:$4 sm:$0xff]  }
 0x326   :  { %v3174_v23 = vrot.slane %v9161_v14, 7  ;;  %v3202_v24 = vrot.slane %v9161_v14, 1  ;;  %v3173_v25 = vrot.slane %v9163_v15, 7  ;;  %v3201_v55 = vrot.slane %v9163_v15, 1  ;;  %v8256_v61 = vld [vmem:[#allocation8 + $0x420] ss:$8 sps:$4 sm:$0xff]  }
 0x327   :  { %v3176_v56 = vsel %vm240_vm0, %v3168_v8, %v3172_v10  ;;  %v3180_v29 = vsel %vm240_vm0, %v3172_v10, %v3168_v8  ;;  %v9186_v30 = vsel %vm273_vm4, %v3196_v7, %v3200_v21  ;;  %v9190_v43 = vsel %vm273_vm4, %v3200_v21, %v3196_v7  ;;  %v8114_v8 = vld [vmem:[#allocation8 + $0x124] ss:$8 sps:$4 sm:$0xff]   ;;  %v8112_v7 = vld [vmem:[#allocation8 + $0x120] ss:$8 sps:$4 sm:$0xff]   ;;  %v8261_v14 = vld [vmem:[#allocation8 + $0x434] ss:$8 sps:$4 sm:$0xff]  }
 0x328   :  { %v6779_v49 = vpack.c.bf16 %v3176_v56, %v3180_v29  ;;  %v6919_v34 = vpack.c.bf16 %v9190_v43, %v9186_v30  ;;  %v9196_v35 = vsel %vm240_vm0, %v3170_v11, %v3174_v23  ;;  %v9200_v31 = vsel %vm240_vm0, %v3174_v23, %v3170_v11  ;;  %v8117_v11 = vld [vmem:[#allocation8 + $0x134] ss:$8 sps:$4 sm:$0xff]   ;;  %v8126_v10 = vld [vmem:[#allocation8 + $0x164] ss:$8 sps:$4 sm:$0xff]   ;;  %v8124_v21 = vld [vmem:[#allocation8 + $0x160] ss:$8 sps:$4 sm:$0xff]  }
 0x329   :  { %v9204_v33 = vsel %vm273_vm4, %v3198_v12, %v3202_v24  ;;  %v9208_v36 = vsel %vm273_vm4, %v3202_v24, %v3198_v12  ;;  %v6785_v39 = vpack.c.bf16 %v9196_v35, %v9200_v31  ;;  %v3175_v40 = vrot.slane %v9168_v20, 7  ;;  %v8115_v12 = vld [vmem:[#allocation8 + $0x130] ss:$8 sps:$4 sm:$0xff]   ;;  %v8129_v23 = vld [vmem:[#allocation8 + $0x174] ss:$8 sps:$4 sm:$0xff]  }
 0x32a   :  { %v6925_v41 = vpack.c.bf16 %v9208_v36, %v9204_v33  ;;  %v3203_v42 = vrot.slane %v9168_v20, 1  ;;  %v3177_v44 = vsel %vm240_vm0, %v3169_v26, %v3173_v25  ;;  %v3181_v45 = vsel %vm240_vm0, %v3173_v25, %v3169_v26  ;;  %v8120_v26 = vld [vmem:[#allocation8 + $0x144] ss:$8 sps:$4 sm:$0xff]   ;;  %v8127_v24 = vld [vmem:[#allocation8 + $0x170] ss:$8 sps:$4 sm:$0xff]  }
 0x32b   :  { %v6776_v19 = vpack.c.bf16 %v3177_v44, %v3181_v45  ;;  %v3179_v48 = vsel %vm240_vm0, %v3171_v17, %v3175_v40  ;;  %v3183_v50 = vsel %vm240_vm0, %v3175_v40, %v3171_v17  ;;  %v3165_v51 = vpack.c.bf16 %v9163_v15, %v9150_v3  ;;  %v8123_v17 = vld [vmem:[#allocation8 + $0x154] ss:$8 sps:$4 sm:$0xff]   ;;  %v8132_v25 = vld [vmem:[#allocation8 + $0x184] ss:$8 sps:$4 sm:$0xff]   ;;  %v8133_v29 = vld [vmem:[#allocation8 + $0x190] ss:$8 sps:$4 sm:$0xff]  }
 0x32c   :  { %v6782_v52 = vpack.c.bf16 %v3179_v48, %v3183_v50  ;;  %v3167_v58 = vpack.c.bf16 %v9168_v20, %v9152_v4  ;;  %v9230_v59 = vsel %vm273_vm4, %v3197_v16, %v3201_v55  ;;  %v9234_v62 = vsel %vm273_vm4, %v3201_v55, %v3197_v16  ;;  %v8118_v16 = vld [vmem:[#allocation8 + $0x140] ss:$8 sps:$4 sm:$0xff]   ;;  %v8135_v56 = vld [vmem:[#allocation8 + $0x194] ss:$8 sps:$4 sm:$0xff]   ;;  %v8139_v44 = vld [vmem:[#allocation8 + $0x1b0] ss:$8 sps:$4 sm:$0xff]  }
 0x32d   :  { %6777 = vmatprep.mubr.msk.bf16.mxu0 %vm9006_vm3, %v6776_v19  ;;  %v6916_v63 = vpack.c.bf16 %v9234_v62, %v9230_v59  ;;  %v9242_v1 = vsel %vm273_vm4, %v3199_v18, %v3203_v42  ;;  %v9246_v2 = vsel %vm273_vm4, %v3203_v42, %v3199_v18  ;;  %v8121_v18 = vld [vmem:[#allocation8 + $0x150] ss:$8 sps:$4 sm:$0xff]   ;;  %v8130_v55 = vld [vmem:[#allocation8 + $0x180] ss:$8 sps:$4 sm:$0xff]   ;;  %v8141_v42 = vld [vmem:[#allocation8 + $0x1b4] ss:$8 sps:$4 sm:$0xff]  }
 0x32e   :  { %6780 = vmatmul.mubr.msk.bf16.vlgmr.msra.gmra.mrb[4].mxu0 %vm9006_vm3, %v6779_v49  ;;  %v6922_v5 = vpack.c.bf16 %v9246_v2, %v9242_v1  ;;  %v8138_v49 = vld [vmem:[#allocation8 + $0x1a4] ss:$8 sps:$4 sm:$0xff]   ;;  %v8136_v40 = vld [vmem:[#allocation8 + $0x1a0] ss:$8 sps:$4 sm:$0xff]   ;;  %v8145_v48 = vld [vmem:[#allocation8 + $0x1d0] ss:$8 sps:$4 sm:$0xff]  }
 0x32f   :  { %3716 = vmatpush1.bf16.msra.mxu0 %v8106_v46  ;;  %6783 = vmatprep.mubr.msk.bf16.mxu0 %vm9006_vm3, %v6782_v52  ;;  %v8144_v45 = vld [vmem:[#allocation8 + $0x1c4] ss:$8 sps:$4 sm:$0xff]   ;;  %v8142_v19 = vld [vmem:[#allocation8 + $0x1c0] ss:$8 sps:$4 sm:$0xff]   ;;  %v8147_v46 = vld [vmem:[#allocation8 + $0x1d4] ss:$8 sps:$4 sm:$0xff]  }
 0x330   :  { %3717 = vmatprep.subr.bf16.mxu0 %v8111_v54  ;;  %v8150_v50 = vld [vmem:[#allocation8 + $0x1e4] ss:$8 sps:$4 sm:$0xff]   ;;  %v8148_v52 = vld [vmem:[#allocation8 + $0x1e0] ss:$8 sps:$4 sm:$0xff]   ;;  %v8153_v54 = vld [vmem:[#allocation8 + $0x1f4] ss:$8 sps:$4 sm:$0xff]  }
 0x331   :  { %v8166_v35 = vld [vmem:[#allocation8 + $0x240] ss:$8 sps:$4 sm:$0xff]   ;;  %v8171_v31 = vld [vmem:[#allocation8 + $0x254] ss:$8 sps:$4 sm:$0xff]   ;;  %v8174_v3 = vld [vmem:[#allocation8 + $0x264] ss:$8 sps:$4 sm:$0xff]  }
 0x332   :  { %v8172_v15 = vld [vmem:[#allocation8 + $0x260] ss:$8 sps:$4 sm:$0xff]   ;;  %v8222_v4 = vld [vmem:[#allocation8 + $0x364] ss:$8 sps:$4 sm:$0xff]   ;;  %v8259_v59 = vld [vmem:[#allocation8 + $0x430] ss:$8 sps:$4 sm:$0xff]  }
 0x333   :  { %3718 = vmatpush1.bf16.msra.mxu0 %v8109_v6  ;;  %v8151_v6 = vld [vmem:[#allocation8 + $0x1f0] ss:$8 sps:$4 sm:$0xff]   ;;  %v8220_v20 = vld [vmem:[#allocation8 + $0x360] ss:$8 sps:$4 sm:$0xff]   ;;  %v8264_v62 = vld [vmem:[#allocation8 + $0x444] ss:$8 sps:$4 sm:$0xff]  }
 0x334   :  { %3719 = vmatprep.subr.bf16.mxu0 %v8114_v8  ;;  %v8156_v8 = vld [vmem:[#allocation8 + $0x204] ss:$8 sps:$4 sm:$0xff]   ;;  %v8310_v43 = vld [vmem:[#allocation8 + $0x540] ss:$8 sps:$4 sm:$0xff]   ;;  %v8313_v1 = vld [vmem:[#allocation8 + $0x550] ss:$8 sps:$4 sm:$0xff]  }
 0x335   :  { %v8312_v30 = vld [vmem:[#allocation8 + $0x544] ss:$8 sps:$4 sm:$0xff]  }
 0x336   :  { %v8318_v2 = vld [vmem:[#allocation8 + $0x564] ss:$8 sps:$4 sm:$0xff]  }
 0x337   :  { %3720 = vmatpush1.bf16.msra.mxu0 %v8112_v7  ;;  %v8154_v7 = vld [vmem:[#allocation8 + $0x200] ss:$8 sps:$4 sm:$0xff]  }
 0x338   :  { %3721 = vmatprep.subr.bf16.mxu0 %v8117_v11  ;;  %v8159_v11 = vld [vmem:[#allocation8 + $0x214] ss:$8 sps:$4 sm:$0xff]  }
 0x33b   :  { %3722 = vmatpush1.bf16.msra.mxu0 %v8115_v12  ;;  %v8157_v12 = vld [vmem:[#allocation8 + $0x210] ss:$8 sps:$4 sm:$0xff]  }
 0x33c   :  { %3723 = vmatprep.subr.bf16.mxu0 %v8120_v26  ;;  %v8162_v26 = vld [vmem:[#allocation8 + $0x224] ss:$8 sps:$4 sm:$0xff]  }
 0x33f   :  { %3724 = vmatpush1.bf16.msra.mxu0 %v8118_v16  ;;  %v8160_v16 = vld [vmem:[#allocation8 + $0x220] ss:$8 sps:$4 sm:$0xff]  }
 0x340   :  { %3725 = vmatprep.subr.bf16.mxu0 %v8123_v17  ;;  %v8165_v17 = vld [vmem:[#allocation8 + $0x234] ss:$8 sps:$4 sm:$0xff]  }
 0x343   :  { %3726 = vmatpush1.bf16.msra.mxu0 %v8121_v18  ;;  %v8163_v18 = vld [vmem:[#allocation8 + $0x230] ss:$8 sps:$4 sm:$0xff]  }
 0x344   :  { %3727 = vmatprep.subr.bf16.mxu0 %v8126_v10  ;;  %v8168_v10 = vld [vmem:[#allocation8 + $0x244] ss:$8 sps:$4 sm:$0xff]  }
 0x347   :  { %3728 = vmatpush1.bf16.msra.mxu0 %v8124_v21  ;;  %v8175_v21 = vld [vmem:[#allocation8 + $0x270] ss:$8 sps:$4 sm:$0xff]  }
 0x348   :  { %3729 = vmatprep.subr.bf16.mxu0 %v8129_v23  ;;  %v8180_v23 = vld [vmem:[#allocation8 + $0x284] ss:$8 sps:$4 sm:$0xff]  }
 0x34b   :  { %3730 = vmatpush1.bf16.msra.mxu0 %v8127_v24  ;;  %v8178_v24 = vld [vmem:[#allocation8 + $0x280] ss:$8 sps:$4 sm:$0xff]  }
 0x34c   :  { %3731 = vmatprep.subr.bf16.mxu0 %v8132_v25  ;;  %v8183_v25 = vld [vmem:[#allocation8 + $0x294] ss:$8 sps:$4 sm:$0xff]  }
 0x34f   :  { %3732 = vmatpush1.bf16.msra.mxu0 %v8130_v55  ;;  %v8181_v55 = vld [vmem:[#allocation8 + $0x290] ss:$8 sps:$4 sm:$0xff]  }
 0x350   :  { %3733 = vmatprep.subr.bf16.mxu0 %v8135_v56  ;;  %v8186_v56 = vld [vmem:[#allocation8 + $0x2a4] ss:$8 sps:$4 sm:$0xff]  }
 0x353   :  { %3734 = vmatpush1.bf16.msra.mxu0 %v8133_v29  ;;  %v8184_v29 = vld [vmem:[#allocation8 + $0x2a0] ss:$8 sps:$4 sm:$0xff]  }
 0x354   :  { %3735 = vmatprep.subr.bf16.mxu0 %v8138_v49  ;;  %v8189_v49 = vld [vmem:[#allocation8 + $0x2b4] ss:$8 sps:$4 sm:$0xff]  }
 0x357   :  { %3736 = vmatpush1.bf16.msra.mxu0 %v8136_v40  ;;  %v8187_v40 = vld [vmem:[#allocation8 + $0x2b0] ss:$8 sps:$4 sm:$0xff]  }
 0x358   :  { %3737 = vmatprep.subr.bf16.mxu0 %v8141_v42  ;;  %v8192_v42 = vld [vmem:[#allocation8 + $0x2c4] ss:$8 sps:$4 sm:$0xff]  }
 0x35b   :  { %3738 = vmatpush1.bf16.msra.mxu0 %v8139_v44  ;;  %v8190_v44 = vld [vmem:[#allocation8 + $0x2c0] ss:$8 sps:$4 sm:$0xff]  }
 0x35c   :  { %3739 = vmatprep.subr.bf16.mxu0 %v8144_v45  ;;  %v8195_v45 = vld [vmem:[#allocation8 + $0x2d4] ss:$8 sps:$4 sm:$0xff]  }
 0x35f   :  { %3740 = vmatpush1.bf16.msra.mxu0 %v8142_v19  ;;  %v8193_v19 = vld [vmem:[#allocation8 + $0x2d0] ss:$8 sps:$4 sm:$0xff]  }
 0x360   :  { %3741 = vmatprep.subr.bf16.mxu0 %v8147_v46  ;;  %v8198_v46 = vld [vmem:[#allocation8 + $0x2e4] ss:$8 sps:$4 sm:$0xff]  }
 0x363   :  { %3742 = vmatpush1.bf16.msra.mxu0 %v8145_v48  ;;  %v8196_v48 = vld [vmem:[#allocation8 + $0x2e0] ss:$8 sps:$4 sm:$0xff]  }
 0x364   :  { %3743 = vmatprep.subr.bf16.mxu0 %v8150_v50  ;;  %v8201_v50 = vld [vmem:[#allocation8 + $0x2f4] ss:$8 sps:$4 sm:$0xff]  }
 0x367   :  { %3744 = vmatpush1.bf16.msra.mxu0 %v8148_v52  ;;  %v8199_v52 = vld [vmem:[#allocation8 + $0x2f0] ss:$8 sps:$4 sm:$0xff]  }
 0x368   :  { %3745 = vmatprep.subr.bf16.mxu0 %v8153_v54  ;;  %v8204_v54 = vld [vmem:[#allocation8 + $0x304] ss:$8 sps:$4 sm:$0xff]  }
 0x36b   :  { %3746 = vmatpush1.bf16.msra.mxu0 %v8151_v6  ;;  %v8202_v6 = vld [vmem:[#allocation8 + $0x300] ss:$8 sps:$4 sm:$0xff]  }
 0x36c   :  { %4078 = vmatprep.subr.bf16.mxu0 %v8156_v8  ;;  %v8207_v8 = vld [vmem:[#allocation8 + $0x314] ss:$8 sps:$4 sm:$0xff]  }
 0x36e   :  { %6786 = vmatmul.mubr.msk.bf16.vlgmr.msra.gmra.mrb[4].mxu0 %vm9006_vm3, %v6785_v39  ;;  %v8169_v39 = vld [vmem:[#allocation8 + $0x250] ss:$8 sps:$4 sm:$0xff]  }
 0x36f   :  { %4079 = vmatpush1.bf16.msra.mxu0 %v8154_v7  ;;  %4110 = vmatprep.mubr.bf16.mxu0 %v3165_v51  ;;  %v8177_v51 = vld [vmem:[#allocation8 + $0x274] ss:$8 sps:$4 sm:$0xff]   ;;  %v8205_v7 = vld [vmem:[#allocation8 + $0x310] ss:$8 sps:$4 sm:$0xff]  }
 0x370   :  { %4080 = vmatprep.subr.bf16.mxu0 %v8159_v11  ;;  %v8210_v11 = vld [vmem:[#allocation8 + $0x324] ss:$8 sps:$4 sm:$0xff]  }
 0x373   :  { %4081 = vmatpush1.bf16.msra.mxu0 %v8157_v12  ;;  %v8208_v12 = vld [vmem:[#allocation8 + $0x320] ss:$8 sps:$4 sm:$0xff]  }
 0x374   :  { %4082 = vmatprep.subr.bf16.mxu0 %v8162_v26  ;;  %v8213_v26 = vld [vmem:[#allocation8 + $0x334] ss:$8 sps:$4 sm:$0xff]  }
 0x377   :  { %4083 = vmatpush1.bf16.msra.mxu0 %v8160_v16  ;;  %v8211_v16 = vld [vmem:[#allocation8 + $0x330] ss:$8 sps:$4 sm:$0xff]  }
 0x378   :  { %4084 = vmatprep.subr.bf16.mxu0 %v8165_v17  ;;  %v8216_v17 = vld [vmem:[#allocation8 + $0x344] ss:$8 sps:$4 sm:$0xff]  }
 0x37b   :  { %4085 = vmatpush1.bf16.msra.mxu0 %v8163_v18  ;;  %v8214_v18 = vld [vmem:[#allocation8 + $0x340] ss:$8 sps:$4 sm:$0xff]  }
 0x37c   :  { %4086 = vmatprep.subr.bf16.mxu0 %v8168_v10  ;;  %v8228_v10 = vld [vmem:[#allocation8 + $0x384] ss:$8 sps:$4 sm:$0xff]  }
 0x37f   :  { %4087 = vmatpush1.bf16.msra.mxu0 %v8166_v35  ;;  %v8226_v35 = vld [vmem:[#allocation8 + $0x380] ss:$8 sps:$4 sm:$0xff]  }
 0x380   :  { %4088 = vmatprep.subr.bf16.mxu0 %v8171_v31  ;;  %v8231_v31 = vld [vmem:[#allocation8 + $0x394] ss:$8 sps:$4 sm:$0xff]  }
 0x383   :  { %4089 = vmatpush1.bf16.msra.mxu0 %v8169_v39  ;;  %v8229_v39 = vld [vmem:[#allocation8 + $0x390] ss:$8 sps:$4 sm:$0xff]  }
 0x384   :  { %4090 = vmatprep.subr.bf16.mxu0 %v8174_v3  ;;  %v8234_v3 = vld [vmem:[#allocation8 + $0x3a4] ss:$8 sps:$4 sm:$0xff]  }
 0x387   :  { %4091 = vmatpush1.bf16.msra.mxu0 %v8172_v15  ;;  %v8232_v15 = vld [vmem:[#allocation8 + $0x3a0] ss:$8 sps:$4 sm:$0xff]  }
 0x388   :  { %4092 = vmatprep.subr.bf16.mxu0 %v8177_v51  ;;  %v8237_v51 = vld [vmem:[#allocation8 + $0x3b4] ss:$8 sps:$4 sm:$0xff]  }
 0x38b   :  { %4093 = vmatpush1.bf16.msra.mxu0 %v8175_v21  ;;  %v8235_v21 = vld [vmem:[#allocation8 + $0x3b0] ss:$8 sps:$4 sm:$0xff]  }
 0x38c   :  { %4094 = vmatprep.subr.bf16.mxu0 %v8180_v23  ;;  %v8240_v23 = vld [vmem:[#allocation8 + $0x3c4] ss:$8 sps:$4 sm:$0xff]  }
 0x38f   :  { %4095 = vmatpush1.bf16.msra.mxu0 %v8178_v24  ;;  %v8238_v24 = vld [vmem:[#allocation8 + $0x3c0] ss:$8 sps:$4 sm:$0xff]  }
 0x390   :  { %4096 = vmatprep.subr.bf16.mxu0 %v8183_v25  ;;  %v8243_v25 = vld [vmem:[#allocation8 + $0x3d4] ss:$8 sps:$4 sm:$0xff]  }
 0x393   :  { %4097 = vmatpush1.bf16.msra.mxu0 %v8181_v55  ;;  %v8241_v55 = vld [vmem:[#allocation8 + $0x3d0] ss:$8 sps:$4 sm:$0xff]  }
 0x394   :  { %4098 = vmatprep.subr.bf16.mxu0 %v8186_v56  ;;  %v8246_v56 = vld [vmem:[#allocation8 + $0x3e4] ss:$8 sps:$4 sm:$0xff]  }
 0x397   :  { %4099 = vmatpush1.bf16.msra.mxu0 %v8184_v29  ;;  %v8244_v29 = vld [vmem:[#allocation8 + $0x3e0] ss:$8 sps:$4 sm:$0xff]  }
 0x398   :  { %4100 = vmatprep.subr.bf16.mxu0 %v8189_v49  ;;  %v8249_v49 = vld [vmem:[#allocation8 + $0x3f4] ss:$8 sps:$4 sm:$0xff]  }
 0x39b   :  { %4101 = vmatpush1.bf16.msra.mxu0 %v8187_v40  ;;  %v8247_v40 = vld [vmem:[#allocation8 + $0x3f0] ss:$8 sps:$4 sm:$0xff]  }
 0x39c   :  { %4102 = vmatprep.subr.bf16.mxu0 %v8192_v42  ;;  %v8252_v42 = vld [vmem:[#allocation8 + $0x404] ss:$8 sps:$4 sm:$0xff]  }
 0x39f   :  { %4103 = vmatpush1.bf16.msra.mxu0 %v8190_v44  ;;  %v8250_v44 = vld [vmem:[#allocation8 + $0x400] ss:$8 sps:$4 sm:$0xff]  }
 0x3a0   :  { %4104 = vmatprep.subr.bf16.mxu0 %v8195_v45  ;;  %v8255_v45 = vld [vmem:[#allocation8 + $0x414] ss:$8 sps:$4 sm:$0xff]  }
 0x3a3   :  { %4105 = vmatpush1.bf16.msra.mxu0 %v8193_v19  ;;  %v8346_v19 = vld [vmem:[#allocation11 + $0x40] sm:$0xff]  }
 0x3a4   :  { %4106 = vmatprep.subr.bf16.mxu0 %v8198_v46  ;;  %v8347_v46 = vld [vmem:[#allocation11] sm:$0xff]   ;;  %7068 = vmatprep.subr.bf16.mxu1 %v8346_v19  ;;  %v8307_v19 = vld [vmem:[#allocation8 + $0x530] ss:$8 sps:$4 sm:$0xff]  }
 0x3a5   :  { %7069 = vmatpush3.bf16.msra.mxu1 %v8347_v46  ;;  %v8321_v46 = vld [vmem:[#allocation8 + $0x574] ss:$8 sps:$4 sm:$0xff]  }
 0x3a7   :  { %4107 = vmatpush1.bf16.msra.mxu0 %v8196_v48  ;;  %v8348_v48 = vld [vmem:[#allocation11 + $0x48] sm:$0xff]  }
 0x3a8   :  { %4108 = vmatprep.subr.bf16.mxu0 %v8201_v50  ;;  %v8253_v50 = vld [vmem:[#allocation8 + $0x410] ss:$8 sps:$4 sm:$0xff]   ;;  %7070 = vmatprep.subr.bf16.mxu1 %v8348_v48 }
 0x3a9   :  { %v8319_v48 = vld [vmem:[#allocation8 + $0x570] ss:$8 sps:$4 sm:$0xff]  }
 0x3ab   :  { %4109 = vmatpush1.bf16.msra.mxu0 %v8199_v52  ;;  %v8258_v52 = vld [vmem:[#allocation8 + $0x424] ss:$8 sps:$4 sm:$0xff]  }
 0x3ac   :  { %4121 = vmatprep.subr.bf16.mxu0 %v8204_v54  ;;  %v8349_v54 = vld [vmem:[#allocation11 + $0x8] sm:$0xff]  }
 0x3ad   :  { %7071 = vmatpush3.bf16.msra.mxu1 %v8349_v54  ;;  %v8327_v54 = vld [vmem:[#allocation8 + $0x594] ss:$8 sps:$4 sm:$0xff]  }
 0x3ae   :  { %4111 = vmatmul.mubr.bf16.vlgmr.msra.gmra.mrb[4].mxu0 %v3164_v9  ;;  %v8225_v9 = vld [vmem:[#allocation8 + $0x374] ss:$8 sps:$4 sm:$0xff]  }
 0x3af   :  { %4122 = vmatpush1.bf16.msra.mxu0 %v8202_v6  ;;  %4153 = vmatprep.mubr.bf16.mxu0 %v3167_v58  ;;  %v8223_v58 = vld [vmem:[#allocation8 + $0x370] ss:$8 sps:$4 sm:$0xff]  }
 0x3b0   :  { %4123 = vmatprep.subr.bf16.mxu0 %v8207_v8  ;;  %v8350_v6 = vld [vmem:[#allocation11 + $0x50] sm:$0xff]   ;;  %v8352_v8 = vld [vmem:[#allocation11 + $0x58] sm:$0xff]  }
 0x3b1   :  { %7072 = vmatprep.subr.bf16.mxu1 %v8350_v6  ;;  %v8325_v6 = vld [vmem:[#allocation8 + $0x590] ss:$8 sps:$4 sm:$0xff]  }
 0x3b3   :  { %4124 = vmatpush1.bf16.msra.mxu0 %v8205_v7  ;;  %v8354_v7 = vld [vmem:[#allocation11 + $0x60] sm:$0xff]  }
 0x3b4   :  { %4125 = vmatprep.subr.bf16.mxu0 %v8210_v11  ;;  %v8262_v11 = vld [vmem:[#allocation8 + $0x440] ss:$8 sps:$4 sm:$0xff]  }
 0x3b7   :  { %4126 = vmatpush1.bf16.msra.mxu0 %v8208_v12  ;;  %v8267_v12 = vld [vmem:[#allocation8 + $0x454] ss:$8 sps:$4 sm:$0xff]  }
 0x3b8   :  { %4127 = vmatprep.subr.bf16.mxu0 %v8213_v26  ;;  %v8355_v26 = vld [vmem:[#allocation11 + $0x20] sm:$0xff]  }
 0x3bb   :  { %4128 = vmatpush1.bf16.msra.mxu0 %v8211_v16  ;;  %v8265_v16 = vld [vmem:[#allocation8 + $0x450] ss:$8 sps:$4 sm:$0xff]  }
 0x3bc   :  { %4129 = vmatprep.subr.bf16.mxu0 %v8216_v17  ;;  %v8270_v17 = vld [vmem:[#allocation8 + $0x464] ss:$8 sps:$4 sm:$0xff]  }
 0x3bf   :  { %4130 = vmatpush1.bf16.msra.mxu0 %v8214_v18  ;;  %v8268_v18 = vld [vmem:[#allocation8 + $0x460] ss:$8 sps:$4 sm:$0xff]  }
 0x3c0   :  { %4131 = vmatprep.subr.bf16.mxu0 %v8219_v60  ;;  %v8273_v60 = vld [vmem:[#allocation8 + $0x474] ss:$8 sps:$4 sm:$0xff]  }
 0x3c3   :  { %4132 = vmatpush1.bf16.msra.mxu0 %v8217_v13  ;;  %v8271_v13 = vld [vmem:[#allocation8 + $0x470] ss:$8 sps:$4 sm:$0xff]  }
 0x3c4   :  { %4133 = vmatprep.subr.bf16.mxu0 %v8222_v4  ;;  %v8276_v4 = vld [vmem:[#allocation8 + $0x484] ss:$8 sps:$4 sm:$0xff]  }
 0x3c7   :  { %4134 = vmatpush1.bf16.msra.mxu0 %v8220_v20  ;;  %v8274_v20 = vld [vmem:[#allocation8 + $0x480] ss:$8 sps:$4 sm:$0xff]  }
 0x3c8   :  { %4135 = vmatprep.subr.bf16.mxu0 %v8225_v9  ;;  %v8279_v9 = vld [vmem:[#allocation8 + $0x494] ss:$8 sps:$4 sm:$0xff]  }
 0x3cb   :  { %4136 = vmatpush1.bf16.msra.mxu0 %v8223_v58  ;;  %v8277_v58 = vld [vmem:[#allocation8 + $0x490] ss:$8 sps:$4 sm:$0xff]  }
 0x3cc   :  { %4137 = vmatprep.subr.bf16.mxu0 %v8228_v10  ;;  %v8282_v10 = vld [vmem:[#allocation8 + $0x4a4] ss:$8 sps:$4 sm:$0xff]  }
 0x3cf   :  { %4138 = vmatpush1.bf16.msra.mxu0 %v8226_v35  ;;  %v8280_v35 = vld [vmem:[#allocation8 + $0x4a0] ss:$8 sps:$4 sm:$0xff]  }
 0x3d0   :  { %4139 = vmatprep.subr.bf16.mxu0 %v8231_v31  ;;  %v8285_v31 = vld [vmem:[#allocation8 + $0x4b4] ss:$8 sps:$4 sm:$0xff]  }
 0x3d3   :  { %4140 = vmatpush1.bf16.msra.mxu0 %v8229_v39  ;;  %v8283_v39 = vld [vmem:[#allocation8 + $0x4b0] ss:$8 sps:$4 sm:$0xff]  }
 0x3d4   :  { %4141 = vmatprep.subr.bf16.mxu0 %v8234_v3  ;;  %v8288_v3 = vld [vmem:[#allocation8 + $0x4c4] ss:$8 sps:$4 sm:$0xff]  }
 0x3d7   :  { %4142 = vmatpush1.bf16.msra.mxu0 %v8232_v15  ;;  %v8286_v15 = vld [vmem:[#allocation8 + $0x4c0] ss:$8 sps:$4 sm:$0xff]  }
 0x3d8   :  { %4143 = vmatprep.subr.bf16.mxu0 %v8237_v51  ;;  %v8291_v51 = vld [vmem:[#allocation8 + $0x4d4] ss:$8 sps:$4 sm:$0xff]  }
 0x3db   :  { %4144 = vmatpush1.bf16.msra.mxu0 %v8235_v21  ;;  %v8289_v21 = vld [vmem:[#allocation8 + $0x4d0] ss:$8 sps:$4 sm:$0xff]  }
 0x3dc   :  { %4145 = vmatprep.subr.bf16.mxu0 %v8240_v23  ;;  %v8294_v23 = vld [vmem:[#allocation8 + $0x4e4] ss:$8 sps:$4 sm:$0xff]  }
 0x3df   :  { %4146 = vmatpush1.bf16.msra.mxu0 %v8238_v24  ;;  %v8292_v24 = vld [vmem:[#allocation8 + $0x4e0] ss:$8 sps:$4 sm:$0xff]  }
 0x3e0   :  { %4147 = vmatprep.subr.bf16.mxu0 %v8243_v25  ;;  %v8297_v25 = vld [vmem:[#allocation8 + $0x4f4] ss:$8 sps:$4 sm:$0xff]  }
 0x3e3   :  { %4148 = vmatpush1.bf16.msra.mxu0 %v8241_v55  ;;  %v8295_v55 = vld [vmem:[#allocation8 + $0x4f0] ss:$8 sps:$4 sm:$0xff]  }
 0x3e4   :  { %4149 = vmatprep.subr.bf16.mxu0 %v8246_v56  ;;  %v8300_v56 = vld [vmem:[#allocation8 + $0x504] ss:$8 sps:$4 sm:$0xff]  }
 0x3e7   :  { %4150 = vmatpush1.bf16.msra.mxu0 %v8244_v29  ;;  %v8298_v29 = vld [vmem:[#allocation8 + $0x500] ss:$8 sps:$4 sm:$0xff]  }
 0x3e8   :  { %4151 = vmatprep.subr.bf16.mxu0 %v8249_v49  ;;  %v8303_v49 = vld [vmem:[#allocation8 + $0x514] ss:$8 sps:$4 sm:$0xff]  }
 0x3eb   :  { %4152 = vmatpush1.bf16.msra.mxu0 %v8247_v40  ;;  %v8301_v40 = vld [vmem:[#allocation8 + $0x510] ss:$8 sps:$4 sm:$0xff]  }
 0x3ec   :  { %4548 = vmatprep.subr.bf16.mxu0 %v8252_v42  ;;  %v8306_v42 = vld [vmem:[#allocation8 + $0x524] ss:$8 sps:$4 sm:$0xff]  }
 0x3ee   :  { %4154 = vmatmul.mubr.bf16.vlgmr.msra.gmra.mrb[4].mxu0 %v3166_v22  ;;  %v8351_v22 = vld [vmem:[#allocation11 + $0x10] sm:$0xff]  }
 0x3ef   :  { %4549 = vmatpush1.bf16.msra.mxu0 %v8250_v44  ;;  %6917 = vmatprep.mubr.msk.bf16.mxu0 %vm9090_vm7, %v6916_v63  ;;  %v8353_v63 = vld [vmem:[#allocation11 + $0x18] sm:$0xff]  }
 0x3f0   :  { %4550 = vmatprep.subr.bf16.mxu0 %v8255_v45  ;;  %7073 = vmatpush3.bf16.msra.mxu1 %v8351_v22  ;;  %v8304_v44 = vld [vmem:[#allocation8 + $0x520] ss:$8 sps:$4 sm:$0xff]   ;;  %v8309_v45 = vld [vmem:[#allocation8 + $0x534] ss:$8 sps:$4 sm:$0xff]  }
 0x3f1   :  { %7074 = vmatprep.subr.bf16.mxu1 %v8352_v8  ;;  %v8333_v22 = vld [vmem:[#allocation8 + $0x5b4] ss:$8 sps:$4 sm:$0xff]   ;;  %v8331_v8 = vld [vmem:[#allocation8 + $0x5b0] ss:$8 sps:$4 sm:$0xff]  }
 0x3f3   :  { %4551 = vmatpush1.bf16.msra.mxu0 %v8253_v50  ;;  %v8324_v50 = vld [vmem:[#allocation8 + $0x584] ss:$8 sps:$4 sm:$0xff]  }
 0x3f4   :  { %4552 = vmatprep.subr.bf16.mxu0 %v8258_v52  ;;  %7075 = vmatpush3.bf16.msra.mxu1 %v8353_v63  ;;  %v8322_v52 = vld [vmem:[#allocation8 + $0x580] ss:$8 sps:$4 sm:$0xff]   ;;  %v8339_v63 = vld [vmem:[#allocation8 + $0x5d4] ss:$8 sps:$4 sm:$0xff]  }
 0x3f5   :  { %7076 = vmatprep.subr.bf16.mxu1 %v8354_v7  ;;  %v8337_v7 = vld [vmem:[#allocation8 + $0x5d0] ss:$8 sps:$4 sm:$0xff]  }
 0x3f7   :  { %4553 = vmatpush1.bf16.msra.mxu0 %v8256_v61  ;;  %v8330_v61 = vld [vmem:[#allocation8 + $0x5a4] ss:$8 sps:$4 sm:$0xff]  }
 0x3f8   :  { %4554 = vmatprep.subr.bf16.mxu0 %v8261_v14  ;;  %7077 = vmatpush3.bf16.msra.mxu1 %v8355_v26  ;;  %v8328_v14 = vld [vmem:[#allocation8 + $0x5a0] ss:$8 sps:$4 sm:$0xff]   ;;  %v8345_v26 = vld [vmem:[#allocation8 + $0x5f4] ss:$8 sps:$4 sm:$0xff]  }
 0x3fb   :  { %4555 = vmatpush1.bf16.msra.mxu0 %v8259_v59  ;;  %v8336_v59 = vld [vmem:[#allocation8 + $0x5c4] ss:$8 sps:$4 sm:$0xff]  }
 0x3fc   :  { %4556 = vmatprep.subr.bf16.mxu0 %v8264_v62  ;;  %v8334_v62 = vld [vmem:[#allocation8 + $0x5c0] ss:$8 sps:$4 sm:$0xff]  }
 0x3ff   :  { %4557 = vmatpush1.bf16.msra.mxu0 %v8262_v11  ;;  %v8342_v11 = vld [vmem:[#allocation8 + $0x5e4] ss:$8 sps:$4 sm:$0xff]  }
 0x400   :  { %4558 = vmatprep.subr.bf16.mxu0 %v8267_v12  ;;  %v8340_v12 = vld [vmem:[#allocation8 + $0x5e0] ss:$8 sps:$4 sm:$0xff]  }
 0x403   :  { %4559 = vmatpush1.bf16.msra.mxu0 %v8265_v16  ;;  %v8343_v16 = vld [vmem:[#allocation8 + $0x5f0] ss:$8 sps:$4 sm:$0xff]  }
 0x404   :  { %4560 = vmatprep.subr.bf16.mxu0 %v8270_v17  ;;  %v8356_v17 = vld [vmem:[#allocation11 + $0x68] sm:$0xff]  }
 0x405   :  { %7078 = vmatprep.subr.bf16.mxu1 %v8356_v17  ;;  %v8376_v17 = vld [vmem:[#allocation11 + $0xf8] sm:$0xff]  }
 0x407   :  { %4561 = vmatpush1.bf16.msra.mxu0 %v8268_v18  ;;  %v8357_v18 = vld [vmem:[#allocation11 + $0x28] sm:$0xff]  }
 0x408   :  { %4562 = vmatprep.subr.bf16.mxu0 %v8273_v60  ;;  %7079 = vmatpush3.bf16.msra.mxu1 %v8357_v18  ;;  %v8358_v60 = vld [vmem:[#allocation11 + $0x70] sm:$0xff]   ;;  %v8377_v18 = vld [vmem:[#allocation11 + $0xb8] sm:$0xff]  }
 0x409   :  { %7080 = vmatprep.subr.bf16.mxu1 %v8358_v60  ;;  %v8378_v60 = vld [vmem:[#allocation11 + $0x140] sm:$0xff]  }
 0x40b   :  { %4563 = vmatpush1.bf16.msra.mxu0 %v8271_v13  ;;  %v8359_v13 = vld [vmem:[#allocation11 + $0x30] sm:$0xff]  }
 0x40c   :  { %4564 = vmatprep.subr.bf16.mxu0 %v8276_v4  ;;  %7081 = vmatpush3.bf16.msra.mxu1 %v8359_v13  ;;  %v8360_v4 = vld [vmem:[#allocation11 + $0x78] sm:$0xff]   ;;  %v8379_v13 = vld [vmem:[#allocation11 + $0x100] sm:$0xff]  }
 0x40d   :  { %7082 = vmatprep.subr.bf16.mxu1 %v8360_v4  ;;  %v8380_v4 = vld [vmem:[#allocation11 + $0x148] sm:$0xff]  }
 0x40f   :  { %4565 = vmatpush1.bf16.msra.mxu0 %v8274_v20  ;;  %v8361_v20 = vld [vmem:[#allocation11 + $0x38] sm:$0xff]  }
 0x410   :  { %4566 = vmatprep.subr.bf16.mxu0 %v8279_v9  ;;  %7083 = vmatpush3.bf16.msra.mxu1 %v8361_v20  ;;  %v8362_v9 = vld [vmem:[#allocation11 + $0xc0] sm:$0xff]   ;;  %v8381_v20 = vld [vmem:[#allocation11 + $0x108] sm:$0xff]  }
 0x411   :  { %7090 = vmatprep.subr.bf16.mxu1 %v8362_v9  ;;  %v8382_v9 = vld [vmem:[#allocation11 + $0x150] sm:$0xff]  }
 0x413   :  { %4567 = vmatpush1.bf16.msra.mxu0 %v8277_v58  ;;  %v4638_v58 = vld [vmem:[#allocation10] sm:$0x3] }
 0x414   :  { %4568 = vmatprep.subr.bf16.mxu0 %v8282_v10  ;;  %v4643_v33 = vrot.slane %v4638_v58, %v3130_v32  ;;  %v4647_v36 = vrot.slane %v4638_v58, %v3134_v37  ;;  %v8383_v58 = vld [vmem:[#allocation11 + $0x110] sm:$0xff]  }
 0x417   :  { %4569 = vmatpush1.bf16.msra.mxu0 %v8280_v35 }
 0x418   :  { %4570 = vmatprep.subr.bf16.mxu0 %v8285_v31 }
 0x41b   :  { %4571 = vmatpush1.bf16.msra.mxu0 %v8283_v39 }
 0x41c   :  { %4572 = vmatprep.subr.bf16.mxu0 %v8288_v3 }
 0x41f   :  { %4573 = vmatpush1.bf16.msra.mxu0 %v8286_v15 }
 0x420   :  { %4574 = vmatprep.subr.bf16.mxu0 %v8291_v51 }
 0x423   :  { %4575 = vmatpush1.bf16.msra.mxu0 %v8289_v21 }
 0x424   :  { %4576 = vmatprep.subr.bf16.mxu0 %v8294_v23 }
 0x427   :  { %4577 = vmatpush1.bf16.msra.mxu0 %v8292_v24 }
 0x428   :  { %4578 = vmatprep.subr.bf16.mxu0 %v8297_v25 }
 0x42b   :  { %4579 = vmatpush1.bf16.msra.mxu0 %v8295_v55 }
 0x42c   :  { %4591 = vmatprep.subr.bf16.mxu0 %v8300_v56 }
 0x42e   :  { %6920 = vmatmul.mubr.msk.bf16.vlgmr.msra.gmra.mrb[4].mxu0 %vm9090_vm7, %v6919_v34  ;;  %v8315_v34 = vld [vmem:[#allocation8 + $0x554] ss:$8 sps:$4 sm:$0xff]  }
 0x42f   :  { %4592 = vmatpush1.bf16.msra.mxu0 %v8298_v29  ;;  %6923 = vmatprep.mubr.msk.bf16.mxu0 %vm9090_vm7, %v6922_v5  ;;  %v8316_v5 = vld [vmem:[#allocation8 + $0x560] ss:$8 sps:$4 sm:$0xff]  }
 0x430   :  { %4593 = vmatprep.subr.bf16.mxu0 %v8303_v49 }
 0x433   :  { %4594 = vmatpush1.bf16.msra.mxu0 %v8301_v40 }
 0x434   :  { %4595 = vmatprep.subr.bf16.mxu0 %v8306_v42 }
 0x437   :  { %4596 = vmatpush1.bf16.msra.mxu0 %v8304_v44 }
 0x438   :  { %4597 = vmatprep.subr.bf16.mxu0 %v8309_v45 }
 0x43b   :  { %4598 = vmatpush1.bf16.msra.mxu0 %v8307_v19 }
 0x43c   :  { %4599 = vmatprep.subr.bf16.mxu0 %v8312_v30 }
 0x43f   :  { %4600 = vmatpush1.bf16.msra.mxu0 %v8310_v43 }
 0x440   :  { %4601 = vmatprep.subr.bf16.mxu0 %v8315_v34 }
 0x443   :  { %4602 = vmatpush1.bf16.msra.mxu0 %v8313_v1 }
 0x444   :  { %4603 = vmatprep.subr.bf16.mxu0 %v8318_v2 }
 0x447   :  { %4604 = vmatpush1.bf16.msra.mxu0 %v8316_v5 }
 0x448   :  { %4605 = vmatprep.subr.bf16.mxu0 %v8321_v46 }
 0x44b   :  { %4606 = vmatpush1.bf16.msra.mxu0 %v8319_v48 }
 0x44c   :  { %4607 = vmatprep.subr.bf16.mxu0 %v8324_v50  ;;  %v8363_v50 = vld [vmem:[#allocation11 + $0x80] sm:$0xff]  }
 0x44f   :  { %4608 = vmatpush1.bf16.msra.mxu0 %v8322_v52 }
 0x450   :  { %4609 = vmatprep.subr.bf16.mxu0 %v8327_v54 }
 0x453   :  { %4610 = vmatpush1.bf16.msra.mxu0 %v8325_v6  ;;  %v8364_v6 = vld [vmem:[#allocation11 + $0xc8] sm:$0xff]  }
 0x454   :  { %4611 = vmatprep.subr.bf16.mxu0 %v8330_v61 }
 0x457   :  { %4612 = vmatpush1.bf16.msra.mxu0 %v8328_v14  ;;  %v8365_v14 = vld [vmem:[#allocation11 + $0x88] sm:$0xff]  }
 0x458   :  { %4613 = vmatprep.subr.bf16.mxu0 %v8333_v22  ;;  %v8366_v22 = vld [vmem:[#allocation11 + $0xd0] sm:$0xff]  }
 0x45b   :  { %4614 = vmatpush1.bf16.msra.mxu0 %v8331_v8  ;;  %v8367_v8 = vld [vmem:[#allocation11 + $0x90] sm:$0xff]  }
 0x45c   :  { %4615 = vmatprep.subr.bf16.mxu0 %v8336_v59  ;;  %v8368_v59 = vld [vmem:[#allocation11 + $0xd8] sm:$0xff]  }
 0x45f   :  { %4616 = vmatpush1.bf16.msra.mxu0 %v8334_v62  ;;  %v8369_v62 = vld [vmem:[#allocation11 + $0x98] sm:$0xff]  }
 0x460   :  { %4617 = vmatprep.subr.bf16.mxu0 %v8339_v63  ;;  %v8370_v63 = vld [vmem:[#allocation11 + $0xe0] sm:$0xff]  }
 0x463   :  { %4618 = vmatpush1.bf16.msra.mxu0 %v8337_v7  ;;  %v8371_v7 = vld [vmem:[#allocation11 + $0xa0] sm:$0xff]  }
 0x464   :  { %4619 = vmatprep.subr.bf16.mxu0 %v8342_v11  ;;  %v8372_v11 = vld [vmem:[#allocation11 + $0xe8] sm:$0xff]  }
 0x467   :  { %4620 = vmatpush1.bf16.msra.mxu0 %v8340_v12  ;;  %v8373_v12 = vld [vmem:[#allocation11 + $0xa8] sm:$0xff]  }
 0x468   :  { %4621 = vmatprep.subr.bf16.mxu0 %v8345_v26  ;;  %v8374_v26 = vld [vmem:[#allocation11 + $0xf0] sm:$0xff]  }
 0x46b   :  { %4622 = vmatpush1.bf16.msra.mxu0 %v8343_v16  ;;  %v8375_v16 = vld [vmem:[#allocation11 + $0xb0] sm:$0xff]  }
 0x46e   :  { %6926 = vmatmul.mubr.msk.bf16.vlgmr.msra.gmra.mrb[4].mxu0 %vm9090_vm7, %v6925_v41 }
 0x541   :  { %v4625_v41 = vpop.f32.mrb[4].mxu0 }
 0x542   :  { %v4650_v10 = vadd.f32 %v4643_v33, %v4625_v41  ;;  %v4627_v35 = vpop.f32.mrb[5].mxu0  ;;  %v8386_v41 = vld [vmem:[#allocation11 + $0x160] sm:$0xff]  }
 0x543   :  { %v4651_v31 = vadd.f32 %v4647_v36, %v4627_v35  ;;  %v4629_v39 = vpop.f32.mrb[6].mxu0  ;;  %v8388_v35 = vld [vmem:[#allocation11 + $0x168] sm:$0xff]  }
 0x544   :  { %v9295_v3 = vmax.f32 %v4650_v10, 0.0  ;;  %v4652_v15 = vadd.f32 %v4643_v33, %v4629_v39  ;;  %v4631_v51 = vpop.f32.mrb[7].mxu0  ;;  %v8384_v33 = vld [vmem:[#allocation11 + $0x158] sm:$0xff]   ;;  %v8387_v10 = vld [vmem:[#allocation11 + $0x120] sm:$0xff]   ;;  %v8390_v39 = vld [vmem:[#allocation11 + $0x170] sm:$0xff]  }
 0x545   :  { %v4655_v21 = vmax.f32 %v4651_v31, 0.0  ;;  %v4653_v23 = vadd.f32 %v4647_v36, %v4631_v51  ;;  %v8385_v36 = vld [vmem:[#allocation11 + $0x118] sm:$0xff]   ;;  %v8389_v31 = vld [vmem:[#allocation11 + $0x128] sm:$0xff]  }
 0x546   :  { %v4656_v24 = vmax.f32 %v4652_v15, 0.0  ;;  %v4660_v25 = vrot.slane %v9295_v3, 7  ;;  %v4674_v55 = vrot.slane %v9295_v3, 1  ;;  %v8392_v15 = vld [vmem:[#allocation11 + $0x178] sm:$0xff]  }
 0x547   :  { %v4657_v32 = vmax.f32 %v4653_v23, 0.0  ;;  %v4661_v56 = vrot.slane %v4655_v21, 7  ;;  %v4675_v40 = vrot.slane %v4655_v21, 1  ;;  %v8393_v51 = vld [vmem:[#allocation11 + $0x138] sm:$0xff]   ;;  %v8759_v23 = vmov 0.0  }
 0x548   :  { %v4658_v37 = vpack.c.bf16 %v4656_v24, %v9295_v3  ;;  %v4662_v29 = vrot.slane %v4656_v24, 7  ;;  %v4676_v49 = vrot.slane %v4656_v24, 1  ;;  %v8391_v3 = vld [vmem:[#allocation11 + $0x130] sm:$0xff]  }
 0x549   :  { %v4663_v42 = vrot.slane %v4657_v32, 7  ;;  %v4677_v44 = vrot.slane %v4657_v32, 1  ;;  %v4659_v45 = vpack.c.bf16 %v4657_v32, %v4655_v21  ;;  %v8394_v21 = vld [vmem:[#allocation14] sm:$0xff]   ;;  %v8395_v24 = vld [vmem:[#allocation14 + $0x8] sm:$0xff]  }
 0x54a   :  { %v4664_v19 = vsel %vm240_vm0, %v4660_v25, %v4662_v29  ;;  %v4666_v30 = vsel %vm240_vm0, %v4662_v29, %v4660_v25  ;;  %v9306_v43 = vsel %vm273_vm4, %v4674_v55, %v4676_v49  ;;  %v9310_v34 = vsel %vm273_vm4, %v4676_v49, %v4674_v55  ;;  %v8396_v25 = vld [vmem:[#allocation14 + $0x10] sm:$0xff]   ;;  %v8397_v55 = vld [vmem:[#allocation14 + $0x18] sm:$0xff]   ;;  %v8398_v32 = vld [vmem:[#allocation14 + $0x20] sm:$0xff]  }
 0x54b   :  { %v6947_v1 = vpack.c.bf16 %v4664_v19, %v4666_v30  ;;  %v6985_v2 = vpack.c.bf16 %v9310_v34, %v9306_v43  ;;  %v4665_v5 = vsel %vm240_vm0, %v4661_v56, %v4663_v42  ;;  %v4667_v46 = vsel %vm240_vm0, %v4663_v42, %v4661_v56  ;;  %v8399_v56 = vld [vmem:[#allocation14 + $0x28] sm:$0xff]   ;;  %v8401_v29 = vld [vmem:[#allocation14 + $0x38] sm:$0xff]  }
 0x54c   :  { %v6944_v48 = vpack.c.bf16 %v4665_v5, %v4667_v46  ;;  %v4679_v52 = vsel %vm273_vm4, %v4675_v40, %v4677_v44  ;;  %v4681_v54 = vsel %vm273_vm4, %v4677_v44, %v4675_v40 }
 0x54d   :  { %v6982_v61 = vpack.c.bf16 %v4681_v54, %v4679_v52 }
 0x54e   :  { %6945 = vmatprep.mubr.msk.bf16.mxu1 %vm9006_vm3, %v6944_v48 }
 0x54f   :  { %6948 = vmatmul.mubr.msk.bf16.vlgmr.msra.gmra.mrb[4].mxu1 %vm9006_vm3, %v6947_v1 }
 0x550   :  { %7091 = vmatpush3.bf16.msra.mxu1 %v8363_v50  ;;  %5017 = vmatprep.mubr.bf16.mxu1 %v4659_v45 }
 0x551   :  { %7092 = vmatprep.subr.bf16.mxu1 %v8364_v6 }
 0x554   :  { %7093 = vmatpush3.bf16.msra.mxu1 %v8365_v14 }
 0x555   :  { %7094 = vmatprep.subr.bf16.mxu1 %v8366_v22 }
 0x558   :  { %7095 = vmatpush3.bf16.msra.mxu1 %v8367_v8 }
 0x559   :  { %7096 = vmatprep.subr.bf16.mxu1 %v8368_v59 }
 0x55c   :  { %7097 = vmatpush3.bf16.msra.mxu1 %v8369_v62 }
 0x55d   :  { %7098 = vmatprep.subr.bf16.mxu1 %v8370_v63 }
 0x560   :  { %7099 = vmatpush3.bf16.msra.mxu1 %v8371_v7 }
 0x561   :  { %7100 = vmatprep.subr.bf16.mxu1 %v8372_v11 }
 0x564   :  { %7101 = vmatpush3.bf16.msra.mxu1 %v8373_v12 }
 0x565   :  { %7102 = vmatprep.subr.bf16.mxu1 %v8374_v26 }
 0x568   :  { %7103 = vmatpush3.bf16.msra.mxu1 %v8375_v16 }
 0x569   :  { %7104 = vmatprep.subr.bf16.mxu1 %v8376_v17 }
 0x56c   :  { %7105 = vmatpush3.bf16.msra.mxu1 %v8377_v18 }
 0x56d   :  { %7112 = vmatprep.subr.bf16.mxu1 %v8378_v60 }
 0x56f   :  { %5018 = vmatmul.mubr.bf16.vlgmr.msra.gmra.mrb[8].mxu1 %v4658_v37  ;;  %v8400_v37 = vld [vmem:[#allocation14 + $0x30] sm:$0xff]  }
 0x570   :  { %7113 = vmatpush3.bf16.msra.mxu1 %v8379_v13  ;;  %6983 = vmatprep.mubr.msk.bf16.mxu1 %vm9090_vm7, %v6982_v61  ;;  %v6987_v61 = vld [vmem:[#allocation13] ss:$0 sm:$0xff] }
 0x571   :  { %7114 = vmatprep.subr.bf16.mxu1 %v8380_v4  ;;  %v8402_v4 = vld [vmem:[#allocation14 + $0x40] sm:$0xff]  }
 0x574   :  { %7115 = vmatpush3.bf16.msra.mxu1 %v8381_v20 }
 0x575   :  { %7116 = vmatprep.subr.bf16.mxu1 %v8382_v9 }
 0x578   :  { %7117 = vmatpush3.bf16.msra.mxu1 %v8383_v58 }
 0x579   :  { %7118 = vmatprep.subr.bf16.mxu1 %v8384_v33 }
 0x57c   :  { %7119 = vmatpush3.bf16.msra.mxu1 %v8385_v36  ;;  %v8403_v36 = vld [vmem:[#allocation14 + $0x48] sm:$0xff]  }
 0x57d   :  { %7120 = vmatprep.subr.bf16.mxu1 %v8386_v41  ;;  %v8404_v41 = vld [vmem:[#allocation14 + $0x50] sm:$0xff]  }
 0x580   :  { %7121 = vmatpush3.bf16.msra.mxu1 %v8387_v10  ;;  %v8405_v10 = vld [vmem:[#allocation14 + $0x58] sm:$0xff]  }
 0x581   :  { %7122 = vmatprep.subr.bf16.mxu1 %v8388_v35  ;;  %v8406_v35 = vld [vmem:[#allocation14 + $0x60] sm:$0xff]  }
 0x584   :  { %7123 = vmatpush3.bf16.msra.mxu1 %v8389_v31  ;;  %v8407_v31 = vld [vmem:[#allocation14 + $0x68] sm:$0xff]  }
 0x585   :  { %7124 = vmatprep.subr.bf16.mxu1 %v8390_v39  ;;  %v8408_v39 = vld [vmem:[#allocation14 + $0x70] sm:$0xff]  }
 0x588   :  { %7125 = vmatpush3.bf16.msra.mxu1 %v8391_v3  ;;  %v8409_v3 = vld [vmem:[#allocation14 + $0x78] sm:$0xff]  }
 0x589   :  { %7126 = vmatprep.subr.bf16.mxu1 %v8392_v15  ;;  %v8410_v15 = vld [vmem:[#allocation14 + $0x80] sm:$0xff]  }
 0x58c   :  { %7127 = vmatpush3.bf16.msra.mxu1 %v8393_v51  ;;  %v8411_v51 = vld [vmem:[#allocation14 + $0x88] sm:$0xff]  }
 0x58d   :  { %7212 = vmatprep.subr.bf16.mxu1 %v8759_v23 }
 0x58f   :  { %6986 = vmatmul.mubr.msk.bf16.vlgmr.msra.gmra.mrb[12].mxu1 %vm9090_vm7, %v6985_v2 }
 0x590   :  { %7213 = vmatpush3.bf16.msra.mxu1 %v8394_v21  ;;  %7228 = vmatprep.mubr.msk.bf16.mxu1 %vm8760_vm8, %v8759_v23  ;;  %v8412_v21 = vld [vmem:[#allocation14 + $0x90] sm:$0xff]  }
 0x591   :  { %7214 = vmatprep.subr.bf16.mxu1 %v8759_v23 }
 0x594   :  { %7215 = vmatpush3.bf16.msra.mxu1 %v8395_v24  ;;  %v8413_v24 = vld [vmem:[#allocation14 + $0x98] sm:$0xff]  }
 0x595   :  { %7216 = vmatprep.subr.bf16.mxu1 %v8759_v23 }
 0x598   :  { %7217 = vmatpush3.bf16.msra.mxu1 %v8396_v25  ;;  %v8414_v25 = vld [vmem:[#allocation14 + $0xa0] sm:$0xff]  }
 0x599   :  { %7218 = vmatprep.subr.bf16.mxu1 %v8759_v23 }
 0x59c   :  { %7219 = vmatpush3.bf16.msra.mxu1 %v8397_v55  ;;  %v8415_v55 = vld [vmem:[#allocation14 + $0xa8] sm:$0xff]  }
 0x59d   :  { %7220 = vmatprep.subr.bf16.mxu1 %v8759_v23 }
 0x5a0   :  { %7221 = vmatpush3.bf16.msra.mxu1 %v8398_v32  ;;  %v8416_v32 = vld [vmem:[#allocation14 + $0xb0] sm:$0xff]  }
 0x5a1   :  { %7222 = vmatprep.subr.bf16.mxu1 %v8759_v23 }
 0x5a4   :  { %7223 = vmatpush3.bf16.msra.mxu1 %v8399_v56  ;;  %v8417_v56 = vld [vmem:[#allocation14 + $0xb8] sm:$0xff]  }
 0x5a5   :  { %7224 = vmatprep.subr.bf16.mxu1 %v8759_v23 }
 0x5a8   :  { %7225 = vmatpush3.bf16.msra.mxu1 %v8400_v37  ;;  %v8418_v37 = vld [vmem:[%s9615_s9] sm:$0xff]  }
 0x5a9   :  { %7226 = vmatprep.subr.bf16.mxu1 %v8759_v23 }
 0x5ac   :  { %7227 = vmatpush3.bf16.msra.mxu1 %v8401_v29  ;;  %v8419_v29 = vld [vmem:[%s9615_s9 + $0x8] sm:$0xff]  }
 0x5ad   :  { %7232 = vmatprep.subr.bf16.mxu1 %v8759_v23 }
 0x622   :  { %v7084_v49 = vpop.f32.mrb[4].mxu1 }
 0x623   :  { %v7085_v40 = vpop.f32.mrb[5].mxu1 }
 0x624   :  { %v7086_v42 = vadd.f32 %v7085_v40, %v7084_v49  ;;  %v7087_v44 = vpop.f32.mrb[6].mxu1  ;;  %v8420_v49 = vld [vmem:[%s9615_s9 + $0x10] sm:$0xff]   ;;  %v8421_v40 = vld [vmem:[%s9615_s9 + $0x18] sm:$0xff]  }
 0x625   :  { %v7088_v45 = vpop.f32.mrb[7].mxu1 }
 0x626   :  { %v7089_v19 = vadd.f32 %v7088_v45, %v7087_v44  ;;  %v8423_v44 = vld [vmem:[%s9615_s9 + $0x28] sm:$0xff]   ;;  %v8424_v45 = vld [vmem:[%s9615_s9 + $0x30] sm:$0xff]  }
 0x642   :  { %v7106_v30 = vpop.f32.mrb[8].mxu1 }
 0x643   :  { %v7107_v43 = vpop.f32.mrb[9].mxu1 }
 0x644   :  { %v7108_v34 = vadd.f32 %v7107_v43, %v7106_v30  ;;  %v7109_v1 = vpop.f32.mrb[10].mxu1 }
 0x645   :  { %v7110_v2 = vpop.f32.mrb[11].mxu1 }
 0x646   :  { %v5020_v5 = vadd.f32 %v7108_v34, %v7086_v42  ;;  %v7111_v46 = vadd.f32 %v7110_v2, %v7109_v1  ;;  %v8422_v42 = vld [vmem:[%s9615_s9 + $0x20] sm:$0xff]  }
 0x648   :  { %v5023_v48 = vadd.f32 %v7111_v46, %v7089_v19  ;;  %v8425_v19 = vld [vmem:[%s9615_s9 + $0x38] sm:$0xff]  }
 0x662   :  { %v7128_v50 = vpop.f32.mrb[12].mxu1 }
 0x663   :  { %v7129_v52 = vpop.f32.mrb[13].mxu1 }
 0x664   :  { %v7130_v54 = vadd.f32 %v7129_v52, %v7128_v50  ;;  %v7131_v6 = vpop.f32.mrb[14].mxu1 }
 0x665   :  { %v7132_v14 = vpop.f32.mrb[15].mxu1 }
 0x666   :  { %v5195_v22 = vadd.f32 %v7130_v54, %v5020_v5  ;;  %v7133_v8 = vadd.f32 %v7132_v14, %v7131_v6  ;;  %v7018_v6 = vld [vmem:[#allocation16] ss:$0 sm:$0xff] }
 0x668   :  { %v5204_v59 = vadd.f32 %v6987_v61, %v5195_v22  ;;  %v5196_v62 = vadd.f32 %v7133_v8, %v5023_v48 }
 0x66a   :  { %v5206_v63 = vmax.f32 %v5204_v59, 0.0  ;;  %v5205_v7 = vadd.f32 %v6987_v61, %v5196_v62 }
 0x66c   :  { %v5207_v11 = vmax.f32 %v5205_v7, 0.0  ;;  %v5209_v12 = vrot.slane %v5206_v63, 7  ;;  %v5216_v26 = vrot.slane %v5206_v63, 1 }
 0x66e   :  { %v5210_v16 = vrot.slane %v5207_v11, 7  ;;  %v5217_v17 = vrot.slane %v5207_v11, 1  ;;  %v5208_v18 = vpack.c.bf16 %v5207_v11, %v5206_v63 }
 0x670   :  { %v5211_v60 = vsel %vm240_vm0, %v5209_v12, %v5210_v16  ;;  %v5212_v13 = vsel %vm240_vm0, %v5210_v16, %v5209_v12  ;;  %v5218_v20 = vsel %vm273_vm4, %v5216_v26, %v5217_v17  ;;  %v5219_v9 = vsel %vm273_vm4, %v5217_v17, %v5216_v26 }
 0x671   :  { %v6997_v58 = vpack.c.bf16 %v5211_v60, %v5212_v13  ;;  %v7016_v33 = vpack.c.bf16 %v5219_v9, %v5218_v20  ;;  %v8426_v9 = vld [vmem:[%s9615_s9 + $0x40] sm:$0xff]  }
 0x673   :  { %7229 = vmatmul.mubr.msk.bf16.vlgmr.msra.gmra.mrb[16].mxu1 %vm9006_vm3, %v6997_v58 }
 0x674   :  { %7233 = vmatpush3.bf16.msra.mxu1 %v8402_v4  ;;  %7248 = vmatprep.mubr.msk.bf16.mxu1 %vm8760_vm8, %v8759_v23 }
 0x675   :  { %7234 = vmatprep.subr.bf16.mxu1 %v8759_v23 }
 0x678   :  { %7235 = vmatpush3.bf16.msra.mxu1 %v8403_v36  ;;  %v8427_v36 = vld [vmem:[%s9615_s9 + $0x48] sm:$0xff]  }
 0x679   :  { %7236 = vmatprep.subr.bf16.mxu1 %v8759_v23 }
 0x67c   :  { %7237 = vmatpush3.bf16.msra.mxu1 %v8404_v41  ;;  %v8428_v41 = vld [vmem:[%s9615_s9 + $0x50] sm:$0xff]  }
 0x67d   :  { %7238 = vmatprep.subr.bf16.mxu1 %v8759_v23 }
 0x680   :  { %7239 = vmatpush3.bf16.msra.mxu1 %v8405_v10  ;;  %v8430_v10 = vld [vmem:[%s9615_s9 + $0x60] sm:$0xff]  }
 0x681   :  { %7240 = vmatprep.subr.bf16.mxu1 %v8759_v23 }
 0x684   :  { %7241 = vmatpush3.bf16.msra.mxu1 %v8406_v35  ;;  %v8431_v35 = vld [vmem:[%s9615_s9 + $0x68] sm:$0xff]  }
 0x685   :  { %7242 = vmatprep.subr.bf16.mxu1 %v8759_v23 }
 0x688   :  { %7243 = vmatpush3.bf16.msra.mxu1 %v8407_v31  ;;  %v8432_v31 = vld [vmem:[%s9615_s9 + $0x70] sm:$0xff]  }
 0x689   :  { %7244 = vmatprep.subr.bf16.mxu1 %v8759_v23 }
 0x68c   :  { %7245 = vmatpush3.bf16.msra.mxu1 %v8408_v39  ;;  %v8433_v39 = vld [vmem:[%s9615_s9 + $0x78] sm:$0xff]  }
 0x68d   :  { %7246 = vmatprep.subr.bf16.mxu1 %v8759_v23 }
 0x690   :  { %7247 = vmatpush3.bf16.msra.mxu1 %v8409_v3  ;;  %v8434_v3 = vld [vmem:[%s9615_s9 + $0x80] sm:$0xff]  }
 0x691   :  { %7252 = vmatprep.subr.bf16.mxu1 %v8759_v23 }
 0x693   :  { %7249 = vmatmul.mubr.bf16.vlgmr.msra.gmra.mrb[20].mxu1 %v5208_v18 }
 0x694   :  { %7253 = vmatpush3.bf16.msra.mxu1 %v8410_v15  ;;  %7268 = vmatprep.mubr.msk.bf16.mxu1 %vm8760_vm8, %v8759_v23  ;;  %v8435_v15 = vld [vmem:[%s9615_s9 + $0x88] sm:$0xff]  }
 0x695   :  { %7254 = vmatprep.subr.bf16.mxu1 %v8759_v23 }
 0x698   :  { %7255 = vmatpush3.bf16.msra.mxu1 %v8411_v51  ;;  %v8436_v51 = vld [vmem:[%s9615_s9 + $0x90] sm:$0xff]  }
 0x699   :  { %7256 = vmatprep.subr.bf16.mxu1 %v8759_v23 }
 0x69c   :  { %7257 = vmatpush3.bf16.msra.mxu1 %v8412_v21  ;;  %v8437_v21 = vld [vmem:[%s9615_s9 + $0x98] sm:$0xff]  }
 0x69d   :  { %7258 = vmatprep.subr.bf16.mxu1 %v8759_v23 }
 0x6a0   :  { %7259 = vmatpush3.bf16.msra.mxu1 %v8413_v24  ;;  %v8438_v24 = vld [vmem:[%s9615_s9 + $0xa0] sm:$0xff]  }
 0x6a1   :  { %7260 = vmatprep.subr.bf16.mxu1 %v8759_v23 }
 0x6a4   :  { %7261 = vmatpush3.bf16.msra.mxu1 %v8414_v25  ;;  %v8439_v25 = vld [vmem:[%s9615_s9 + $0xa8] sm:$0xff]  }
 0x6a5   :  { %7262 = vmatprep.subr.bf16.mxu1 %v8759_v23 }
 0x6a8   :  { %7263 = vmatpush3.bf16.msra.mxu1 %v8415_v55  ;;  %v8440_v55 = vld [vmem:[%s9615_s9 + $0xb0] sm:$0xff]  }
 0x6a9   :  { %7264 = vmatprep.subr.bf16.mxu1 %v8759_v23 }
 0x6ac   :  { %7265 = vmatpush3.bf16.msra.mxu1 %v8416_v32  ;;  %v8441_v32 = vld [vmem:[%s9615_s9 + $0xb8] sm:$0xff]  }
 0x6ad   :  { %7266 = vmatprep.subr.bf16.mxu1 %v8759_v23 }
 0x6b0   :  { %7267 = vmatpush3.bf16.msra.mxu1 %v8417_v56  ;;  %v8442_v56 = vld [vmem:[%s9617_s11] sm:$0xff]  }
 0x6b1   :  { %7272 = vmatprep.subr.bf16.mxu1 %v8759_v23 }
 0x6b3   :  { %7269 = vmatmul.mubr.msk.bf16.vlgmr.msra.gmra.mrb[24].mxu1 %vm9090_vm7, %v7016_v33 }
 0x6b4   :  { %7288 = vmatprep.mubr.msk.bf16.mxu1 %vm8760_vm8, %v8759_v23  ;;  %7273 = vmatpush3.bf16.msra.mxu1 %v8418_v37  ;;  %v8443_v37 = vld [vmem:[%s9617_s11 + $0x8] sm:$0xff]  }
 0x6b5   :  { %7274 = vmatprep.subr.bf16.mxu1 %v8759_v23 }
 0x6b8   :  { %7275 = vmatpush3.bf16.msra.mxu1 %v8419_v29  ;;  %v8445_v29 = vld [vmem:[%s9617_s11 + $0x18] sm:$0xff]  }
 0x6b9   :  { %7276 = vmatprep.subr.bf16.mxu1 %v8759_v23 }
 0x6bc   :  { %7277 = vmatpush3.bf16.msra.mxu1 %v8420_v49 }
 0x6bd   :  { %7278 = vmatprep.subr.bf16.mxu1 %v8759_v23 }
 0x6c0   :  { %7279 = vmatpush3.bf16.msra.mxu1 %v8421_v40 }
 0x6c1   :  { %7280 = vmatprep.subr.bf16.mxu1 %v8759_v23 }
 0x6c4   :  { %7281 = vmatpush3.bf16.msra.mxu1 %v8422_v42 }
 0x6c5   :  { %7282 = vmatprep.subr.bf16.mxu1 %v8759_v23 }
 0x6c8   :  { %7283 = vmatpush3.bf16.msra.mxu1 %v8423_v44 }
 0x6c9   :  { %7284 = vmatprep.subr.bf16.mxu1 %v8759_v23 }
 0x6cc   :  { %7285 = vmatpush3.bf16.msra.mxu1 %v8424_v45 }
 0x6cd   :  { %7286 = vmatprep.subr.bf16.mxu1 %v8759_v23 }
 0x6d0   :  { %7287 = vmatpush3.bf16.msra.mxu1 %v8425_v19 }
 0x6d1   :  { %7292 = vmatprep.subr.bf16.mxu1 %v8759_v23 }
 0x746   :  { %v5337_v30 = vpop.f32.mrb[16].mxu1 }
 0x747   :  { %v7230_v43 = vpop.f32.mrb[17].mxu1 }
 0x748   :  { %v5340_v34 = vpop.f32.mrb[18].mxu1 }
 0x749   :  { %v7231_v1 = vpop.f32.mrb[19].mxu1 }
 0x766   :  { %v5426_v2 = vpop.f32.mrb[20].mxu1 }
 0x767   :  { %v5427_v5 = vadd.f32 %v5426_v2, %v5337_v30  ;;  %v7250_v46 = vpop.f32.mrb[21].mxu1 }
 0x768   :  { %v5429_v48 = vpop.f32.mrb[22].mxu1 }
 0x769   :  { %v5430_v50 = vadd.f32 %v5429_v48, %v5340_v34  ;;  %v7251_v52 = vpop.f32.mrb[23].mxu1 }
 0x786   :  { %v5531_v54 = vpop.f32.mrb[24].mxu1 }
 0x787   :  { %v5538_v61 = vadd.f32 %v5531_v54, %v5427_v5  ;;  %v7270_v14 = vpop.f32.mrb[25].mxu1  ;;  %v7049_v5 = vld [vmem:[#allocation17] ss:$0 sm:$0xff] }
 0x788   :  { %v5534_v22 = vpop.f32.mrb[26].mxu1 }
 0x789   :  { %v5547_v8 = vadd.f32 %v7018_v6, %v5538_v61  ;;  %v5539_v59 = vadd.f32 %v5534_v22, %v5430_v50  ;;  %v7271_v62 = vpop.f32.mrb[27].mxu1 }
 0x78b   :  { %v5549_v63 = vmax.f32 %v5547_v8, 0.0  ;;  %v5548_v7 = vadd.f32 %v7018_v6, %v5539_v59 }
 0x78d   :  { %v5550_v11 = vmax.f32 %v5548_v7, 0.0  ;;  %v5552_v12 = vrot.slane %v5549_v63, 7  ;;  %v5559_v26 = vrot.slane %v5549_v63, 1 }
 0x78f   :  { %v5553_v16 = vrot.slane %v5550_v11, 7  ;;  %v5560_v17 = vrot.slane %v5550_v11, 1  ;;  %v5551_v18 = vpack.c.bf16 %v5550_v11, %v5549_v63 }
 0x791   :  { %v5554_v60 = vsel %vm240_vm0, %v5552_v12, %v5553_v16  ;;  %v5555_v13 = vsel %vm240_vm0, %v5553_v16, %v5552_v12  ;;  %v5561_v4 = vsel %vm273_vm4, %v5559_v26, %v5560_v17  ;;  %v5562_v20 = vsel %vm273_vm4, %v5560_v17, %v5559_v26 }
 0x792   :  { %v7028_v58 = vpack.c.bf16 %v5554_v60, %v5555_v13  ;;  %v7047_v33 = vpack.c.bf16 %v5562_v20, %v5561_v4  ;;  %v8446_v60 = vld [vmem:[%s9617_s11 + $0x20] sm:$0xff]  }
 0x794   :  { %7289 = vmatmul.mubr.msk.bf16.vlgmr.msra.gmra.mrb[28].mxu1 %vm9006_vm3, %v7028_v58  ;;  %v8452_v58 = vld [vmem:[%s9617_s11 + $0x50] sm:$0xff]  }
 0x795   :  { %7293 = vmatpush3.bf16.msra.mxu1 %v8426_v9  ;;  %7308 = vmatprep.mubr.msk.bf16.mxu1 %vm8760_vm8, %v8759_v23 }
 0x796   :  { %7294 = vmatprep.subr.bf16.mxu1 %v8759_v23 }
 0x799   :  { %7295 = vmatpush3.bf16.msra.mxu1 %v8427_v36  ;;  %v6167_v36 = vld [vmem:[%s9619_s13] sm:$0xff] }
 0x79a   :  { %7296 = vmatprep.subr.bf16.mxu1 %v8759_v23 }
 0x79d   :  { %7297 = vmatpush3.bf16.msra.mxu1 %v8428_v41  ;;  %v6168_v41 = vld [vmem:[%s9619_s13 + $0x8] sm:$0xff] }
 0x79e   :  { %7298 = vmatprep.subr.bf16.mxu1 %v8759_v23 }
 0x7a1   :  { %7299 = vmatpush3.bf16.msra.mxu1 %v8429_v0  ;;  %v7388_v0 = vpack.c.bf16 %v6168_v41, %v6167_v36 }
 0x7a2   :  { %7300 = vmatprep.subr.bf16.mxu1 %v8759_v23 }
 0x7a5   :  { %7301 = vmatpush3.bf16.msra.mxu1 %v8430_v10  ;;  %v8761_v10 = vmov 0.0|0.0  }
 0x7a6   :  { %7302 = vmatprep.subr.bf16.mxu1 %v8759_v23 }
 0x7a9   :  { %7303 = vmatpush3.bf16.msra.mxu1 %v8431_v35  ;;  %v6169_v35 = vld [vmem:[%s9619_s13 + $0x10] sm:$0xff] }
 0x7aa   :  { %7304 = vmatprep.subr.bf16.mxu1 %v8759_v23 }
 0x7ad   :  { %7305 = vmatpush3.bf16.msra.mxu1 %v8432_v31 }
 0x7ae   :  { %7306 = vmatprep.subr.bf16.mxu1 %v8759_v23 }
 0x7b1   :  { %7307 = vmatpush3.bf16.msra.mxu1 %v8433_v39  ;;  %v6171_v39 = vld [vmem:[%s9619_s13 + $0x20] sm:$0xff] }
 0x7b2   :  { %7312 = vmatprep.subr.bf16.mxu1 %v8759_v23 }
 0x7b4   :  { %7309 = vmatmul.mubr.bf16.vlgmr.msra.gmra.mrb[32].mxu1 %v5551_v18 }
 0x7b5   :  { %7313 = vmatpush3.bf16.msra.mxu1 %v8434_v3  ;;  %7328 = vmatprep.mubr.msk.bf16.mxu1 %vm8760_vm8, %v8759_v23  ;;  %v6172_v3 = vld [vmem:[%s9619_s13 + $0x28] sm:$0xff] }
 0x7b6   :  { %7314 = vmatprep.subr.bf16.mxu1 %v8759_v23 }
 0x7b9   :  { %7315 = vmatpush3.bf16.msra.mxu1 %v8435_v15  ;;  %v7394_v15 = vpack.c.bf16 %v6172_v3, %v6171_v39 }
 0x7ba   :  { %7316 = vmatprep.subr.bf16.mxu1 %v8759_v23 }
 0x7bd   :  { %7317 = vmatpush3.bf16.msra.mxu1 %v8436_v51  ;;  %v6173_v51 = vld [vmem:[%s9619_s13 + $0x30] sm:$0xff] }
 0x7be   :  { %7318 = vmatprep.subr.bf16.mxu1 %v8759_v23 }
 0x7c1   :  { %7319 = vmatpush3.bf16.msra.mxu1 %v8437_v21  ;;  %v6174_v21 = vld [vmem:[%s9619_s13 + $0x38] sm:$0xff] }
 0x7c2   :  { %7320 = vmatprep.subr.bf16.mxu1 %v8759_v23 }
 0x7c5   :  { %7321 = vmatpush3.bf16.msra.mxu1 %v8438_v24  ;;  %v7397_v24 = vpack.c.bf16 %v6174_v21, %v6173_v51 }
 0x7c6   :  { %7322 = vmatprep.subr.bf16.mxu1 %v8759_v23 }
 0x7c9   :  { %7323 = vmatpush3.bf16.msra.mxu1 %v8439_v25 }
 0x7ca   :  { %7324 = vmatprep.subr.bf16.mxu1 %v8759_v23 }
 0x7cd   :  { %7325 = vmatpush3.bf16.msra.mxu1 %v8440_v55 }
 0x7ce   :  { %7326 = vmatprep.subr.bf16.mxu1 %v8759_v23 }
 0x7d1   :  { %7327 = vmatpush3.bf16.msra.mxu1 %v8441_v32 }
 0x7d2   :  { %7332 = vmatprep.subr.bf16.mxu1 %v8759_v23 }
 0x7d4   :  { %7329 = vmatmul.mubr.msk.bf16.vlgmr.msra.gmra.mrb[36].mxu1 %vm9090_vm7, %v7047_v33  ;;  %v8453_v33 = vld [vmem:[%s9617_s11 + $0x58] sm:$0xff]  }
 0x7d5   :  { %7340 = vmatprep.mubr.msk.bf16.mxu1 %vm8760_vm8, %v8759_v23  ;;  %7333 = vmatpush3.bf16.msra.mxu1 %v8442_v56 }
 0x7d6   :  { %7334 = vmatprep.subr.bf16.mxu1 %v8759_v23 }
 0x7d9   :  { %7335 = vmatpush3.bf16.msra.mxu1 %v8443_v37 }
 0x7da   :  { %7336 = vmatprep.subr.bf16.mxu1 %v8759_v23 }
 0x7dd   :  { %7337 = vmatpush3.bf16.msra.mxu1 %v8444_v47 }
 0x7de   :  { %7338 = vmatprep.subr.bf16.mxu1 %v8759_v23 }
 0x7e1   :  { %7339 = vmatpush3.bf16.msra.mxu1 %v8445_v29 }
 0x7e2   :  { %7344 = vmatprep.subr.bf16.mxu1 %v8759_v23 }
 0x867   :  { %v5680_v49 = vpop.f32.mrb[28].mxu1 }
 0x868   :  { %v7290_v40 = vpop.f32.mrb[29].mxu1 }
 0x869   :  { %v5683_v42 = vpop.f32.mrb[30].mxu1 }
 0x86a   :  { %v7291_v44 = vpop.f32.mrb[31].mxu1 }
 0x887   :  { %v5769_v45 = vpop.f32.mrb[32].mxu1 }
 0x888   :  { %v5770_v19 = vadd.f32 %v5769_v45, %v5680_v49  ;;  %v7310_v30 = vpop.f32.mrb[33].mxu1  ;;  %v7065_v45 = vld [vmem:[#allocation19] ss:$0 sm:$0xff] }
 0x889   :  { %v5772_v43 = vpop.f32.mrb[34].mxu1 }
 0x88a   :  { %v5773_v34 = vadd.f32 %v5772_v43, %v5683_v42  ;;  %v7311_v1 = vpop.f32.mrb[35].mxu1 }
 0x8a7   :  { %v5874_v2 = vpop.f32.mrb[36].mxu1 }
 0x8a8   :  { %v5881_v46 = vadd.f32 %v5874_v2, %v5770_v19  ;;  %v7330_v48 = vpop.f32.mrb[37].mxu1 }
 0x8a9   :  { %v5877_v50 = vpop.f32.mrb[38].mxu1 }
 0x8aa   :  { %v5890_v52 = vadd.f32 %v7049_v5, %v5881_v46  ;;  %v5882_v54 = vadd.f32 %v5877_v50, %v5773_v34  ;;  %v7331_v6 = vpop.f32.mrb[39].mxu1 }
 0x8ac   :  { %v5892_v61 = vmax.f32 %v5890_v52, 0.0  ;;  %v5891_v14 = vadd.f32 %v7049_v5, %v5882_v54 }
 0x8ae   :  { %v5893_v22 = vmax.f32 %v5891_v14, 0.0  ;;  %v5895_v8 = vrot.slane %v5892_v61, 7  ;;  %v5902_v59 = vrot.slane %v5892_v61, 1 }
 0x8b0   :  { %v5894_v62 = vpack.c.bf16 %v5893_v22, %v5892_v61  ;;  %v5896_v63 = vrot.slane %v5893_v22, 7  ;;  %v5903_v7 = vrot.slane %v5893_v22, 1 }
 0x8b2   :  { %v5897_v11 = vsel %vm240_vm0, %v5895_v8, %v5896_v63  ;;  %v5898_v12 = vsel %vm240_vm0, %v5896_v63, %v5895_v8  ;;  %v5904_v26 = vsel %vm273_vm4, %v5902_v59, %v5903_v7  ;;  %v5905_v16 = vsel %vm273_vm4, %v5903_v7, %v5902_v59 }
 0x8b3   :  { %v5899_v17 = vsel %vm8987_vm1, %v5898_v12, 0.0  ;;  %v5900_v18 = vsel %vm8994_vm2, %v5897_v11, 0.0  ;;  %v5906_v13 = vsel %vm9076_vm5, %v5904_v26, 0.0  ;;  %v5907_v4 = vsel %vm9082_vm6, %v5905_v16, 0.0 }
 0x8b4   :  { %v5901_v20 = vpack.c.bf16 %v5900_v18, %v5899_v17  ;;  %v5908_v9 = vpack.c.bf16 %v5907_v4, %v5906_v13  ;;  %v7066_v18 = vld [vmem:[%s9620_s14] ss:$0 sm:$0xff] }
 0x8b6   :  { %7341 = vmatmul.mubr.msk.bf16.vlgmr.msra.gmra.mrb[40].mxu1 %vm5949_vm9, %v5901_v20 }
 0x8b7   :  { %7345 = vmatpush3.bf16.msra.mxu1 %v8446_v60  ;;  %7352 = vmatprep.mubr.msk.bf16.mxu1 %vm8760_vm8, %v8759_v23 }
 0x8b8   :  { %7346 = vmatprep.subr.bf16.mxu1 %v8759_v23 }
 0x8bb   :  { %7347 = vmatpush3.bf16.msra.mxu1 %v8447_v38 }
 0x8bc   :  { %7348 = vmatprep.subr.bf16.mxu1 %v8759_v23 }
 0x8bf   :  { %7349 = vmatpush3.bf16.msra.mxu1 %v8448_v53 }
 0x8c0   :  { %7350 = vmatprep.subr.bf16.mxu1 %v8759_v23 }
 0x8c3   :  { %7351 = vmatpush3.bf16.msra.mxu1 %v8449_v57 }
 0x8c4   :  { %7356 = vmatprep.subr.bf16.mxu1 %v8759_v23 }
 0x8c6   :  { %7353 = vmatmul.mubr.msk.bf16.vlgmr.msra.gmra.mrb[44].mxu1 %vm5949_vm9, %v5894_v62 }
 0x8c7   :  { %7357 = vmatpush3.bf16.msra.mxu1 %v8450_v27  ;;  %7364 = vmatprep.mubr.msk.bf16.mxu1 %vm8760_vm8, %v8759_v23 }
 0x8c8   :  { %7358 = vmatprep.subr.bf16.mxu1 %v8759_v23 }
 0x8cb   :  { %7359 = vmatpush3.bf16.msra.mxu1 %v8451_v28 }
 0x8cc   :  { %7360 = vmatprep.subr.bf16.mxu1 %v8759_v23 }
 0x8cf   :  { %7361 = vmatpush3.bf16.msra.mxu1 %v8452_v58 }
 0x8d0   :  { %7362 = vmatprep.subr.bf16.mxu1 %v8759_v23 }
 0x8d3   :  { %7363 = vmatpush3.bf16.msra.mxu1 %v8453_v33 }
 0x8d4   :  { %7387 = vmatprep.subr.bf16.mxu1 %v8761_v10 }
 0x8d6   :  { %7365 = vmatmul.mubr.msk.bf16.vlgmr.msra.gmra.mrb[48].mxu1 %vm5949_vm9, %v5908_v9 }
 0x8d7   :  { %7384 = vmatprep.mubr.msk.f32.mxu1 %vm8760_vm8, %v8759_v23  ;;  %7389 = vmatpush3.bf16.msra.mxu1 %v7388_v0  ;;  %v6170_v23 = vld [vmem:[%s9619_s13 + $0x18] sm:$0xff] }
 0x8d8   :  { %7390 = vmatprep.subr.bf16.mxu1 %v8761_v10  ;;  %v7391_v31 = vpack.c.bf16 %v6170_v23, %v6169_v35 }
 0x8db   :  { %7392 = vmatpush3.bf16.msra.mxu1 %v7391_v31 }
 0x8dc   :  { %7393 = vmatprep.subr.bf16.mxu1 %v8761_v10 }
 0x8df   :  { %7395 = vmatpush3.bf16.msra.mxu1 %v7394_v15 }
 0x8e0   :  { %7396 = vmatprep.subr.bf16.mxu1 %v8761_v10 }
 0x8e3   :  { %7398 = vmatpush3.bf16.msra.mxu1 %v7397_v24 }
 0x989   :  { %v5987_v25 = vpop.f32.mrb[40].mxu1 }
 0x98a   :  { %v7342_v55 = vpop.f32.mrb[41].mxu1 }
 0x98b   :  { %v5990_v32 = vpop.f32.mrb[42].mxu1 }
 0x98c   :  { %v7343_v56 = vpop.f32.mrb[43].mxu1 }
 0x999   :  { %v6055_v37 = vpop.f32.mrb[44].mxu1 }
 0x99a   :  { %v6056_v47 = vadd.f32 %v6055_v37, %v5987_v25  ;;  %v7354_v29 = vpop.f32.mrb[45].mxu1 }
 0x99b   :  { %v6058_v49 = vpop.f32.mrb[46].mxu1 }
 0x99c   :  { %v6059_v40 = vadd.f32 %v6058_v49, %v5990_v32  ;;  %v7355_v42 = vpop.f32.mrb[47].mxu1 }
 0x9a9   :  { %v6131_v44 = vpop.f32.mrb[48].mxu1 }
 0x9aa   :  { %v6138_v19 = vadd.f32 %v6131_v44, %v6056_v47  ;;  %v7366_v30 = vpop.f32.mrb[49].mxu1 }
 0x9ab   :  { %v6134_v43 = vpop.f32.mrb[50].mxu1 }
 0x9ac   :  { %v6147_v34 = vadd.f32 %v7065_v45, %v6138_v19  ;;  %v6139_v1 = vadd.f32 %v6134_v43, %v6059_v40  ;;  %v7367_v2 = vpop.f32.mrb[51].mxu1 }
 0x9ae   :  { %v6149_v5 = vmax.f32 %v6147_v34, 0.0  ;;  %v6148_v46 = vadd.f32 %v7065_v45, %v6139_v1 }
 0x9b0   :  { %v6151_v48 = vsel %vm5949_vm9, %v6149_v5, 0.0  ;;  %v6150_v50 = vmax.f32 %v6148_v46, 0.0 }
 0x9b1   :  { %v6152_v52 = vrot.slane %v6151_v48, 4 }
 0x9b2   :  { %v6158_v54 = vsel %vm5949_vm9, %v6150_v50, 0.0 }
 0x9b3   :  { %v6153_v6 = vadd.f32 %v6152_v52, %v6151_v48  ;;  %v6159_v61 = vrot.slane %v6158_v54, 4 }
 0x9b5   :  { %v6154_v14 = vrot.slane %v6153_v6, 2  ;;  %v6160_v22 = vadd.f32 %v6159_v61, %v6158_v54 }
 0x9b7   :  { %v6155_v8 = vadd.f32 %v6154_v14, %v6153_v6  ;;  %v6161_v59 = vrot.slane %v6160_v22, 2 }
 0x9b9   :  { %v6156_v62 = vrot.slane %v6155_v8, 1  ;;  %v6162_v63 = vadd.f32 %v6161_v59, %v6160_v22 }
 0x9bb   :  { %v6157_v7 = vadd.f32 %v6156_v62, %v6155_v8  ;;  %v6163_v11 = vrot.slane %v6162_v63, 1 }
 0x9bd   :  { %v6164_v12 = vadd.f32 %v6163_v11, %v6162_v63  ;;  %v6165_v26 = vmul.f32 0.125, %v6157_v7 }
 0x9bf   :  { %v6166_v16 = vmul.f32 0.125, %v6164_v12 }
 0x9c1   :  { %v6185_v17 = vsel %vm6184_vm10, %v6166_v16, %v6165_v26 }
 0x9c2   :  { %7385 = vmatmul.mubr.msk.f32.vlgmr.msra.gmra.mrb[52].mxu1 %vm5949_vm9, %v6185_v17 }
 0xa95   :  { %v6254_v60 = vpop.f32.mrb[52].mxu1 }
 0xa96   :  { %v6255_v13 = vadd.f32 %v7066_v18, %v6254_v60  ;;  %v7386_v4 = vpop.f32.mrb[53].mxu1 }
 0xa98   :  { %6258 = vst [vmem:[#allocation20] sm:$0x3] %v6255_v13 }
 0xa99   :  { %8715 = shalt.err (!%p8712_p8)
}
 0xa9a   :  { %s8716_s3 = scalar_lea.hbm %s9621_s15, 32 }
 0xa9b   :  { %p8717_p9 = scmp.ne.s32.totalorder %s9621_s15, %s8716_s3  ;;  %p8720_p10 = scmp.lt.u32.totalorder %s8716_s3, %s9621_s15 }
 0xa9d   :  { %p8722_p11 = pnand %p8720_p10, %p8717_p9 }
 0xa9f   :  { %8725 = shalt.err (!%p8722_p11)
}
 0xaa0   :  { %6268 = dma.vmem_to_hbm [thread:$0]  %s6266_s21, 32, %s9621_s15, [#allocation4]  }
 0xaa1   :  { %8738 = dma.done.wait [#allocation4], 32  }
 0xaa2   :  { %8739 = vsyncadd [#allocation4], 4294967264 }
 0xaa3   :  { %6272 = vsyncpa [#allocation3], 1 }
 0xaa4   :  { %6273 = vsyncpa [#allocation6], 1 }
 0xaa5   :  { %6274 = vsyncpa [#allocation9], 1 }
 0xaa6   :  { %6275 = vsyncpa [#allocation12], 1 }
 0xaa7   :  { %6276 = vsyncpa [#allocation15], 1 }
 0xaa8   :  { %6277 = vsyncpa [#allocation18], 1 }
 0xaa9   :  { %6278 = vsyncpa [#allocation4], 1 }

</bundles_post_ra>
